<compile_context>
chip_gen: v6e
topology: v6e:2x2x1
jax: 0.10.0
libtpu: 0.0.40
codegen_flags: <defaults>
</compile_context>

<pallas_src>
import functools

import jax
import jax.numpy as jnp
from jax.experimental import pallas as pl
from jax.experimental.pallas import tpu as pltpu

LANE = 128  # TPU vreg lane width; features are padded to a multiple of this.


# --------------------------------------------------------------------------
# Fused Pallas kernel: 1x1 convs + all TemporalAwareBlock pairs + skip means
# --------------------------------------------------------------------------

def _timnet_kernel(x_ref, w0_ref, b0_ref, wf_ref, bf_ref, wb_ref, bb_ref,
                   out_ref, *, Bt, T, Fp, k, dilations):
    # x_ref : (Bt, T, Fp) bf16         input slab (Bt batch elements)
    # w0_ref: (2, Fp, Fp) bf16         1x1 conv weights [fwd, bwd]
    # b0_ref: (2, 1, Fp)  f32          1x1 conv biases
    # wf/wb : (n_blocks*2*k, Fp, Fp) bf16   per-block/conv/tap weights, BN-folded
    # bf/bb : (n_blocks*2, 1, Fp) f32       fused biases (b*scale + shift)
    # out   : (Bt, n_blocks, Fp) f32        skip outputs
    M = Bt * T
    x = x_ref[...].reshape(M, Fp)          # batch folded into the matmul M dim

    # Per-row time index (hoisted once); full lane width avoids (M,1) broadcasts.
    t_idx = jax.lax.broadcasted_iota(jnp.int32, (Bt, T, Fp), 1).reshape(M, Fp)

    def shift_time(y, s, causal):
        # Per-batch-element time shift by s with zero fill (f32 in/out).
        #   causal      : out[b, t] = y[b, t-s]   (zeros for t <  s)
        #   anti-causal : out[b, t] = y[b, t+s]   (zeros for t >= T-s)
        # Flat sublane roll over (Bt*T) + mask: the wrapped rows are exactly
        # the rows the mask zeroes, so crossing batch boundaries is harmless.
        if s == 0:
            return y
        if s >= T:
            return jnp.zeros_like(y)
        if causal:
            rolled = pltpu.roll(y, s, 0)           # out[r] = y[r-s]
            keep = t_idx >= s
        else:
            rolled = pltpu.roll(y, M - s, 0)       # out[r] = y[r+s]
            keep = t_idx < (T - s)
        return jnp.where(keep, rolled, 0.0)

    def conv(y, w_ref, b_ref, l, c, d, causal):
        # Dilated (anti-)causal conv; BatchNorm (eval) pre-folded into W and b.
        # One accumulating MXU dot per tap — no lane-axis concatenation.
        acc = b_ref[2 * l + c]                     # (1, Fp) f32, broadcasts over M
        for j in range(k):
            s = (k - 1 - j) * d
            op = shift_time(y, s, causal).astype(jnp.bfloat16)
            acc = acc + jnp.dot(op, w_ref[(2 * l + c) * k + j],
                                preferred_element_type=jnp.float32)
        return acc

    def tab(y, w_ref, b_ref, l, d, causal):
        z = jnp.maximum(conv(y, w_ref, b_ref, l, 0, d, causal), 0.0)   # relu
        z = jnp.maximum(conv(z, w_ref, b_ref, l, 1, d, causal), 0.0)   # relu
        return y * jax.nn.sigmoid(z)                                   # gated residual

    # kernel_size=1 causal conv == pointwise matmul (nothing to trim).
    sf = jnp.dot(x, w0_ref[0], preferred_element_type=jnp.float32) + b0_ref[0]
    sb = jnp.dot(x, w0_ref[1], preferred_element_type=jnp.float32) + b0_ref[1]

    for l, d in enumerate(dilations):              # static unroll over blocks
        sf = tab(sf, wf_ref, bf_ref, l, d, causal=True)
        sb = tab(sb, wb_ref, bb_ref, l, d, causal=False)
        # AdaptiveAvgPool1d(1) over time of (sf + sb): the mean is time-order
        # invariant, so the un-flipped backward stream gives identical skips.
        skip = jnp.mean((sf + sb).reshape(Bt, T, Fp), axis=1)   # (Bt, Fp) f32
        out_ref[:, l, :] = skip


def _pick_batch_tile(B, T, target_rows=512):
    # Largest divisor of B with Bt*T <= target_rows (keeps the handful of live
    # (Bt*T, Fp) f32 slabs far under VMEM, even on v7x's 64 MiB), while keeping
    # >= 2 grid steps when B >= 2 so both v7x TensorCores get work.
    best = 1
    for bt in range(2, B + 1):
        if B % bt:
            continue
        if bt * T > target_rows:
            break
        if B // bt < 2:
            continue
        best = bt
    return best


def timnet_forward(x, packed, *, kernel_size, dilations, batch_tile=None):
    """Full TIMNET forward (eval mode) in one pallas_call."""
    B, T, F = x.shape
    n_blocks = len(dilations)
    k = kernel_size
    Fp = packed['w0'].shape[-1]                    # lane-padded feature width

    if Fp != F:                                    # lane-dense feature axis
        x = jnp.pad(x, ((0, 0), (0, 0), (0, Fp - F)))
    x = x.astype(jnp.bfloat16)                     # bf16 operands, f32 accumulate

    Bt = batch_tile if batch_tile is not None else _pick_batch_tile(B, T)
    assert B % Bt == 0, (B, Bt)

    kern = functools.partial(_timnet_kernel, Bt=Bt, T=T, Fp=Fp, k=k,
                             dilations=tuple(dilations))
    out = pl.pallas_call(
        kern,
        out_shape=jax.ShapeDtypeStruct((B, n_blocks, Fp), jnp.float32),
        grid=(B // Bt,),
        in_specs=[
            pl.BlockSpec((Bt, T, Fp), lambda b: (b, 0, 0)),
            # Grid-invariant index_maps: weights stay resident in VMEM.
            pl.BlockSpec((2, Fp, Fp), lambda b: (0, 0, 0)),
            pl.BlockSpec((2, 1, Fp), lambda b: (0, 0, 0)),
            pl.BlockSpec((n_blocks * 2 * k, Fp, Fp), lambda b: (0, 0, 0)),
            pl.BlockSpec((n_blocks * 2, 1, Fp), lambda b: (0, 0, 0)),
            pl.BlockSpec((n_blocks * 2 * k, Fp, Fp), lambda b: (0, 0, 0)),
            pl.BlockSpec((n_blocks * 2, 1, Fp), lambda b: (0, 0, 0)),
        ],
        out_specs=pl.BlockSpec((Bt, n_blocks, Fp), lambda b: (b, 0, 0)),
        compiler_params=pltpu.CompilerParams(
            dimension_semantics=("parallel",)),
    )(x, packed['w0'], packed['b0'], packed['wf'], packed['bf'],
      packed['wb'], packed['bb'])
    return out[:, :, :F]                           # drop lane padding


# --------------------------------------------------------------------------
# Parameter initialization (PyTorch-like) and packing (BN folding + padding)
# --------------------------------------------------------------------------

def init_timnet_params(key, nb_filters, kernel_size, dilations):
    """Deterministic PyTorch-style Conv1d init + randomized eval-mode BatchNorm
    statistics (so BN folding is actually exercised by the test)."""
    F, k = nb_filters, kernel_size
    s1 = 1.0 / float(F) ** 0.5            # Conv1d uniform bound, kernel_size=1
    sk = 1.0 / float(F * k) ** 0.5        # Conv1d uniform bound, kernel_size=k
    keys = iter(jax.random.split(key, 4 + 24 * len(dilations)))

    def u(shape, lo, hi):
        return jax.random.uniform(next(keys), shape, jnp.float32, lo, hi)

    def bn_eval(eps=1e-5):                # eval-mode affine: y = x*scale + shift
        gamma = u((F,), 0.5, 1.5)
        beta = u((F,), -0.1, 0.1)
        mean = u((F,), -0.2, 0.2)
        var = u((F,), 0.5, 1.5)
        scale = gamma / jnp.sqrt(var + eps)
        return scale, beta - mean * scale

    raw = {'w0f': u((F, F), -s1, s1), 'b0f': u((F,), -s1, s1),
           'w0b': u((F, F), -s1, s1), 'b0b': u((F,), -s1, s1),
           'blocks_f': [], 'blocks_b': []}
    for _ in dilations:
        for dst in (raw['blocks_f'], raw['blocks_b']):
            blk = {}
            for c in (1, 2):
                blk[f'w{c}'] = u((k, F, F), -sk, sk)   # tap-major (k, Fin, Fout)
                blk[f'b{c}'] = u((F,), -sk, sk)
                blk[f's{c}'], blk[f't{c}'] = bn_eval()
            dst.append(blk)
    return raw


def pack_params(raw, *, nb_filters, kernel_size, lane=LANE):
    """Fold eval BatchNorm into the conv weights/biases, zero-pad features to a
    multiple of 128 lanes, cast matmul weights to bf16, pack for the kernel."""
    F, k = nb_filters, kernel_size
    Fp = ((F + lane - 1) // lane) * lane

    def pad_mat(w):                                   # (F, F) -> (Fp, Fp)
        return jnp.zeros((Fp, Fp), jnp.float32).at[:F, :F].set(w)

    def pad_row(v):                                   # (F,)  -> (1, Fp)
        return jnp.zeros((1, Fp), jnp.float32).at[0, :F].set(v)

    w0 = jnp.stack([pad_mat(raw['w0f']), pad_mat(raw['w0b'])]).astype(jnp.bfloat16)
    b0 = jnp.stack([pad_row(raw['b0f']), pad_row(raw['b0b'])])          # f32

    def pack_stream(blocks):
        ws, bs = [], []
        for blk in blocks:
            for c in (1, 2):
                w, b = blk[f'w{c}'], blk[f'b{c}']
                scale, shift = blk[f's{c}'], blk[f't{c}']
                for j in range(k):
                    ws.append(pad_mat(w[j] * scale[None, :]))   # fold BN scale
                bs.append(pad_row(b * scale + shift))           # fold BN shift
        return (jnp.stack(ws).astype(jnp.bfloat16),   # (n_blocks*2*k, Fp, Fp)
                jnp.stack(bs))                          # (n_blocks*2, 1, Fp) f32

    wf, bf = pack_stream(raw['blocks_f'])
    wb, bb = pack_stream(raw['blocks_b'])
    return {'w0': w0, 'b0': b0, 'wf': wf, 'bf': bf, 'wb': wb, 'bb': bb}


# --------------------------------------------------------------------------
# Pure-JAX reference (mirrors the PyTorch module literally, with the flip)
# --------------------------------------------------------------------------

def timnet_reference(x, raw, kernel_size, dilations):
    k = kernel_size
    B, T, F = x.shape

    def causal_conv(a, w_taps, b, d):
        out = jnp.zeros(a.shape, jnp.float32)
        for j in range(k):
            s = (k - 1 - j) * d
            if s == 0:
                shifted = a
            elif s >= T:
                shifted = jnp.zeros_like(a)
            else:
                shifted = jnp.concatenate(
                    [jnp.zeros_like(a[:, :s]), a[:, :T - s]], axis=1)
            out = out + jnp.einsum('btf,fg->btg', shifted, w_taps[j])
        return out + b[None, None, :]

    def tab(a, blk, d):
        z = causal_conv(a, blk['w1'], blk['b1'], d)
        z = jnp.maximum(z * blk['s1'][None, None] + blk['t1'][None, None], 0.0)
        z = causal_conv(z, blk['w2'], blk['b2'], d)
        z = jnp.maximum(z * blk['s2'][None, None] + blk['t2'][None, None], 0.0)
        return a * jax.nn.sigmoid(z)

    xf, xb = x, x[:, ::-1, :]                          # torch.flip(dims=[1])
    sf = jnp.einsum('btf,fg->btg', xf, raw['w0f']) + raw['b0f'][None, None]
    sb = jnp.einsum('btf,fg->btg', xb, raw['w0b']) + raw['b0b'][None, None]
    skips = []
    for l, d in enumerate(dilations):
        sf = tab(sf, raw['blocks_f'][l], d)
        sb = tab(sb, raw['blocks_b'][l], d)
        skips.append(jnp.mean(sf + sb, axis=1, keepdims=True))
    return jnp.concatenate(skips, axis=1)


# --------------------------------------------------------------------------

if __name__ == "__main__":
    B, T, NB_FILTERS = 2, 16, 32
    KERNEL_SIZE = 2
    DILATIONS = (1, 2, 4, 8)          # static config (tuple => hashable for jit)

    key = jax.random.PRNGKey(0)
    kx, kp = jax.random.split(key)
    x = jax.random.normal(kx, (B, T, NB_FILTERS), jnp.float32)
    raw = init_timnet_params(kp, NB_FILTERS, KERNEL_SIZE, DILATIONS)
    packed = pack_params(raw, nb_filters=NB_FILTERS, kernel_size=KERNEL_SIZE)

    fwd = jax.jit(timnet_forward,
                  static_argnames=("kernel_size", "dilations", "batch_tile"))
    out = jax.block_until_ready(
        fwd(x, packed, kernel_size=KERNEL_SIZE, dilations=DILATIONS))
    ref = jax.block_until_ready(
        timnet_reference(x, raw, KERNEL_SIZE, DILATIONS))

    assert out.shape == (B, len(DILATIONS), NB_FILTERS), out.shape
    assert bool(jnp.all(jnp.isfinite(out)))
    # Kernel uses explicit bf16 MXU operands with f32 accumulation; the f32
    # reference at default TPU precision rounds operands to bf16 as well, so a
    # few-e-2 tolerance covers the accumulated single-pass bf16 error.
    err = float(jnp.max(jnp.abs(out - ref)))
    assert jnp.allclose(out, ref, atol=3e-2, rtol=3e-2), f"max abs err {err}"

    print("KERNEL_OK")
</pallas_src>

<mosaic_0001>
module attributes {stable_mosaic.version = 11 : i64} {
  func.func @_timnet_kernel(%arg0: i32, %arg1: memref<1x16x128xbf16, #tpu.memory_space<vmem>>, %arg2: memref<2x128x128xbf16, #tpu.memory_space<vmem>>, %arg3: memref<2x1x128xf32, #tpu.memory_space<vmem>>, %arg4: memref<16x128x128xbf16, #tpu.memory_space<vmem>>, %arg5: memref<8x1x128xf32, #tpu.memory_space<vmem>>, %arg6: memref<16x128x128xbf16, #tpu.memory_space<vmem>>, %arg7: memref<8x1x128xf32, #tpu.memory_space<vmem>>, %arg8: memref<1x4x128xf32, #tpu.memory_space<vmem>>) attributes {dimension_semantics = [#tpu.dimension_semantics<parallel>], iteration_bounds = array<i64: 2>, scalar_prefetch = 0 : i64, scratch_operands = 0 : i64, tpu.core_type = #tpu.core_type<tc>, window_params = [{transform_indices = @transform_0, window_bounds = array<i64: 1, 16, 128>}, {pipeline_mode = #tpu.pipeline_mode<synchronous>, transform_indices = @transform_1, window_bounds = array<i64: 2, 128, 128>}, {pipeline_mode = #tpu.pipeline_mode<synchronous>, transform_indices = @transform_2, window_bounds = array<i64: 2, 1, 128>}, {pipeline_mode = #tpu.pipeline_mode<synchronous>, transform_indices = @transform_3, window_bounds = array<i64: 16, 128, 128>}, {pipeline_mode = #tpu.pipeline_mode<synchronous>, transform_indices = @transform_4, window_bounds = array<i64: 8, 1, 128>}, {pipeline_mode = #tpu.pipeline_mode<synchronous>, transform_indices = @transform_5, window_bounds = array<i64: 16, 128, 128>}, {pipeline_mode = #tpu.pipeline_mode<synchronous>, transform_indices = @transform_6, window_bounds = array<i64: 8, 1, 128>}, {transform_indices = @transform_7, window_bounds = array<i64: 1, 4, 128>}]} {
    %c0 = arith.constant 0 : index
    %c0_0 = arith.constant 0 : index
    %c0_1 = arith.constant 0 : index
    %0 = vector.load %arg1[%c0, %c0_0, %c0_1] : memref<1x16x128xbf16, #tpu.memory_space<vmem>>, vector<1x16x128xbf16>
    %1 = vector.shape_cast %0 : vector<1x16x128xbf16> to vector<16x128xbf16>
    %2 = tpu.iota {dimensions = array<i32: 1>} : vector<1x16x128xi32>
    %3 = vector.shape_cast %2 : vector<1x16x128xi32> to vector<16x128xi32>
    %c0_2 = arith.constant 0 : index
    %c0_3 = arith.constant 0 : index
    %c0_4 = arith.constant 0 : index
    %4 = vector.load %arg2[%c0_2, %c0_3, %c0_4] : memref<2x128x128xbf16, #tpu.memory_space<vmem>>, vector<1x128x128xbf16>
    %5 = vector.shape_cast %4 : vector<1x128x128xbf16> to vector<128x128xbf16>
    %cst = arith.constant dense<0.000000e+00> : vector<16x128xf32>
    %6 = tpu.matmul %1, %5, %cst {dimension_numbers = #tpu.dot_dimension_numbers<[1], [0], [0], [1], [0, 0, 1, 1], [], []>} : vector<16x128xbf16>, vector<128x128xbf16>, vector<16x128xf32> -> vector<16x128xf32>
    %c0_5 = arith.constant 0 : index
    %c0_6 = arith.constant 0 : index
    %c0_7 = arith.constant 0 : index
    %7 = vector.load %arg3[%c0_5, %c0_6, %c0_7] : memref<2x1x128xf32, #tpu.memory_space<vmem>>, vector<1x1x128xf32>
    %8 = vector.shape_cast %7 : vector<1x1x128xf32> to vector<1x128xf32>
    %9 = vector.broadcast %8 : vector<1x128xf32> to vector<16x128xf32>
    %10 = arith.addf %6, %9 : vector<16x128xf32>
    %c1 = arith.constant 1 : index
    %c0_8 = arith.constant 0 : index
    %c0_9 = arith.constant 0 : index
    %11 = vector.load %arg2[%c1, %c0_8, %c0_9] : memref<2x128x128xbf16, #tpu.memory_space<vmem>>, vector<1x128x128xbf16>
    %12 = vector.shape_cast %11 : vector<1x128x128xbf16> to vector<128x128xbf16>
    %cst_10 = arith.constant dense<0.000000e+00> : vector<16x128xf32>
    %13 = tpu.matmul %1, %12, %cst_10 {dimension_numbers = #tpu.dot_dimension_numbers<[1], [0], [0], [1], [0, 0, 1, 1], [], []>} : vector<16x128xbf16>, vector<128x128xbf16>, vector<16x128xf32> -> vector<16x128xf32>
    %c1_11 = arith.constant 1 : index
    %c0_12 = arith.constant 0 : index
    %c0_13 = arith.constant 0 : index
    %14 = vector.load %arg3[%c1_11, %c0_12, %c0_13] : memref<2x1x128xf32, #tpu.memory_space<vmem>>, vector<1x1x128xf32>
    %15 = vector.shape_cast %14 : vector<1x1x128xf32> to vector<1x128xf32>
    %16 = vector.broadcast %15 : vector<1x128xf32> to vector<16x128xf32>
    %17 = arith.addf %13, %16 : vector<16x128xf32>
    %c0_14 = arith.constant 0 : index
    %c0_15 = arith.constant 0 : index
    %c0_16 = arith.constant 0 : index
    %18 = vector.load %arg5[%c0_14, %c0_15, %c0_16] : memref<8x1x128xf32, #tpu.memory_space<vmem>>, vector<1x1x128xf32>
    %19 = vector.shape_cast %18 : vector<1x1x128xf32> to vector<1x128xf32>
    %c1_i32 = arith.constant 1 : i32
    %20 = tpu.dynamic_rotate %10 by %c1_i32 dim 0 : vector<16x128xf32>, i32 -> vector<16x128xf32>
    %c1_i32_17 = arith.constant 1 : i32
    %21 = vector.broadcast %c1_i32_17 : i32 to vector<16x128xi32>
    %22 = arith.cmpi sge, %3, %21 : vector<16x128xi32>
    %cst_18 = arith.constant 0.000000e+00 : f32
    %23 = vector.broadcast %cst_18 : f32 to vector<16x128xf32>
    %24 = arith.select %22, %20, %23 : vector<16x128xi1>, vector<16x128xf32>
    %25 = arith.truncf %24 : vector<16x128xf32> to vector<16x128xbf16>
    %c0_19 = arith.constant 0 : index
    %c0_20 = arith.constant 0 : index
    %c0_21 = arith.constant 0 : index
    %26 = vector.load %arg4[%c0_19, %c0_20, %c0_21] : memref<16x128x128xbf16, #tpu.memory_space<vmem>>, vector<1x128x128xbf16>
    %27 = vector.shape_cast %26 : vector<1x128x128xbf16> to vector<128x128xbf16>
    %cst_22 = arith.constant dense<0.000000e+00> : vector<16x128xf32>
    %28 = tpu.matmul %25, %27, %cst_22 {dimension_numbers = #tpu.dot_dimension_numbers<[1], [0], [0], [1], [0, 0, 1, 1], [], []>} : vector<16x128xbf16>, vector<128x128xbf16>, vector<16x128xf32> -> vector<16x128xf32>
    %29 = vector.broadcast %19 : vector<1x128xf32> to vector<16x128xf32>
    %30 = arith.addf %29, %28 : vector<16x128xf32>
    %31 = arith.truncf %10 : vector<16x128xf32> to vector<16x128xbf16>
    %c1_23 = arith.constant 1 : index
    %c0_24 = arith.constant 0 : index
    %c0_25 = arith.constant 0 : index
    %32 = vector.load %arg4[%c1_23, %c0_24, %c0_25] : memref<16x128x128xbf16, #tpu.memory_space<vmem>>, vector<1x128x128xbf16>
    %33 = vector.shape_cast %32 : vector<1x128x128xbf16> to vector<128x128xbf16>
    %cst_26 = arith.constant dense<0.000000e+00> : vector<16x128xf32>
    %34 = tpu.matmul %31, %33, %cst_26 {dimension_numbers = #tpu.dot_dimension_numbers<[1], [0], [0], [1], [0, 0, 1, 1], [], []>} : vector<16x128xbf16>, vector<128x128xbf16>, vector<16x128xf32> -> vector<16x128xf32>
    %35 = arith.addf %30, %34 : vector<16x128xf32>
    %cst_27 = arith.constant 0.000000e+00 : f32
    %36 = vector.broadcast %cst_27 : f32 to vector<16x128xf32>
    %37 = arith.maximumf %35, %36 : vector<16x128xf32>
    %c1_28 = arith.constant 1 : index
    %c0_29 = arith.constant 0 : index
    %c0_30 = arith.constant 0 : index
    %38 = vector.load %arg5[%c1_28, %c0_29, %c0_30] : memref<8x1x128xf32, #tpu.memory_space<vmem>>, vector<1x1x128xf32>
    %39 = vector.shape_cast %38 : vector<1x1x128xf32> to vector<1x128xf32>
    %c1_i32_31 = arith.constant 1 : i32
    %40 = tpu.dynamic_rotate %37 by %c1_i32_31 dim 0 : vector<16x128xf32>, i32 -> vector<16x128xf32>
    %c1_i32_32 = arith.constant 1 : i32
    %41 = vector.broadcast %c1_i32_32 : i32 to vector<16x128xi32>
    %42 = arith.cmpi sge, %3, %41 : vector<16x128xi32>
    %cst_33 = arith.constant 0.000000e+00 : f32
    %43 = vector.broadcast %cst_33 : f32 to vector<16x128xf32>
    %44 = arith.select %42, %40, %43 : vector<16x128xi1>, vector<16x128xf32>
    %45 = arith.truncf %44 : vector<16x128xf32> to vector<16x128xbf16>
    %c2 = arith.constant 2 : index
    %c0_34 = arith.constant 0 : index
    %c0_35 = arith.constant 0 : index
    %46 = vector.load %arg4[%c2, %c0_34, %c0_35] : memref<16x128x128xbf16, #tpu.memory_space<vmem>>, vector<1x128x128xbf16>
    %47 = vector.shape_cast %46 : vector<1x128x128xbf16> to vector<128x128xbf16>
    %cst_36 = arith.constant dense<0.000000e+00> : vector<16x128xf32>
    %48 = tpu.matmul %45, %47, %cst_36 {dimension_numbers = #tpu.dot_dimension_numbers<[1], [0], [0], [1], [0, 0, 1, 1], [], []>} : vector<16x128xbf16>, vector<128x128xbf16>, vector<16x128xf32> -> vector<16x128xf32>
    %49 = vector.broadcast %39 : vector<1x128xf32> to vector<16x128xf32>
    %50 = arith.addf %49, %48 : vector<16x128xf32>
    %51 = arith.truncf %37 : vector<16x128xf32> to vector<16x128xbf16>
    %c3 = arith.constant 3 : index
    %c0_37 = arith.constant 0 : index
    %c0_38 = arith.constant 0 : index
    %52 = vector.load %arg4[%c3, %c0_37, %c0_38] : memref<16x128x128xbf16, #tpu.memory_space<vmem>>, vector<1x128x128xbf16>
    %53 = vector.shape_cast %52 : vector<1x128x128xbf16> to vector<128x128xbf16>
    %cst_39 = arith.constant dense<0.000000e+00> : vector<16x128xf32>
    %54 = tpu.matmul %51, %53, %cst_39 {dimension_numbers = #tpu.dot_dimension_numbers<[1], [0], [0], [1], [0, 0, 1, 1], [], []>} : vector<16x128xbf16>, vector<128x128xbf16>, vector<16x128xf32> -> vector<16x128xf32>
    %55 = arith.addf %50, %54 : vector<16x128xf32>
    %cst_40 = arith.constant 0.000000e+00 : f32
    %56 = vector.broadcast %cst_40 : f32 to vector<16x128xf32>
    %57 = arith.maximumf %55, %56 : vector<16x128xf32>
    %58 = arith.negf %57 : vector<16x128xf32>
    %59 = math.exp %58 : vector<16x128xf32>
    %cst_41 = arith.constant 1.000000e+00 : f32
    %60 = vector.broadcast %cst_41 : f32 to vector<16x128xf32>
    %61 = arith.addf %60, %59 : vector<16x128xf32>
    %62 = arith.divf %60, %61 : vector<16x128xf32>
    %63 = arith.mulf %10, %62 : vector<16x128xf32>
    %c0_42 = arith.constant 0 : index
    %c0_43 = arith.constant 0 : index
    %c0_44 = arith.constant 0 : index
    %64 = vector.load %arg7[%c0_42, %c0_43, %c0_44] : memref<8x1x128xf32, #tpu.memory_space<vmem>>, vector<1x1x128xf32>
    %65 = vector.shape_cast %64 : vector<1x1x128xf32> to vector<1x128xf32>
    %c15_i32 = arith.constant 15 : i32
    %66 = tpu.dynamic_rotate %17 by %c15_i32 dim 0 : vector<16x128xf32>, i32 -> vector<16x128xf32>
    %c15_i32_45 = arith.constant 15 : i32
    %67 = vector.broadcast %c15_i32_45 : i32 to vector<16x128xi32>
    %68 = arith.cmpi slt, %3, %67 : vector<16x128xi32>
    %cst_46 = arith.constant 0.000000e+00 : f32
    %69 = vector.broadcast %cst_46 : f32 to vector<16x128xf32>
    %70 = arith.select %68, %66, %69 : vector<16x128xi1>, vector<16x128xf32>
    %71 = arith.truncf %70 : vector<16x128xf32> to vector<16x128xbf16>
    %c0_47 = arith.constant 0 : index
    %c0_48 = arith.constant 0 : index
    %c0_49 = arith.constant 0 : index
    %72 = vector.load %arg6[%c0_47, %c0_48, %c0_49] : memref<16x128x128xbf16, #tpu.memory_space<vmem>>, vector<1x128x128xbf16>
    %73 = vector.shape_cast %72 : vector<1x128x128xbf16> to vector<128x128xbf16>
    %cst_50 = arith.constant dense<0.000000e+00> : vector<16x128xf32>
    %74 = tpu.matmul %71, %73, %cst_50 {dimension_numbers = #tpu.dot_dimension_numbers<[1], [0], [0], [1], [0, 0, 1, 1], [], []>} : vector<16x128xbf16>, vector<128x128xbf16>, vector<16x128xf32> -> vector<16x128xf32>
    %75 = vector.broadcast %65 : vector<1x128xf32> to vector<16x128xf32>
    %76 = arith.addf %75, %74 : vector<16x128xf32>
    %77 = arith.truncf %17 : vector<16x128xf32> to vector<16x128xbf16>
    %c1_51 = arith.constant 1 : index
    %c0_52 = arith.constant 0 : index
    %c0_53 = arith.constant 0 : index
    %78 = vector.load %arg6[%c1_51, %c0_52, %c0_53] : memref<16x128x128xbf16, #tpu.memory_space<vmem>>, vector<1x128x128xbf16>
    %79 = vector.shape_cast %78 : vector<1x128x128xbf16> to vector<128x128xbf16>
    %cst_54 = arith.constant dense<0.000000e+00> : vector<16x128xf32>
    %80 = tpu.matmul %77, %79, %cst_54 {dimension_numbers = #tpu.dot_dimension_numbers<[1], [0], [0], [1], [0, 0, 1, 1], [], []>} : vector<16x128xbf16>, vector<128x128xbf16>, vector<16x128xf32> -> vector<16x128xf32>
    %81 = arith.addf %76, %80 : vector<16x128xf32>
    %cst_55 = arith.constant 0.000000e+00 : f32
    %82 = vector.broadcast %cst_55 : f32 to vector<16x128xf32>
    %83 = arith.maximumf %81, %82 : vector<16x128xf32>
    %c1_56 = arith.constant 1 : index
    %c0_57 = arith.constant 0 : index
    %c0_58 = arith.constant 0 : index
    %84 = vector.load %arg7[%c1_56, %c0_57, %c0_58] : memref<8x1x128xf32, #tpu.memory_space<vmem>>, vector<1x1x128xf32>
    %85 = vector.shape_cast %84 : vector<1x1x128xf32> to vector<1x128xf32>
    %c15_i32_59 = arith.constant 15 : i32
    %86 = tpu.dynamic_rotate %83 by %c15_i32_59 dim 0 : vector<16x128xf32>, i32 -> vector<16x128xf32>
    %c15_i32_60 = arith.constant 15 : i32
    %87 = vector.broadcast %c15_i32_60 : i32 to vector<16x128xi32>
    %88 = arith.cmpi slt, %3, %87 : vector<16x128xi32>
    %cst_61 = arith.constant 0.000000e+00 : f32
    %89 = vector.broadcast %cst_61 : f32 to vector<16x128xf32>
    %90 = arith.select %88, %86, %89 : vector<16x128xi1>, vector<16x128xf32>
    %91 = arith.truncf %90 : vector<16x128xf32> to vector<16x128xbf16>
    %c2_62 = arith.constant 2 : index
    %c0_63 = arith.constant 0 : index
    %c0_64 = arith.constant 0 : index
    %92 = vector.load %arg6[%c2_62, %c0_63, %c0_64] : memref<16x128x128xbf16, #tpu.memory_space<vmem>>, vector<1x128x128xbf16>
    %93 = vector.shape_cast %92 : vector<1x128x128xbf16> to vector<128x128xbf16>
    %cst_65 = arith.constant dense<0.000000e+00> : vector<16x128xf32>
    %94 = tpu.matmul %91, %93, %cst_65 {dimension_numbers = #tpu.dot_dimension_numbers<[1], [0], [0], [1], [0, 0, 1, 1], [], []>} : vector<16x128xbf16>, vector<128x128xbf16>, vector<16x128xf32> -> vector<16x128xf32>
    %95 = vector.broadcast %85 : vector<1x128xf32> to vector<16x128xf32>
    %96 = arith.addf %95, %94 : vector<16x128xf32>
    %97 = arith.truncf %83 : vector<16x128xf32> to vector<16x128xbf16>
    %c3_66 = arith.constant 3 : index
    %c0_67 = arith.constant 0 : index
    %c0_68 = arith.constant 0 : index
    %98 = vector.load %arg6[%c3_66, %c0_67, %c0_68] : memref<16x128x128xbf16, #tpu.memory_space<vmem>>, vector<1x128x128xbf16>
    %99 = vector.shape_cast %98 : vector<1x128x128xbf16> to vector<128x128xbf16>
    %cst_69 = arith.constant dense<0.000000e+00> : vector<16x128xf32>
    %100 = tpu.matmul %97, %99, %cst_69 {dimension_numbers = #tpu.dot_dimension_numbers<[1], [0], [0], [1], [0, 0, 1, 1], [], []>} : vector<16x128xbf16>, vector<128x128xbf16>, vector<16x128xf32> -> vector<16x128xf32>
    %101 = arith.addf %96, %100 : vector<16x128xf32>
    %cst_70 = arith.constant 0.000000e+00 : f32
    %102 = vector.broadcast %cst_70 : f32 to vector<16x128xf32>
    %103 = arith.maximumf %101, %102 : vector<16x128xf32>
    %104 = arith.negf %103 : vector<16x128xf32>
    %105 = math.exp %104 : vector<16x128xf32>
    %cst_71 = arith.constant 1.000000e+00 : f32
    %106 = vector.broadcast %cst_71 : f32 to vector<16x128xf32>
    %107 = arith.addf %106, %105 : vector<16x128xf32>
    %108 = arith.divf %106, %107 : vector<16x128xf32>
    %109 = arith.mulf %17, %108 : vector<16x128xf32>
    %110 = arith.addf %63, %109 : vector<16x128xf32>
    %111 = vector.shape_cast %110 : vector<16x128xf32> to vector<1x16x128xf32>
    %cst_72 = arith.constant dense<0.000000e+00> : vector<1x128xf32>
    %112 = vector.multi_reduction <add>, %111, %cst_72 [1] : vector<1x16x128xf32> to vector<1x128xf32>
    %cst_73 = arith.constant 1.600000e+01 : f32
    %113 = vector.broadcast %cst_73 : f32 to vector<1x128xf32>
    %114 = arith.divf %112, %113 : vector<1x128xf32>
    %c0_74 = arith.constant 0 : index
    %c0_75 = arith.constant 0 : index
    %c0_76 = arith.constant 0 : index
    %115 = vector.load %arg8[%c0_74, %c0_75, %c0_76] : memref<1x4x128xf32, #tpu.memory_space<vmem>>, vector<1x1x128xf32>
    %116 = vector.shape_cast %115 : vector<1x1x128xf32> to vector<1x128xf32>
    %117 = vector.shape_cast %114 : vector<1x128xf32> to vector<1x1x128xf32>
    tpu.vector_store %arg8[%c0_74, %c0_75, %c0_76], %117 {strides = array<i32>} : memref<1x4x128xf32, #tpu.memory_space<vmem>>, vector<1x1x128xf32>,
    %c2_77 = arith.constant 2 : index
    %c0_78 = arith.constant 0 : index
    %c0_79 = arith.constant 0 : index
    %118 = vector.load %arg5[%c2_77, %c0_78, %c0_79] : memref<8x1x128xf32, #tpu.memory_space<vmem>>, vector<1x1x128xf32>
    %119 = vector.shape_cast %118 : vector<1x1x128xf32> to vector<1x128xf32>
    %c2_i32 = arith.constant 2 : i32
    %120 = tpu.dynamic_rotate %63 by %c2_i32 dim 0 : vector<16x128xf32>, i32 -> vector<16x128xf32>
    %c2_i32_80 = arith.constant 2 : i32
    %121 = vector.broadcast %c2_i32_80 : i32 to vector<16x128xi32>
    %122 = arith.cmpi sge, %3, %121 : vector<16x128xi32>
    %cst_81 = arith.constant 0.000000e+00 : f32
    %123 = vector.broadcast %cst_81 : f32 to vector<16x128xf32>
    %124 = arith.select %122, %120, %123 : vector<16x128xi1>, vector<16x128xf32>
    %125 = arith.truncf %124 : vector<16x128xf32> to vector<16x128xbf16>
    %c4 = arith.constant 4 : index
    %c0_82 = arith.constant 0 : index
    %c0_83 = arith.constant 0 : index
    %126 = vector.load %arg4[%c4, %c0_82, %c0_83] : memref<16x128x128xbf16, #tpu.memory_space<vmem>>, vector<1x128x128xbf16>
    %127 = vector.shape_cast %126 : vector<1x128x128xbf16> to vector<128x128xbf16>
    %cst_84 = arith.constant dense<0.000000e+00> : vector<16x128xf32>
    %128 = tpu.matmul %125, %127, %cst_84 {dimension_numbers = #tpu.dot_dimension_numbers<[1], [0], [0], [1], [0, 0, 1, 1], [], []>} : vector<16x128xbf16>, vector<128x128xbf16>, vector<16x128xf32> -> vector<16x128xf32>
    %129 = vector.broadcast %119 : vector<1x128xf32> to vector<16x128xf32>
    %130 = arith.addf %129, %128 : vector<16x128xf32>
    %131 = arith.truncf %63 : vector<16x128xf32> to vector<16x128xbf16>
    %c5 = arith.constant 5 : index
    %c0_85 = arith.constant 0 : index
    %c0_86 = arith.constant 0 : index
    %132 = vector.load %arg4[%c5, %c0_85, %c0_86] : memref<16x128x128xbf16, #tpu.memory_space<vmem>>, vector<1x128x128xbf16>
    %133 = vector.shape_cast %132 : vector<1x128x128xbf16> to vector<128x128xbf16>
    %cst_87 = arith.constant dense<0.000000e+00> : vector<16x128xf32>
    %134 = tpu.matmul %131, %133, %cst_87 {dimension_numbers = #tpu.dot_dimension_numbers<[1], [0], [0], [1], [0, 0, 1, 1], [], []>} : vector<16x128xbf16>, vector<128x128xbf16>, vector<16x128xf32> -> vector<16x128xf32>
    %135 = arith.addf %130, %134 : vector<16x128xf32>
    %cst_88 = arith.constant 0.000000e+00 : f32
    %136 = vector.broadcast %cst_88 : f32 to vector<16x128xf32>
    %137 = arith.maximumf %135, %136 : vector<16x128xf32>
    %c3_89 = arith.constant 3 : index
    %c0_90 = arith.constant 0 : index
    %c0_91 = arith.constant 0 : index
    %138 = vector.load %arg5[%c3_89, %c0_90, %c0_91] : memref<8x1x128xf32, #tpu.memory_space<vmem>>, vector<1x1x128xf32>
    %139 = vector.shape_cast %138 : vector<1x1x128xf32> to vector<1x128xf32>
    %c2_i32_92 = arith.constant 2 : i32
    %140 = tpu.dynamic_rotate %137 by %c2_i32_92 dim 0 : vector<16x128xf32>, i32 -> vector<16x128xf32>
    %c2_i32_93 = arith.constant 2 : i32
    %141 = vector.broadcast %c2_i32_93 : i32 to vector<16x128xi32>
    %142 = arith.cmpi sge, %3, %141 : vector<16x128xi32>
    %cst_94 = arith.constant 0.000000e+00 : f32
    %143 = vector.broadcast %cst_94 : f32 to vector<16x128xf32>
    %144 = arith.select %142, %140, %143 : vector<16x128xi1>, vector<16x128xf32>
    %145 = arith.truncf %144 : vector<16x128xf32> to vector<16x128xbf16>
    %c6 = arith.constant 6 : index
    %c0_95 = arith.constant 0 : index
    %c0_96 = arith.constant 0 : index
    %146 = vector.load %arg4[%c6, %c0_95, %c0_96] : memref<16x128x128xbf16, #tpu.memory_space<vmem>>, vector<1x128x128xbf16>
    %147 = vector.shape_cast %146 : vector<1x128x128xbf16> to vector<128x128xbf16>
    %cst_97 = arith.constant dense<0.000000e+00> : vector<16x128xf32>
    %148 = tpu.matmul %145, %147, %cst_97 {dimension_numbers = #tpu.dot_dimension_numbers<[1], [0], [0], [1], [0, 0, 1, 1], [], []>} : vector<16x128xbf16>, vector<128x128xbf16>, vector<16x128xf32> -> vector<16x128xf32>
    %149 = vector.broadcast %139 : vector<1x128xf32> to vector<16x128xf32>
    %150 = arith.addf %149, %148 : vector<16x128xf32>
    %151 = arith.truncf %137 : vector<16x128xf32> to vector<16x128xbf16>
    %c7 = arith.constant 7 : index
    %c0_98 = arith.constant 0 : index
    %c0_99 = arith.constant 0 : index
    %152 = vector.load %arg4[%c7, %c0_98, %c0_99] : memref<16x128x128xbf16, #tpu.memory_space<vmem>>, vector<1x128x128xbf16>
    %153 = vector.shape_cast %152 : vector<1x128x128xbf16> to vector<128x128xbf16>
    %cst_100 = arith.constant dense<0.000000e+00> : vector<16x128xf32>
    %154 = tpu.matmul %151, %153, %cst_100 {dimension_numbers = #tpu.dot_dimension_numbers<[1], [0], [0], [1], [0, 0, 1, 1], [], []>} : vector<16x128xbf16>, vector<128x128xbf16>, vector<16x128xf32> -> vector<16x128xf32>
    %155 = arith.addf %150, %154 : vector<16x128xf32>
    %cst_101 = arith.constant 0.000000e+00 : f32
    %156 = vector.broadcast %cst_101 : f32 to vector<16x128xf32>
    %157 = arith.maximumf %155, %156 : vector<16x128xf32>
    %158 = arith.negf %157 : vector<16x128xf32>
    %159 = math.exp %158 : vector<16x128xf32>
    %cst_102 = arith.constant 1.000000e+00 : f32
    %160 = vector.broadcast %cst_102 : f32 to vector<16x128xf32>
    %161 = arith.addf %160, %159 : vector<16x128xf32>
    %162 = arith.divf %160, %161 : vector<16x128xf32>
    %163 = arith.mulf %63, %162 : vector<16x128xf32>
    %c2_103 = arith.constant 2 : index
    %c0_104 = arith.constant 0 : index
    %c0_105 = arith.constant 0 : index
    %164 = vector.load %arg7[%c2_103, %c0_104, %c0_105] : memref<8x1x128xf32, #tpu.memory_space<vmem>>, vector<1x1x128xf32>
    %165 = vector.shape_cast %164 : vector<1x1x128xf32> to vector<1x128xf32>
    %c14_i32 = arith.constant 14 : i32
    %166 = tpu.dynamic_rotate %109 by %c14_i32 dim 0 : vector<16x128xf32>, i32 -> vector<16x128xf32>
    %c14_i32_106 = arith.constant 14 : i32
    %167 = vector.broadcast %c14_i32_106 : i32 to vector<16x128xi32>
    %168 = arith.cmpi slt, %3, %167 : vector<16x128xi32>
    %cst_107 = arith.constant 0.000000e+00 : f32
    %169 = vector.broadcast %cst_107 : f32 to vector<16x128xf32>
    %170 = arith.select %168, %166, %169 : vector<16x128xi1>, vector<16x128xf32>
    %171 = arith.truncf %170 : vector<16x128xf32> to vector<16x128xbf16>
    %c4_108 = arith.constant 4 : index
    %c0_109 = arith.constant 0 : index
    %c0_110 = arith.constant 0 : index
    %172 = vector.load %arg6[%c4_108, %c0_109, %c0_110] : memref<16x128x128xbf16, #tpu.memory_space<vmem>>, vector<1x128x128xbf16>
    %173 = vector.shape_cast %172 : vector<1x128x128xbf16> to vector<128x128xbf16>
    %cst_111 = arith.constant dense<0.000000e+00> : vector<16x128xf32>
    %174 = tpu.matmul %171, %173, %cst_111 {dimension_numbers = #tpu.dot_dimension_numbers<[1], [0], [0], [1], [0, 0, 1, 1], [], []>} : vector<16x128xbf16>, vector<128x128xbf16>, vector<16x128xf32> -> vector<16x128xf32>
    %175 = vector.broadcast %165 : vector<1x128xf32> to vector<16x128xf32>
    %176 = arith.addf %175, %174 : vector<16x128xf32>
    %177 = arith.truncf %109 : vector<16x128xf32> to vector<16x128xbf16>
    %c5_112 = arith.constant 5 : index
    %c0_113 = arith.constant 0 : index
    %c0_114 = arith.constant 0 : index
    %178 = vector.load %arg6[%c5_112, %c0_113, %c0_114] : memref<16x128x128xbf16, #tpu.memory_space<vmem>>, vector<1x128x128xbf16>
    %179 = vector.shape_cast %178 : vector<1x128x128xbf16> to vector<128x128xbf16>
    %cst_115 = arith.constant dense<0.000000e+00> : vector<16x128xf32>
    %180 = tpu.matmul %177, %179, %cst_115 {dimension_numbers = #tpu.dot_dimension_numbers<[1], [0], [0], [1], [0, 0, 1, 1], [], []>} : vector<16x128xbf16>, vector<128x128xbf16>, vector<16x128xf32> -> vector<16x128xf32>
    %181 = arith.addf %176, %180 : vector<16x128xf32>
    %cst_116 = arith.constant 0.000000e+00 : f32
    %182 = vector.broadcast %cst_116 : f32 to vector<16x128xf32>
    %183 = arith.maximumf %181, %182 : vector<16x128xf32>
    %c3_117 = arith.constant 3 : index
    %c0_118 = arith.constant 0 : index
    %c0_119 = arith.constant 0 : index
    %184 = vector.load %arg7[%c3_117, %c0_118, %c0_119] : memref<8x1x128xf32, #tpu.memory_space<vmem>>, vector<1x1x128xf32>
    %185 = vector.shape_cast %184 : vector<1x1x128xf32> to vector<1x128xf32>
    %c14_i32_120 = arith.constant 14 : i32
    %186 = tpu.dynamic_rotate %183 by %c14_i32_120 dim 0 : vector<16x128xf32>, i32 -> vector<16x128xf32>
    %c14_i32_121 = arith.constant 14 : i32
    %187 = vector.broadcast %c14_i32_121 : i32 to vector<16x128xi32>
    %188 = arith.cmpi slt, %3, %187 : vector<16x128xi32>
    %cst_122 = arith.constant 0.000000e+00 : f32
    %189 = vector.broadcast %cst_122 : f32 to vector<16x128xf32>
    %190 = arith.select %188, %186, %189 : vector<16x128xi1>, vector<16x128xf32>
    %191 = arith.truncf %190 : vector<16x128xf32> to vector<16x128xbf16>
    %c6_123 = arith.constant 6 : index
    %c0_124 = arith.constant 0 : index
    %c0_125 = arith.constant 0 : index
    %192 = vector.load %arg6[%c6_123, %c0_124, %c0_125] : memref<16x128x128xbf16, #tpu.memory_space<vmem>>, vector<1x128x128xbf16>
    %193 = vector.shape_cast %192 : vector<1x128x128xbf16> to vector<128x128xbf16>
    %cst_126 = arith.constant dense<0.000000e+00> : vector<16x128xf32>
    %194 = tpu.matmul %191, %193, %cst_126 {dimension_numbers = #tpu.dot_dimension_numbers<[1], [0], [0], [1], [0, 0, 1, 1], [], []>} : vector<16x128xbf16>, vector<128x128xbf16>, vector<16x128xf32> -> vector<16x128xf32>
    %195 = vector.broadcast %185 : vector<1x128xf32> to vector<16x128xf32>
    %196 = arith.addf %195, %194 : vector<16x128xf32>
    %197 = arith.truncf %183 : vector<16x128xf32> to vector<16x128xbf16>
    %c7_127 = arith.constant 7 : index
    %c0_128 = arith.constant 0 : index
    %c0_129 = arith.constant 0 : index
    %198 = vector.load %arg6[%c7_127, %c0_128, %c0_129] : memref<16x128x128xbf16, #tpu.memory_space<vmem>>, vector<1x128x128xbf16>
    %199 = vector.shape_cast %198 : vector<1x128x128xbf16> to vector<128x128xbf16>
    %cst_130 = arith.constant dense<0.000000e+00> : vector<16x128xf32>
    %200 = tpu.matmul %197, %199, %cst_130 {dimension_numbers = #tpu.dot_dimension_numbers<[1], [0], [0], [1], [0, 0, 1, 1], [], []>} : vector<16x128xbf16>, vector<128x128xbf16>, vector<16x128xf32> -> vector<16x128xf32>
    %201 = arith.addf %196, %200 : vector<16x128xf32>
    %cst_131 = arith.constant 0.000000e+00 : f32
    %202 = vector.broadcast %cst_131 : f32 to vector<16x128xf32>
    %203 = arith.maximumf %201, %202 : vector<16x128xf32>
    %204 = arith.negf %203 : vector<16x128xf32>
    %205 = math.exp %204 : vector<16x128xf32>
    %cst_132 = arith.constant 1.000000e+00 : f32
    %206 = vector.broadcast %cst_132 : f32 to vector<16x128xf32>
    %207 = arith.addf %206, %205 : vector<16x128xf32>
    %208 = arith.divf %206, %207 : vector<16x128xf32>
    %209 = arith.mulf %109, %208 : vector<16x128xf32>
    %210 = arith.addf %163, %209 : vector<16x128xf32>
    %211 = vector.shape_cast %210 : vector<16x128xf32> to vector<1x16x128xf32>
    %cst_133 = arith.constant dense<0.000000e+00> : vector<1x128xf32>
    %212 = vector.multi_reduction <add>, %211, %cst_133 [1] : vector<1x16x128xf32> to vector<1x128xf32>
    %cst_134 = arith.constant 1.600000e+01 : f32
    %213 = vector.broadcast %cst_134 : f32 to vector<1x128xf32>
    %214 = arith.divf %212, %213 : vector<1x128xf32>
    %c0_135 = arith.constant 0 : index
    %c1_136 = arith.constant 1 : index
    %c0_137 = arith.constant 0 : index
    %215 = vector.load %arg8[%c0_135, %c1_136, %c0_137] : memref<1x4x128xf32, #tpu.memory_space<vmem>>, vector<1x1x128xf32>
    %216 = vector.shape_cast %215 : vector<1x1x128xf32> to vector<1x128xf32>
    %217 = vector.shape_cast %214 : vector<1x128xf32> to vector<1x1x128xf32>
    tpu.vector_store %arg8[%c0_135, %c1_136, %c0_137], %217 {strides = array<i32>} : memref<1x4x128xf32, #tpu.memory_space<vmem>>, vector<1x1x128xf32>,
    %c4_138 = arith.constant 4 : index
    %c0_139 = arith.constant 0 : index
    %c0_140 = arith.constant 0 : index
    %218 = vector.load %arg5[%c4_138, %c0_139, %c0_140] : memref<8x1x128xf32, #tpu.memory_space<vmem>>, vector<1x1x128xf32>
    %219 = vector.shape_cast %218 : vector<1x1x128xf32> to vector<1x128xf32>
    %c4_i32 = arith.constant 4 : i32
    %220 = tpu.dynamic_rotate %163 by %c4_i32 dim 0 : vector<16x128xf32>, i32 -> vector<16x128xf32>
    %c4_i32_141 = arith.constant 4 : i32
    %221 = vector.broadcast %c4_i32_141 : i32 to vector<16x128xi32>
    %222 = arith.cmpi sge, %3, %221 : vector<16x128xi32>
    %cst_142 = arith.constant 0.000000e+00 : f32
    %223 = vector.broadcast %cst_142 : f32 to vector<16x128xf32>
    %224 = arith.select %222, %220, %223 : vector<16x128xi1>, vector<16x128xf32>
    %225 = arith.truncf %224 : vector<16x128xf32> to vector<16x128xbf16>
    %c8 = arith.constant 8 : index
    %c0_143 = arith.constant 0 : index
    %c0_144 = arith.constant 0 : index
    %226 = vector.load %arg4[%c8, %c0_143, %c0_144] : memref<16x128x128xbf16, #tpu.memory_space<vmem>>, vector<1x128x128xbf16>
    %227 = vector.shape_cast %226 : vector<1x128x128xbf16> to vector<128x128xbf16>
    %cst_145 = arith.constant dense<0.000000e+00> : vector<16x128xf32>
    %228 = tpu.matmul %225, %227, %cst_145 {dimension_numbers = #tpu.dot_dimension_numbers<[1], [0], [0], [1], [0, 0, 1, 1], [], []>} : vector<16x128xbf16>, vector<128x128xbf16>, vector<16x128xf32> -> vector<16x128xf32>
    %229 = vector.broadcast %219 : vector<1x128xf32> to vector<16x128xf32>
    %230 = arith.addf %229, %228 : vector<16x128xf32>
    %231 = arith.truncf %163 : vector<16x128xf32> to vector<16x128xbf16>
    %c9 = arith.constant 9 : index
    %c0_146 = arith.constant 0 : index
    %c0_147 = arith.constant 0 : index
    %232 = vector.load %arg4[%c9, %c0_146, %c0_147] : memref<16x128x128xbf16, #tpu.memory_space<vmem>>, vector<1x128x128xbf16>
    %233 = vector.shape_cast %232 : vector<1x128x128xbf16> to vector<128x128xbf16>
    %cst_148 = arith.constant dense<0.000000e+00> : vector<16x128xf32>
    %234 = tpu.matmul %231, %233, %cst_148 {dimension_numbers = #tpu.dot_dimension_numbers<[1], [0], [0], [1], [0, 0, 1, 1], [], []>} : vector<16x128xbf16>, vector<128x128xbf16>, vector<16x128xf32> -> vector<16x128xf32>
    %235 = arith.addf %230, %234 : vector<16x128xf32>
    %cst_149 = arith.constant 0.000000e+00 : f32
    %236 = vector.broadcast %cst_149 : f32 to vector<16x128xf32>
    %237 = arith.maximumf %235, %236 : vector<16x128xf32>
    %c5_150 = arith.constant 5 : index
    %c0_151 = arith.constant 0 : index
    %c0_152 = arith.constant 0 : index
    %238 = vector.load %arg5[%c5_150, %c0_151, %c0_152] : memref<8x1x128xf32, #tpu.memory_space<vmem>>, vector<1x1x128xf32>
    %239 = vector.shape_cast %238 : vector<1x1x128xf32> to vector<1x128xf32>
    %c4_i32_153 = arith.constant 4 : i32
    %240 = tpu.dynamic_rotate %237 by %c4_i32_153 dim 0 : vector<16x128xf32>, i32 -> vector<16x128xf32>
    %c4_i32_154 = arith.constant 4 : i32
    %241 = vector.broadcast %c4_i32_154 : i32 to vector<16x128xi32>
    %242 = arith.cmpi sge, %3, %241 : vector<16x128xi32>
    %cst_155 = arith.constant 0.000000e+00 : f32
    %243 = vector.broadcast %cst_155 : f32 to vector<16x128xf32>
    %244 = arith.select %242, %240, %243 : vector<16x128xi1>, vector<16x128xf32>
    %245 = arith.truncf %244 : vector<16x128xf32> to vector<16x128xbf16>
    %c10 = arith.constant 10 : index
    %c0_156 = arith.constant 0 : index
    %c0_157 = arith.constant 0 : index
    %246 = vector.load %arg4[%c10, %c0_156, %c0_157] : memref<16x128x128xbf16, #tpu.memory_space<vmem>>, vector<1x128x128xbf16>
    %247 = vector.shape_cast %246 : vector<1x128x128xbf16> to vector<128x128xbf16>
    %cst_158 = arith.constant dense<0.000000e+00> : vector<16x128xf32>
    %248 = tpu.matmul %245, %247, %cst_158 {dimension_numbers = #tpu.dot_dimension_numbers<[1], [0], [0], [1], [0, 0, 1, 1], [], []>} : vector<16x128xbf16>, vector<128x128xbf16>, vector<16x128xf32> -> vector<16x128xf32>
    %249 = vector.broadcast %239 : vector<1x128xf32> to vector<16x128xf32>
    %250 = arith.addf %249, %248 : vector<16x128xf32>
    %251 = arith.truncf %237 : vector<16x128xf32> to vector<16x128xbf16>
    %c11 = arith.constant 11 : index
    %c0_159 = arith.constant 0 : index
    %c0_160 = arith.constant 0 : index
    %252 = vector.load %arg4[%c11, %c0_159, %c0_160] : memref<16x128x128xbf16, #tpu.memory_space<vmem>>, vector<1x128x128xbf16>
    %253 = vector.shape_cast %252 : vector<1x128x128xbf16> to vector<128x128xbf16>
    %cst_161 = arith.constant dense<0.000000e+00> : vector<16x128xf32>
    %254 = tpu.matmul %251, %253, %cst_161 {dimension_numbers = #tpu.dot_dimension_numbers<[1], [0], [0], [1], [0, 0, 1, 1], [], []>} : vector<16x128xbf16>, vector<128x128xbf16>, vector<16x128xf32> -> vector<16x128xf32>
    %255 = arith.addf %250, %254 : vector<16x128xf32>
    %cst_162 = arith.constant 0.000000e+00 : f32
    %256 = vector.broadcast %cst_162 : f32 to vector<16x128xf32>
    %257 = arith.maximumf %255, %256 : vector<16x128xf32>
    %258 = arith.negf %257 : vector<16x128xf32>
    %259 = math.exp %258 : vector<16x128xf32>
    %cst_163 = arith.constant 1.000000e+00 : f32
    %260 = vector.broadcast %cst_163 : f32 to vector<16x128xf32>
    %261 = arith.addf %260, %259 : vector<16x128xf32>
    %262 = arith.divf %260, %261 : vector<16x128xf32>
    %263 = arith.mulf %163, %262 : vector<16x128xf32>
    %c4_164 = arith.constant 4 : index
    %c0_165 = arith.constant 0 : index
    %c0_166 = arith.constant 0 : index
    %264 = vector.load %arg7[%c4_164, %c0_165, %c0_166] : memref<8x1x128xf32, #tpu.memory_space<vmem>>, vector<1x1x128xf32>
    %265 = vector.shape_cast %264 : vector<1x1x128xf32> to vector<1x128xf32>
    %c12_i32 = arith.constant 12 : i32
    %266 = tpu.dynamic_rotate %209 by %c12_i32 dim 0 : vector<16x128xf32>, i32 -> vector<16x128xf32>
    %c12_i32_167 = arith.constant 12 : i32
    %267 = vector.broadcast %c12_i32_167 : i32 to vector<16x128xi32>
    %268 = arith.cmpi slt, %3, %267 : vector<16x128xi32>
    %cst_168 = arith.constant 0.000000e+00 : f32
    %269 = vector.broadcast %cst_168 : f32 to vector<16x128xf32>
    %270 = arith.select %268, %266, %269 : vector<16x128xi1>, vector<16x128xf32>
    %271 = arith.truncf %270 : vector<16x128xf32> to vector<16x128xbf16>
    %c8_169 = arith.constant 8 : index
    %c0_170 = arith.constant 0 : index
    %c0_171 = arith.constant 0 : index
    %272 = vector.load %arg6[%c8_169, %c0_170, %c0_171] : memref<16x128x128xbf16, #tpu.memory_space<vmem>>, vector<1x128x128xbf16>
    %273 = vector.shape_cast %272 : vector<1x128x128xbf16> to vector<128x128xbf16>
    %cst_172 = arith.constant dense<0.000000e+00> : vector<16x128xf32>
    %274 = tpu.matmul %271, %273, %cst_172 {dimension_numbers = #tpu.dot_dimension_numbers<[1], [0], [0], [1], [0, 0, 1, 1], [], []>} : vector<16x128xbf16>, vector<128x128xbf16>, vector<16x128xf32> -> vector<16x128xf32>
    %275 = vector.broadcast %265 : vector<1x128xf32> to vector<16x128xf32>
    %276 = arith.addf %275, %274 : vector<16x128xf32>
    %277 = arith.truncf %209 : vector<16x128xf32> to vector<16x128xbf16>
    %c9_173 = arith.constant 9 : index
    %c0_174 = arith.constant 0 : index
    %c0_175 = arith.constant 0 : index
    %278 = vector.load %arg6[%c9_173, %c0_174, %c0_175] : memref<16x128x128xbf16, #tpu.memory_space<vmem>>, vector<1x128x128xbf16>
    %279 = vector.shape_cast %278 : vector<1x128x128xbf16> to vector<128x128xbf16>
    %cst_176 = arith.constant dense<0.000000e+00> : vector<16x128xf32>
    %280 = tpu.matmul %277, %279, %cst_176 {dimension_numbers = #tpu.dot_dimension_numbers<[1], [0], [0], [1], [0, 0, 1, 1], [], []>} : vector<16x128xbf16>, vector<128x128xbf16>, vector<16x128xf32> -> vector<16x128xf32>
    %281 = arith.addf %276, %280 : vector<16x128xf32>
    %cst_177 = arith.constant 0.000000e+00 : f32
    %282 = vector.broadcast %cst_177 : f32 to vector<16x128xf32>
    %283 = arith.maximumf %281, %282 : vector<16x128xf32>
    %c5_178 = arith.constant 5 : index
    %c0_179 = arith.constant 0 : index
    %c0_180 = arith.constant 0 : index
    %284 = vector.load %arg7[%c5_178, %c0_179, %c0_180] : memref<8x1x128xf32, #tpu.memory_space<vmem>>, vector<1x1x128xf32>
    %285 = vector.shape_cast %284 : vector<1x1x128xf32> to vector<1x128xf32>
    %c12_i32_181 = arith.constant 12 : i32
    %286 = tpu.dynamic_rotate %283 by %c12_i32_181 dim 0 : vector<16x128xf32>, i32 -> vector<16x128xf32>
    %c12_i32_182 = arith.constant 12 : i32
    %287 = vector.broadcast %c12_i32_182 : i32 to vector<16x128xi32>
    %288 = arith.cmpi slt, %3, %287 : vector<16x128xi32>
    %cst_183 = arith.constant 0.000000e+00 : f32
    %289 = vector.broadcast %cst_183 : f32 to vector<16x128xf32>
    %290 = arith.select %288, %286, %289 : vector<16x128xi1>, vector<16x128xf32>
    %291 = arith.truncf %290 : vector<16x128xf32> to vector<16x128xbf16>
    %c10_184 = arith.constant 10 : index
    %c0_185 = arith.constant 0 : index
    %c0_186 = arith.constant 0 : index
    %292 = vector.load %arg6[%c10_184, %c0_185, %c0_186] : memref<16x128x128xbf16, #tpu.memory_space<vmem>>, vector<1x128x128xbf16>
    %293 = vector.shape_cast %292 : vector<1x128x128xbf16> to vector<128x128xbf16>
    %cst_187 = arith.constant dense<0.000000e+00> : vector<16x128xf32>
    %294 = tpu.matmul %291, %293, %cst_187 {dimension_numbers = #tpu.dot_dimension_numbers<[1], [0], [0], [1], [0, 0, 1, 1], [], []>} : vector<16x128xbf16>, vector<128x128xbf16>, vector<16x128xf32> -> vector<16x128xf32>
    %295 = vector.broadcast %285 : vector<1x128xf32> to vector<16x128xf32>
    %296 = arith.addf %295, %294 : vector<16x128xf32>
    %297 = arith.truncf %283 : vector<16x128xf32> to vector<16x128xbf16>
    %c11_188 = arith.constant 11 : index
    %c0_189 = arith.constant 0 : index
    %c0_190 = arith.constant 0 : index
    %298 = vector.load %arg6[%c11_188, %c0_189, %c0_190] : memref<16x128x128xbf16, #tpu.memory_space<vmem>>, vector<1x128x128xbf16>
    %299 = vector.shape_cast %298 : vector<1x128x128xbf16> to vector<128x128xbf16>
    %cst_191 = arith.constant dense<0.000000e+00> : vector<16x128xf32>
    %300 = tpu.matmul %297, %299, %cst_191 {dimension_numbers = #tpu.dot_dimension_numbers<[1], [0], [0], [1], [0, 0, 1, 1], [], []>} : vector<16x128xbf16>, vector<128x128xbf16>, vector<16x128xf32> -> vector<16x128xf32>
    %301 = arith.addf %296, %300 : vector<16x128xf32>
    %cst_192 = arith.constant 0.000000e+00 : f32
    %302 = vector.broadcast %cst_192 : f32 to vector<16x128xf32>
    %303 = arith.maximumf %301, %302 : vector<16x128xf32>
    %304 = arith.negf %303 : vector<16x128xf32>
    %305 = math.exp %304 : vector<16x128xf32>
    %cst_193 = arith.constant 1.000000e+00 : f32
    %306 = vector.broadcast %cst_193 : f32 to vector<16x128xf32>
    %307 = arith.addf %306, %305 : vector<16x128xf32>
    %308 = arith.divf %306, %307 : vector<16x128xf32>
    %309 = arith.mulf %209, %308 : vector<16x128xf32>
    %310 = arith.addf %263, %309 : vector<16x128xf32>
    %311 = vector.shape_cast %310 : vector<16x128xf32> to vector<1x16x128xf32>
    %cst_194 = arith.constant dense<0.000000e+00> : vector<1x128xf32>
    %312 = vector.multi_reduction <add>, %311, %cst_194 [1] : vector<1x16x128xf32> to vector<1x128xf32>
    %cst_195 = arith.constant 1.600000e+01 : f32
    %313 = vector.broadcast %cst_195 : f32 to vector<1x128xf32>
    %314 = arith.divf %312, %313 : vector<1x128xf32>
    %c0_196 = arith.constant 0 : index
    %c2_197 = arith.constant 2 : index
    %c0_198 = arith.constant 0 : index
    %315 = vector.load %arg8[%c0_196, %c2_197, %c0_198] : memref<1x4x128xf32, #tpu.memory_space<vmem>>, vector<1x1x128xf32>
    %316 = vector.shape_cast %315 : vector<1x1x128xf32> to vector<1x128xf32>
    %317 = vector.shape_cast %314 : vector<1x128xf32> to vector<1x1x128xf32>
    tpu.vector_store %arg8[%c0_196, %c2_197, %c0_198], %317 {strides = array<i32>} : memref<1x4x128xf32, #tpu.memory_space<vmem>>, vector<1x1x128xf32>,
    %c6_199 = arith.constant 6 : index
    %c0_200 = arith.constant 0 : index
    %c0_201 = arith.constant 0 : index
    %318 = vector.load %arg5[%c6_199, %c0_200, %c0_201] : memref<8x1x128xf32, #tpu.memory_space<vmem>>, vector<1x1x128xf32>
    %319 = vector.shape_cast %318 : vector<1x1x128xf32> to vector<1x128xf32>
    %c8_i32 = arith.constant 8 : i32
    %320 = tpu.dynamic_rotate %263 by %c8_i32 dim 0 : vector<16x128xf32>, i32 -> vector<16x128xf32>
    %c8_i32_202 = arith.constant 8 : i32
    %321 = vector.broadcast %c8_i32_202 : i32 to vector<16x128xi32>
    %322 = arith.cmpi sge, %3, %321 : vector<16x128xi32>
    %cst_203 = arith.constant 0.000000e+00 : f32
    %323 = vector.broadcast %cst_203 : f32 to vector<16x128xf32>
    %324 = arith.select %322, %320, %323 : vector<16x128xi1>, vector<16x128xf32>
    %325 = arith.truncf %324 : vector<16x128xf32> to vector<16x128xbf16>
    %c12 = arith.constant 12 : index
    %c0_204 = arith.constant 0 : index
    %c0_205 = arith.constant 0 : index
    %326 = vector.load %arg4[%c12, %c0_204, %c0_205] : memref<16x128x128xbf16, #tpu.memory_space<vmem>>, vector<1x128x128xbf16>
    %327 = vector.shape_cast %326 : vector<1x128x128xbf16> to vector<128x128xbf16>
    %cst_206 = arith.constant dense<0.000000e+00> : vector<16x128xf32>
    %328 = tpu.matmul %325, %327, %cst_206 {dimension_numbers = #tpu.dot_dimension_numbers<[1], [0], [0], [1], [0, 0, 1, 1], [], []>} : vector<16x128xbf16>, vector<128x128xbf16>, vector<16x128xf32> -> vector<16x128xf32>
    %329 = vector.broadcast %319 : vector<1x128xf32> to vector<16x128xf32>
    %330 = arith.addf %329, %328 : vector<16x128xf32>
    %331 = arith.truncf %263 : vector<16x128xf32> to vector<16x128xbf16>
    %c13 = arith.constant 13 : index
    %c0_207 = arith.constant 0 : index
    %c0_208 = arith.constant 0 : index
    %332 = vector.load %arg4[%c13, %c0_207, %c0_208] : memref<16x128x128xbf16, #tpu.memory_space<vmem>>, vector<1x128x128xbf16>
    %333 = vector.shape_cast %332 : vector<1x128x128xbf16> to vector<128x128xbf16>
    %cst_209 = arith.constant dense<0.000000e+00> : vector<16x128xf32>
    %334 = tpu.matmul %331, %333, %cst_209 {dimension_numbers = #tpu.dot_dimension_numbers<[1], [0], [0], [1], [0, 0, 1, 1], [], []>} : vector<16x128xbf16>, vector<128x128xbf16>, vector<16x128xf32> -> vector<16x128xf32>
    %335 = arith.addf %330, %334 : vector<16x128xf32>
    %cst_210 = arith.constant 0.000000e+00 : f32
    %336 = vector.broadcast %cst_210 : f32 to vector<16x128xf32>
    %337 = arith.maximumf %335, %336 : vector<16x128xf32>
    %c7_211 = arith.constant 7 : index
    %c0_212 = arith.constant 0 : index
    %c0_213 = arith.constant 0 : index
    %338 = vector.load %arg5[%c7_211, %c0_212, %c0_213] : memref<8x1x128xf32, #tpu.memory_space<vmem>>, vector<1x1x128xf32>
    %339 = vector.shape_cast %338 : vector<1x1x128xf32> to vector<1x128xf32>
    %c8_i32_214 = arith.constant 8 : i32
    %340 = tpu.dynamic_rotate %337 by %c8_i32_214 dim 0 : vector<16x128xf32>, i32 -> vector<16x128xf32>
    %c8_i32_215 = arith.constant 8 : i32
    %341 = vector.broadcast %c8_i32_215 : i32 to vector<16x128xi32>
    %342 = arith.cmpi sge, %3, %341 : vector<16x128xi32>
    %cst_216 = arith.constant 0.000000e+00 : f32
    %343 = vector.broadcast %cst_216 : f32 to vector<16x128xf32>
    %344 = arith.select %342, %340, %343 : vector<16x128xi1>, vector<16x128xf32>
    %345 = arith.truncf %344 : vector<16x128xf32> to vector<16x128xbf16>
    %c14 = arith.constant 14 : index
    %c0_217 = arith.constant 0 : index
    %c0_218 = arith.constant 0 : index
    %346 = vector.load %arg4[%c14, %c0_217, %c0_218] : memref<16x128x128xbf16, #tpu.memory_space<vmem>>, vector<1x128x128xbf16>
    %347 = vector.shape_cast %346 : vector<1x128x128xbf16> to vector<128x128xbf16>
    %cst_219 = arith.constant dense<0.000000e+00> : vector<16x128xf32>
    %348 = tpu.matmul %345, %347, %cst_219 {dimension_numbers = #tpu.dot_dimension_numbers<[1], [0], [0], [1], [0, 0, 1, 1], [], []>} : vector<16x128xbf16>, vector<128x128xbf16>, vector<16x128xf32> -> vector<16x128xf32>
    %349 = vector.broadcast %339 : vector<1x128xf32> to vector<16x128xf32>
    %350 = arith.addf %349, %348 : vector<16x128xf32>
    %351 = arith.truncf %337 : vector<16x128xf32> to vector<16x128xbf16>
    %c15 = arith.constant 15 : index
    %c0_220 = arith.constant 0 : index
    %c0_221 = arith.constant 0 : index
    %352 = vector.load %arg4[%c15, %c0_220, %c0_221] : memref<16x128x128xbf16, #tpu.memory_space<vmem>>, vector<1x128x128xbf16>
    %353 = vector.shape_cast %352 : vector<1x128x128xbf16> to vector<128x128xbf16>
    %cst_222 = arith.constant dense<0.000000e+00> : vector<16x128xf32>
    %354 = tpu.matmul %351, %353, %cst_222 {dimension_numbers = #tpu.dot_dimension_numbers<[1], [0], [0], [1], [0, 0, 1, 1], [], []>} : vector<16x128xbf16>, vector<128x128xbf16>, vector<16x128xf32> -> vector<16x128xf32>
    %355 = arith.addf %350, %354 : vector<16x128xf32>
    %cst_223 = arith.constant 0.000000e+00 : f32
    %356 = vector.broadcast %cst_223 : f32 to vector<16x128xf32>
    %357 = arith.maximumf %355, %356 : vector<16x128xf32>
    %358 = arith.negf %357 : vector<16x128xf32>
    %359 = math.exp %358 : vector<16x128xf32>
    %cst_224 = arith.constant 1.000000e+00 : f32
    %360 = vector.broadcast %cst_224 : f32 to vector<16x128xf32>
    %361 = arith.addf %360, %359 : vector<16x128xf32>
    %362 = arith.divf %360, %361 : vector<16x128xf32>
    %363 = arith.mulf %263, %362 : vector<16x128xf32>
    %c6_225 = arith.constant 6 : index
    %c0_226 = arith.constant 0 : index
    %c0_227 = arith.constant 0 : index
    %364 = vector.load %arg7[%c6_225, %c0_226, %c0_227] : memref<8x1x128xf32, #tpu.memory_space<vmem>>, vector<1x1x128xf32>
    %365 = vector.shape_cast %364 : vector<1x1x128xf32> to vector<1x128xf32>
    %c8_i32_228 = arith.constant 8 : i32
    %366 = tpu.dynamic_rotate %309 by %c8_i32_228 dim 0 : vector<16x128xf32>, i32 -> vector<16x128xf32>
    %c8_i32_229 = arith.constant 8 : i32
    %367 = vector.broadcast %c8_i32_229 : i32 to vector<16x128xi32>
    %368 = arith.cmpi slt, %3, %367 : vector<16x128xi32>
    %cst_230 = arith.constant 0.000000e+00 : f32
    %369 = vector.broadcast %cst_230 : f32 to vector<16x128xf32>
    %370 = arith.select %368, %366, %369 : vector<16x128xi1>, vector<16x128xf32>
    %371 = arith.truncf %370 : vector<16x128xf32> to vector<16x128xbf16>
    %c12_231 = arith.constant 12 : index
    %c0_232 = arith.constant 0 : index
    %c0_233 = arith.constant 0 : index
    %372 = vector.load %arg6[%c12_231, %c0_232, %c0_233] : memref<16x128x128xbf16, #tpu.memory_space<vmem>>, vector<1x128x128xbf16>
    %373 = vector.shape_cast %372 : vector<1x128x128xbf16> to vector<128x128xbf16>
    %cst_234 = arith.constant dense<0.000000e+00> : vector<16x128xf32>
    %374 = tpu.matmul %371, %373, %cst_234 {dimension_numbers = #tpu.dot_dimension_numbers<[1], [0], [0], [1], [0, 0, 1, 1], [], []>} : vector<16x128xbf16>, vector<128x128xbf16>, vector<16x128xf32> -> vector<16x128xf32>
    %375 = vector.broadcast %365 : vector<1x128xf32> to vector<16x128xf32>
    %376 = arith.addf %375, %374 : vector<16x128xf32>
    %377 = arith.truncf %309 : vector<16x128xf32> to vector<16x128xbf16>
    %c13_235 = arith.constant 13 : index
    %c0_236 = arith.constant 0 : index
    %c0_237 = arith.constant 0 : index
    %378 = vector.load %arg6[%c13_235, %c0_236, %c0_237] : memref<16x128x128xbf16, #tpu.memory_space<vmem>>, vector<1x128x128xbf16>
    %379 = vector.shape_cast %378 : vector<1x128x128xbf16> to vector<128x128xbf16>
    %cst_238 = arith.constant dense<0.000000e+00> : vector<16x128xf32>
    %380 = tpu.matmul %377, %379, %cst_238 {dimension_numbers = #tpu.dot_dimension_numbers<[1], [0], [0], [1], [0, 0, 1, 1], [], []>} : vector<16x128xbf16>, vector<128x128xbf16>, vector<16x128xf32> -> vector<16x128xf32>
    %381 = arith.addf %376, %380 : vector<16x128xf32>
    %cst_239 = arith.constant 0.000000e+00 : f32
    %382 = vector.broadcast %cst_239 : f32 to vector<16x128xf32>
    %383 = arith.maximumf %381, %382 : vector<16x128xf32>
    %c7_240 = arith.constant 7 : index
    %c0_241 = arith.constant 0 : index
    %c0_242 = arith.constant 0 : index
    %384 = vector.load %arg7[%c7_240, %c0_241, %c0_242] : memref<8x1x128xf32, #tpu.memory_space<vmem>>, vector<1x1x128xf32>
    %385 = vector.shape_cast %384 : vector<1x1x128xf32> to vector<1x128xf32>
    %c8_i32_243 = arith.constant 8 : i32
    %386 = tpu.dynamic_rotate %383 by %c8_i32_243 dim 0 : vector<16x128xf32>, i32 -> vector<16x128xf32>
    %c8_i32_244 = arith.constant 8 : i32
    %387 = vector.broadcast %c8_i32_244 : i32 to vector<16x128xi32>
    %388 = arith.cmpi slt, %3, %387 : vector<16x128xi32>
    %cst_245 = arith.constant 0.000000e+00 : f32
    %389 = vector.broadcast %cst_245 : f32 to vector<16x128xf32>
    %390 = arith.select %388, %386, %389 : vector<16x128xi1>, vector<16x128xf32>
    %391 = arith.truncf %390 : vector<16x128xf32> to vector<16x128xbf16>
    %c14_246 = arith.constant 14 : index
    %c0_247 = arith.constant 0 : index
    %c0_248 = arith.constant 0 : index
    %392 = vector.load %arg6[%c14_246, %c0_247, %c0_248] : memref<16x128x128xbf16, #tpu.memory_space<vmem>>, vector<1x128x128xbf16>
    %393 = vector.shape_cast %392 : vector<1x128x128xbf16> to vector<128x128xbf16>
    %cst_249 = arith.constant dense<0.000000e+00> : vector<16x128xf32>
    %394 = tpu.matmul %391, %393, %cst_249 {dimension_numbers = #tpu.dot_dimension_numbers<[1], [0], [0], [1], [0, 0, 1, 1], [], []>} : vector<16x128xbf16>, vector<128x128xbf16>, vector<16x128xf32> -> vector<16x128xf32>
    %395 = vector.broadcast %385 : vector<1x128xf32> to vector<16x128xf32>
    %396 = arith.addf %395, %394 : vector<16x128xf32>
    %397 = arith.truncf %383 : vector<16x128xf32> to vector<16x128xbf16>
    %c15_250 = arith.constant 15 : index
    %c0_251 = arith.constant 0 : index
    %c0_252 = arith.constant 0 : index
    %398 = vector.load %arg6[%c15_250, %c0_251, %c0_252] : memref<16x128x128xbf16, #tpu.memory_space<vmem>>, vector<1x128x128xbf16>
    %399 = vector.shape_cast %398 : vector<1x128x128xbf16> to vector<128x128xbf16>
    %cst_253 = arith.constant dense<0.000000e+00> : vector<16x128xf32>
    %400 = tpu.matmul %397, %399, %cst_253 {dimension_numbers = #tpu.dot_dimension_numbers<[1], [0], [0], [1], [0, 0, 1, 1], [], []>} : vector<16x128xbf16>, vector<128x128xbf16>, vector<16x128xf32> -> vector<16x128xf32>
    %401 = arith.addf %396, %400 : vector<16x128xf32>
    %cst_254 = arith.constant 0.000000e+00 : f32
    %402 = vector.broadcast %cst_254 : f32 to vector<16x128xf32>
    %403 = arith.maximumf %401, %402 : vector<16x128xf32>
    %404 = arith.negf %403 : vector<16x128xf32>
    %405 = math.exp %404 : vector<16x128xf32>
    %cst_255 = arith.constant 1.000000e+00 : f32
    %406 = vector.broadcast %cst_255 : f32 to vector<16x128xf32>
    %407 = arith.addf %406, %405 : vector<16x128xf32>
    %408 = arith.divf %406, %407 : vector<16x128xf32>
    %409 = arith.mulf %309, %408 : vector<16x128xf32>
    %410 = arith.addf %363, %409 : vector<16x128xf32>
    %411 = vector.shape_cast %410 : vector<16x128xf32> to vector<1x16x128xf32>
    %cst_256 = arith.constant dense<0.000000e+00> : vector<1x128xf32>
    %412 = vector.multi_reduction <add>, %411, %cst_256 [1] : vector<1x16x128xf32> to vector<1x128xf32>
    %cst_257 = arith.constant 1.600000e+01 : f32
    %413 = vector.broadcast %cst_257 : f32 to vector<1x128xf32>
    %414 = arith.divf %412, %413 : vector<1x128xf32>
    %c0_258 = arith.constant 0 : index
    %c3_259 = arith.constant 3 : index
    %c0_260 = arith.constant 0 : index
    %415 = vector.load %arg8[%c0_258, %c3_259, %c0_260] : memref<1x4x128xf32, #tpu.memory_space<vmem>>, vector<1x1x128xf32>
    %416 = vector.shape_cast %415 : vector<1x1x128xf32> to vector<1x128xf32>
    %417 = vector.shape_cast %414 : vector<1x128xf32> to vector<1x1x128xf32>
    tpu.vector_store %arg8[%c0_258, %c3_259, %c0_260], %417 {strides = array<i32>} : memref<1x4x128xf32, #tpu.memory_space<vmem>>, vector<1x1x128xf32>,
    return
  }
  func.func @transform_0(%arg0: i32) -> (i32, i32, i32) {
    %c0_i32 = arith.constant 0 : i32
    %c0_i32_0 = arith.constant 0 : i32
    %c0_i32_1 = arith.constant 0 : i32
    return %arg0, %c0_i32, %c0_i32_0 : i32, i32, i32
  }
  func.func @transform_1(%arg0: i32) -> (i32, i32, i32) {
    %c0_i32 = arith.constant 0 : i32
    %c0_i32_0 = arith.constant 0 : i32
    %c0_i32_1 = arith.constant 0 : i32
    %c0_i32_2 = arith.constant 0 : i32
    return %c0_i32, %c0_i32_0, %c0_i32_1 : i32, i32, i32
  }
  func.func @transform_2(%arg0: i32) -> (i32, i32, i32) {
    %c0_i32 = arith.constant 0 : i32
    %c0_i32_0 = arith.constant 0 : i32
    %c0_i32_1 = arith.constant 0 : i32
    %c0_i32_2 = arith.constant 0 : i32
    return %c0_i32, %c0_i32_0, %c0_i32_1 : i32, i32, i32
  }
  func.func @transform_3(%arg0: i32) -> (i32, i32, i32) {
    %c0_i32 = arith.constant 0 : i32
    %c0_i32_0 = arith.constant 0 : i32
    %c0_i32_1 = arith.constant 0 : i32
    %c0_i32_2 = arith.constant 0 : i32
    return %c0_i32, %c0_i32_0, %c0_i32_1 : i32, i32, i32
  }
  func.func @transform_4(%arg0: i32) -> (i32, i32, i32) {
    %c0_i32 = arith.constant 0 : i32
    %c0_i32_0 = arith.constant 0 : i32
    %c0_i32_1 = arith.constant 0 : i32
    %c0_i32_2 = arith.constant 0 : i32
    return %c0_i32, %c0_i32_0, %c0_i32_1 : i32, i32, i32
  }
  func.func @transform_5(%arg0: i32) -> (i32, i32, i32) {
    %c0_i32 = arith.constant 0 : i32
    %c0_i32_0 = arith.constant 0 : i32
    %c0_i32_1 = arith.constant 0 : i32
    %c0_i32_2 = arith.constant 0 : i32
    return %c0_i32, %c0_i32_0, %c0_i32_1 : i32, i32, i32
  }
  func.func @transform_6(%arg0: i32) -> (i32, i32, i32) {
    %c0_i32 = arith.constant 0 : i32
    %c0_i32_0 = arith.constant 0 : i32
    %c0_i32_1 = arith.constant 0 : i32
    %c0_i32_2 = arith.constant 0 : i32
    return %c0_i32, %c0_i32_0, %c0_i32_1 : i32, i32, i32
  }
  func.func @transform_7(%arg0: i32) -> (i32, i32, i32) {
    %c0_i32 = arith.constant 0 : i32
    %c0_i32_0 = arith.constant 0 : i32
    %c0_i32_1 = arith.constant 0 : i32
    return %arg0, %c0_i32, %c0_i32_0 : i32, i32, i32
  }
}

</mosaic_0001>

<bundles_post_ra>
// kernel: timnet_forward.1
= control target key start
LH: loop header
LB: loop body
LE: loop exit
PB: predicated region body
PF: predicated region fallthrough
CT: control target
= control target key end

     0   :  { %12 = vsyncpa [#allocation3], 0  ;;  %s7295_s0 = inlined_call_operand.vmem [shape: bf16[2,16,128], index: 0, kind: input, shape index: {}]   ;;  %s7296_s1 = inlined_call_operand.hbm [shape: bf16[2,128,128], index: 1, kind: input, shape index: {}]   ;;  %s7297_s2 = inlined_call_operand.vmem [shape: f32[2,1,128], index: 2, kind: input, shape index: {}]   ;;  %s7298_s3 = inlined_call_operand.hbm [shape: bf16[16,128,128], index: 3, kind: input, shape index: {}]   ;;  %s7299_s4 = inlined_call_operand.vmem [shape: f32[8,1,128], index: 4, kind: input, shape index: {}]   ;;  %s7300_s5 = inlined_call_operand.hbm [shape: bf16[16,128,128], index: 5, kind: input, shape index: {}]   ;;  %s7301_s6 = inlined_call_operand.vmem [shape: f32[8,1,128], index: 6, kind: input, shape index: {}]   ;;  %s7302_s7 = inlined_call_operand.hbm [shape: f32[2,4,128], index: 7, kind: output, shape index: {}]  }
   0x1   :  { %13 = vsyncpa [#allocation6], 0 }
   0x2   :  { %14 = vsyncpa [#allocation4], 0 }
   0x3   :  { %16 = vsyncpa [#allocation4 + $0x1], 0  ;;  %s6536_s24 = smov 0   ;;  %s6538_s25 = smov 0  }
   0x4   :  { %s6540_s26 = smov 0   ;;  %s6542_s27 = smov 0  }
   0x5 LB: > { %s6557_s28 = sadd.s32 4294967295, %s6485_s27   ;;  %s4565_s29 = sadd.s32 4294967294, %s6485_s27   ;;  %s6485_s27 = sphi %s6542_s27, %s7330_s27   ;;  %s6481_s26 = sphi %s6540_s26, %s7329_s26   ;;  %s6477_s25 = sphi %s6538_s25, %s7328_s25   ;;  %s6473_s24 = sphi %s6536_s24, %s7327_s24  }
   0x6   : > { %s6561_s30 = sadd.s32 1, %s6485_s27   ;;  %s181_s8 = sadd.s32 1, %s6481_s26 }
   0x7   : > { %s178_s9 = ssub.s32 %s6485_s27, %s6561_s30  ;;  %p191_p0 = scmp.ne.s32.totalorder %s6481_s26, %s6477_s25 }
   0x8   : > { %p179_p1 = scmp.eq.s32.totalorder %s178_s9, 0  ;;  %p192_p2 = scmp.eq.s32.totalorder %s6557_s28, 1 }
   0x9   : > { %p197_p3 = scmp.ne.s32.totalorder %s6477_s25, %s6473_s24  ;;  %p198_p4 = scmp.eq.s32.totalorder %s4565_s29, 1 }
   0xa   : > { %s6572_s10 = scalar_select %p179_p1, %s6481_s26, %s181_s8  }
   0xb   : > { %p6574_p5 = por %p192_p2, %p191_p0  ;;  %p6578_p6 = por %p198_p4, %p197_p3 }
   0xc   : > { %p4566_p7 = scmp.ge.s32.totalorder %s6485_s27, 1  ;;  %p205_p8 = scmp.lt.s32.totalorder %s6485_s27, 3 }
   0xd   : > { %s7305_s11 = scalar_select %p6574_p5, 1, 0 }
   0xe   : > { %s7306_s12 = scalar_select %p6578_p6, 1, 0 }
   0xf   : > { %p7303_p9 = scmp.eq.s32.totalorder %s6557_s28, 0  ;;  %p6585_p10 = pnand %p4566_p7, %p205_p8 }
  0x10   : > { %s6487_s14 = smov [#allocation5]   ;;  %s6488_s17 = smov [#allocation2]  }
  0x11   : > { %p5941_p11 = pneg %p6585_p10  ;;  %s233_s15 = sshll.u32 %s6487_s14, 4  ;;  %s234_s15 = int_to_ptr.vmem [resolvable:$true] %s233_s15 }
  0x12   : > { %s217_s18 = sshll.u32 %s6488_s17, 4  ;;  %s6489_s19 = smov [#allocation7]   ;;  %s218_s18 = int_to_ptr.vmem [resolvable:$true] %s217_s18 }
  0x13   : > { %p6593_p12 = pnand %p7303_p9, %p5941_p11  ;;  %s249_s20 = sshll.u32 %s6489_s19, 4  ;;  %s250_s20 = int_to_ptr.vmem [resolvable:$true] %s249_s20 }
  0x14   : > { %s6350_s21 = scalar_lea.vmem %s234_s15, 16384  ;;  %p6358_p3 = scmp.lt.s32.totalorder %s234_s15, %s234_s15 }
  0x15   : > { %p6341_p13 = pneg %p6593_p12  ;;  %p6351_p0 = scmp.ne.s32.totalorder %s234_s15, %s6350_s21 }
  0x16   : > { %p6359_p4 = scmp.lt.s32.totalorder %s6350_s21, %s6350_s21 }
  0x17   : > { %p6353_p1 = pnand %p6351_p0, %p6341_p13 }
  0x18   : > { %p6360_p7 = por %p6359_p4, %p6358_p3 }
  0x19   : > { %p6354_p2 = pneg %p6353_p1 }
  0x1b   : > { %p6361_p8 = pnand %p6360_p7, %p6354_p2 }
  0x1d   : > { %6364 = shalt.err (!%p6361_p8)
}
  0x1e   : > { %s6490_s22 = smov 64   ;;  %s6491_s23 = smov 4  }
  0x1f   : > { %5947 = dma.hbm_to_vmem [thread:$0]  (!%p6593_p12), %s7298_s3, 16384, %s234_s15, [#allocation6], %s6490_s22, %s6490_s22, %s6491_s23  }
  0x20   : > { %s6376_s9 = scalar_lea.vmem %s218_s18, 2048  ;;  %p6384_p9 = scmp.lt.s32.totalorder %s218_s18, %s218_s18 }
  0x21   : > { %p6377_p11 = scmp.ne.s32.totalorder %s218_s18, %s6376_s9  ;;  %p6385_p6 = scmp.lt.s32.totalorder %s6376_s9, %s6376_s9 }
  0x23   : > { %p6379_p0 = pnand %p6377_p11, %p6341_p13  ;;  %p6386_p3 = por %p6385_p6, %p6384_p9 }
  0x25   : > { %p6380_p1 = pneg %p6379_p0 }
  0x27   : > { %p6387_p2 = pnand %p6386_p3, %p6380_p1 }
  0x29   : > { %6390 = shalt.err (!%p6387_p2)
}
  0x2a   : > { %5944 = dma.hbm_to_vmem [thread:$0]  (!%p6593_p12), %s7296_s1, 2048, %s218_s18, [#allocation3], %s6490_s22, %s6490_s22, %s6491_s23  }
  0x2b   : > { %s6402_s15 = scalar_lea.vmem %s250_s20, 16384  ;;  %p6410_p11 = scmp.lt.s32.totalorder %s250_s20, %s250_s20 }
  0x2c   : > { %p6403_p4 = scmp.ne.s32.totalorder %s250_s20, %s6402_s15  ;;  %p6411_p0 = scmp.lt.s32.totalorder %s6402_s15, %s6402_s15 }
  0x2e   : > { %p6405_p7 = pnand %p6403_p4, %p6341_p13  ;;  %p6412_p5 = por %p6411_p0, %p6410_p11 }
  0x30   : > { %p6406_p8 = pneg %p6405_p7 }
  0x32   : > { %p6413_p6 = pnand %p6412_p5, %p6406_p8 }
  0x34   : > { %6416 = shalt.err (!%p6413_p6)
}
  0x35   : > { %5950 = dma.hbm_to_vmem [thread:$0]  (!%p6593_p12), %s7300_s5, 16384, %s250_s20, [#allocation6], %s6490_s22, %s6490_s22, %s6491_s23  }
  0x36   : > { %276 = sbr.rel (%p6585_p10) target bundleno = 2449 (0x991), region = 48  ;;  %p7309_p9 = scmp.eq.s32.totalorder (!%p6585_p10), %s6557_s28, 0 }
  0x3b   : > { %6460 = dma.done.wait (%p7309_p9), [#allocation3], 2048   ;;  %p7310_p13 = pmov %p7309_p9 }
  0x3c   : > { %p7311_p1 = pmov %p7309_p9 }
  0x3d   : > { %6462 = vsyncadd (%p7310_p13), [#allocation3], 4294965248 }
  0x3e   : > { %6464 = dma.done.wait (%p7311_p1), [#allocation6], 32768   ;;  %p7312_p5 = pmov %p7311_p1 }
  0x3f   : > { %v6492_v0 = vmov 0.0   ;;  %vm6493_vm0 = vmmov 0   ;;  %p316_p10 = scmp.lt.s32.totalorder %s6557_s28, 1  ;;  %v6002_v1 = vld [vmem:[#allocation2 + $0x38] sm:$0xff]   ;;  %v6003_v2 = vld [vmem:[#allocation2 + $0x30] sm:$0xff]   ;;  %v6004_v3 = vld [vmem:[#allocation2 + $0x28] sm:$0xff]   ;;  %v324_v34 = vlaneseq }
  0x40   : > { %6466 = vsyncadd (%p7312_p5), [#allocation6], 4294934528  ;;  %5247 = vmatprep.subr.bf16.mxu0 %v6492_v0  ;;  %5263 = vmatprep.mubr.msk.bf16.mxu0 %vm6493_vm0, %v6492_v0  ;;  %v6011_v4 = vld [vmem:[#allocation2 + $0x78] sm:$0xff]   ;;  %v6005_v5 = vld [vmem:[#allocation2 + $0x20] sm:$0xff]   ;;  %vm6494_vm3 = vmmov 1   ;;  %s313_s23 = sand.u32 1, %s6477_s25  }
  0x41   : > { %5267 = vmatprep.subr.bf16.mxu1 %v6492_v0  ;;  %5283 = vmatprep.mubr.msk.bf16.mxu1 %vm6493_vm0, %v6492_v0  ;;  %s317_s13 = scalar_select %p316_p10, %s6557_s28, 1  ;;  %v6012_v6 = vld [vmem:[#allocation2 + $0x70] sm:$0xff]   ;;  %v6006_v7 = vld [vmem:[#allocation2 + $0x18] sm:$0xff]   ;;  %v6013_v8 = vld [vmem:[#allocation2 + $0x68] sm:$0xff]   ;;  %v6683_v38 = vshrl.u32 %v324_v34, 7 }
  0x42   : > { %5248 = vmatpush3.bf16.msra.mxu0 %v6002_v1  ;;  %5268 = vmatpush3.bf16.msra.mxu1 %v6011_v4  ;;  %v6007_v9 = vld [vmem:[#allocation2 + $0x10] sm:$0xff]   ;;  %v6014_v10 = vld [vmem:[#allocation2 + $0x60] sm:$0xff]   ;;  %v6008_v11 = vld [vmem:[#allocation2 + $0x8] sm:$0xff]   ;;  %s4575_s29 = sshll.u32 %s313_s23, 2  ;;  %s4462_s15 = scalar_lea.sflag [#allocation4], %s313_s23 }
  0x43   : > { %5249 = vmatprep.subr.bf16.mxu0 %v6492_v0  ;;  %s4940_s16 = sshll.u32 %s317_s13, 3  ;;  %5269 = vmatprep.subr.bf16.mxu1 %v6492_v0  ;;  %v6015_v12 = vld [vmem:[#allocation2 + $0x58] sm:$0xff]   ;;  %v6009_v13 = vld [vmem:[#allocation2] sm:$0xff]   ;;  %v6016_v15 = vld [vmem:[#allocation2 + $0x50] sm:$0xff]   ;;  %vm562_vm1 = vcmp.lt.s32.totalorder %v6683_v38, 1  ;;  %vm565_vm2 = vcmp.ge.s32.totalorder %v6683_v38, 1 }
  0x44   : > { %s320_s22 = scalar_lea.vmem %s7295_s0, %s4940_s16  ;;  %v6020_v16 = vld [vmem:[#allocation5 + $0x38] sm:$0xff]   ;;  %v6017_v17 = vld [vmem:[#allocation2 + $0x48] sm:$0xff]   ;;  %v6022_v18 = vld [vmem:[#allocation5 + $0x30] sm:$0xff]   ;;  %v6765_v49 = vadd.s32 8, %v6683_v38  ;;  %vm1045_vm5 = vcmp.lt.s32.totalorder %v6683_v38, 7  ;;  %vm1541_vm8 = vcmp.lt.s32.totalorder %v6683_v38, 2 }
  0x45   : > { %v6010_v14 = vld [vmem:[%s320_s22] sm:$0xff]   ;;  %v6024_v20 = vld [vmem:[#allocation5 + $0x28] sm:$0xff]   ;;  %v6019_v21 = vld [vmem:[#allocation5 + $0x78] sm:$0xff]   ;;  %vm1544_vm9 = vcmp.ge.s32.totalorder %v6683_v38, 2  ;;  %s6921_s8 = scalar_lea.vmem [#allocation8], %s4575_s29  ;;  %vm2026_vm11 = vcmp.lt.s32.totalorder %v6683_v38, 6 }
  0x46   : > { %5250 = vmatpush3.bf16.msra.mxu0 %v6003_v2  ;;  %5270 = vmatpush3.bf16.msra.mxu1 %v6012_v6  ;;  %v6018_v19 = vld [vmem:[#allocation2 + $0x40] sm:$0xff]   ;;  %v6021_v23 = vld [vmem:[#allocation5 + $0x70] sm:$0xff]   ;;  %v6028_v24 = vld [vmem:[#allocation5 + $0x18] sm:$0xff]   ;;  %vm1049_vm6 = vcmp.lt.s32.totalorder %v6765_v49, 15  ;;  %vm2030_vm12 = vcmp.lt.s32.totalorder %v6765_v49, 14  ;;  %vm2522_vm14 = vcmp.lt.s32.totalorder %v6683_v38, 4 }
  0x47   : > { %5251 = vmatprep.subr.bf16.mxu0 %v6492_v0  ;;  %5271 = vmatprep.subr.bf16.mxu1 %v6492_v0  ;;  %v6026_v22 = vld [vmem:[#allocation5 + $0x20] sm:$0xff]   ;;  %v6023_v25 = vld [vmem:[#allocation5 + $0x68] sm:$0xff]   ;;  %v6027_v27 = vld [vmem:[#allocation5 + $0x58] sm:$0xff]   ;;  %vm2525_vm15 = vcmp.ge.s32.totalorder %v6683_v38, 4  ;;  %s4937_s22 = sshll.u32 %s6557_s28, 6  ;;  %s4475_s29 = sshll.u32 %s6921_s8, 4  ;;  %s4476_s29 = int_to_ptr.vmem [resolvable:$true] %s4475_s29 }
  0x48   : > { %v6025_v26 = vld [vmem:[#allocation5 + $0x60] sm:$0xff]   ;;  %v6029_v28 = vld [vmem:[#allocation5 + $0x50] sm:$0xff]   ;;  %v6031_v30 = vld [vmem:[#allocation5 + $0x48] sm:$0xff]   ;;  %s4473_s17 = scalar_lea.hbm %s7302_s7, %s4937_s22  ;;  %s6417_s19 = scalar_lea.vmem %s4476_s29, 64 }
  0x49   : > { %v6030_v29 = vld [vmem:[#allocation5 + $0x10] sm:$0xff]   ;;  %v6032_v31 = vld [vmem:[#allocation5 + $0x8] sm:$0xff]   ;;  %v6033_v32 = vld [vmem:[#allocation5 + $0x40] sm:$0xff]   ;;  %p6418_p12 = scmp.ne.s32.totalorder %s4476_s29, %s6417_s19  ;;  %p7325_p3 = scmp.ne.s32.totalorder %s7305_s11, 0 }
  0x4a   : > { %5252 = vmatpush3.bf16.msra.mxu0 %v6004_v3  ;;  %5272 = vmatpush3.bf16.msra.mxu1 %v6013_v8  ;;  %v6034_v33 = vld [vmem:[#allocation5] sm:$0xff]   ;;  %v6035_v43 = vld [vmem:[#allocation5 + $0xf8] sm:$0xff]   ;;  %vm6700_vm4 = vmpackc.low %vm6494_vm3, %vm565_vm2  ;;  %vm3010_vm2 = vcmp.lt.s32.totalorder %v6765_v49, 12  ;;  %s6495_s21 = smov [#allocation8]  }
  0x4b   : > { %5253 = vmatprep.subr.bf16.mxu0 %v6492_v0  ;;  %5273 = vmatprep.subr.bf16.mxu1 %v6492_v0  ;;  %v4578_v35 = vld [vmem:[%s7297_s2] ss:$0 sm:$0xff]  ;;  %v6036_v51 = vld [vmem:[#allocation5 + $0xb8] sm:$0xff]   ;;  %v6037_v53 = vld [vmem:[#allocation5 + $0xf0] sm:$0xff]   ;;  %p6419_p2 = pnand %p6418_p12, %p7325_p3  ;;  %s6421_s13 = sshll.u32 %s6495_s21, 4  ;;  %s6422_s13 = int_to_ptr.vmem [resolvable:$false] %s6421_s13 }
  0x4c   : > { %v6038_v56 = vld [vmem:[#allocation5 + $0xb0] sm:$0xff]   ;;  %v6039_v57 = vld [vmem:[#allocation5 + $0xe8] sm:$0xff]   ;;  %v6041_v60 = vld [vmem:[#allocation5 + $0xe0] sm:$0xff]   ;;  %s6423_s28 = scalar_lea.vmem %s6422_s13, 128  ;;  %p6424_p7 = scmp.lt.s32.totalorder %s4476_s29, %s6422_s13 }
  0x4d   : > { %v6040_v59 = vld [vmem:[#allocation5 + $0xa8] sm:$0xff]   ;;  %v6042_v61 = vld [vmem:[#allocation5 + $0xa0] sm:$0xff]   ;;  %v6043_v62 = vld [vmem:[#allocation5 + $0xd8] sm:$0xff]   ;;  %p6420_p4 = pneg %p6419_p2  ;;  %p6425_p8 = scmp.lt.s32.totalorder %s6423_s28, %s6417_s19 }
  0x4e   : > { %5254 = vmatpush3.bf16.msra.mxu0 %v6005_v5  ;;  %5274 = vmatpush3.bf16.msra.mxu1 %v6014_v10  ;;  %v6044_v63 = vld [vmem:[#allocation5 + $0x98] sm:$0xff]   ;;  %v6045_v1 = vld [vmem:[#allocation5 + $0xd0] sm:$0xff]   ;;  %v6047_v3 = vld [vmem:[#allocation5 + $0xc8] sm:$0xff]  }
  0x4f   : > { %5255 = vmatprep.subr.bf16.mxu0 %v6492_v0  ;;  %5275 = vmatprep.subr.bf16.mxu1 %v6492_v0  ;;  %v6046_v2 = vld [vmem:[#allocation5 + $0x90] sm:$0xff]   ;;  %v6048_v4 = vld [vmem:[#allocation5 + $0x88] sm:$0xff]   ;;  %v6049_v5 = vld [vmem:[#allocation5 + $0xc0] sm:$0xff]   ;;  %p6426_p11 = por %p6425_p8, %p6424_p7 }
  0x50   : > { %v6050_v6 = vld [vmem:[#allocation5 + $0x80] sm:$0xff]   ;;  %vm6781_vm7 = vmpackc.low %vm1049_vm6, %vm6494_vm3  ;;  %v6195_v49 = vld [vmem:[#allocation7 + $0x2f8] sm:$0xff]  }
  0x51   : > { %v4609_v8 = vld [vmem:[%s7299_s4] ss:$0 sm:$0xff]  ;;  %vm6856_vm10 = vmpackc.low %vm6494_vm3, %vm1544_vm9  ;;  %p6427_p0 = pnand %p6426_p11, %p6420_p4 }
  0x52   : > { %5256 = vmatpush3.bf16.msra.mxu0 %v6006_v7  ;;  %5276 = vmatpush3.bf16.msra.mxu1 %v6015_v12  ;;  %v6057_v34 = vld [vmem:[#allocation7 + $0x60] sm:$0xff]   ;;  %vm6941_vm13 = vmpackc.low %vm2030_vm12, %vm6494_vm3 }
  0x53   : > { %5257 = vmatprep.subr.bf16.mxu0 %v6492_v0  ;;  %5277 = vmatprep.subr.bf16.mxu1 %v6492_v0 }
  0x56   : > { %5258 = vmatpush3.bf16.msra.mxu0 %v6007_v9  ;;  %5278 = vmatpush3.bf16.msra.mxu1 %v6016_v15 }
  0x57   : > { %5259 = vmatprep.subr.bf16.mxu0 %v6492_v0  ;;  %5279 = vmatprep.subr.bf16.mxu1 %v6492_v0 }
  0x5a   : > { %5260 = vmatpush3.bf16.msra.mxu0 %v6008_v11  ;;  %5280 = vmatpush3.bf16.msra.mxu1 %v6017_v17 }
  0x5b   : > { %5261 = vmatprep.subr.bf16.mxu0 %v6492_v0  ;;  %5281 = vmatprep.subr.bf16.mxu1 %v6492_v0 }
  0x5e   : > { %5262 = vmatpush3.bf16.msra.mxu0 %v6009_v13  ;;  %5282 = vmatpush3.bf16.msra.mxu1 %v6018_v19 }
  0x5f   : > { %5287 = vmatprep.subr.bf16.mxu0 %v6492_v0  ;;  %5307 = vmatprep.subr.bf16.mxu1 %v6492_v0 }
  0x61   : > { %5264 = vmatmul.mubr.bf16.vlgmr.msra.gmra.mxu0 %v6010_v14  ;;  %5284 = vmatmul.mubr.bf16.vlgmr.msra.gmra.mxu1 %v6010_v14 }
  0x62   : > { %5288 = vmatpush3.bf16.msra.mxu0 %v6020_v16  ;;  %5303 = vmatprep.mubr.msk.bf16.mxu0 %vm6493_vm0, %v6492_v0 }
  0x63   : > { %5289 = vmatprep.subr.bf16.mxu0 %v6492_v0  ;;  %5308 = vmatpush3.bf16.msra.mxu1 %v6019_v21 }
  0x64   : > { %5309 = vmatprep.subr.bf16.mxu1 %v6492_v0  ;;  %5323 = vmatprep.mubr.msk.bf16.mxu1 %vm6493_vm0, %v6492_v0 }
  0x66   : > { %5290 = vmatpush3.bf16.msra.mxu0 %v6022_v18 }
  0x67   : > { %5291 = vmatprep.subr.bf16.mxu0 %v6492_v0  ;;  %5310 = vmatpush3.bf16.msra.mxu1 %v6021_v23 }
  0x68   : > { %5311 = vmatprep.subr.bf16.mxu1 %v6492_v0 }
  0x6a   : > { %5292 = vmatpush3.bf16.msra.mxu0 %v6024_v20 }
  0x6b   : > { %5293 = vmatprep.subr.bf16.mxu0 %v6492_v0  ;;  %5312 = vmatpush3.bf16.msra.mxu1 %v6023_v25 }
  0x6c   : > { %5313 = vmatprep.subr.bf16.mxu1 %v6492_v0 }
  0x6e   : > { %5294 = vmatpush3.bf16.msra.mxu0 %v6026_v22  ;;  %v6051_v22 = vld [vmem:[#allocation7 + $0x78] sm:$0xff]  }
  0x6f   : > { %5295 = vmatprep.subr.bf16.mxu0 %v6492_v0  ;;  %5314 = vmatpush3.bf16.msra.mxu1 %v6025_v26 }
  0x70   : > { %5315 = vmatprep.subr.bf16.mxu1 %v6492_v0 }
  0x72   : > { %5296 = vmatpush3.bf16.msra.mxu0 %v6028_v24 }
  0x73   : > { %5297 = vmatprep.subr.bf16.mxu0 %v6492_v0  ;;  %5316 = vmatpush3.bf16.msra.mxu1 %v6027_v27 }
  0x74   : > { %5317 = vmatprep.subr.bf16.mxu1 %v6492_v0 }
  0x76   : > { %5298 = vmatpush3.bf16.msra.mxu0 %v6030_v29 }
  0x77   : > { %5318 = vmatpush3.bf16.msra.mxu1 %v6029_v28  ;;  %5299 = vmatprep.subr.bf16.mxu0 %v6492_v0  ;;  %v6052_v28 = vld [vmem:[#allocation7 + $0x38] sm:$0xff]  }
  0x78   : > { %5319 = vmatprep.subr.bf16.mxu1 %v6492_v0 }
  0x7a   : > { %5300 = vmatpush3.bf16.msra.mxu0 %v6032_v31  ;;  %v6054_v31 = vld [vmem:[#allocation7 + $0x30] sm:$0xff]  }
  0x7b   : > { %5320 = vmatpush3.bf16.msra.mxu1 %v6031_v30  ;;  %5301 = vmatprep.subr.bf16.mxu0 %v6492_v0  ;;  %v6053_v30 = vld [vmem:[#allocation7 + $0x70] sm:$0xff]  }
  0x7c   : > { %5321 = vmatprep.subr.bf16.mxu1 %v6492_v0 }
  0x7e   : > { %5302 = vmatpush3.bf16.msra.mxu0 %v6034_v33  ;;  %v6056_v33 = vld [vmem:[#allocation7 + $0x28] sm:$0xff]  }
  0x7f   : > { %5322 = vmatpush3.bf16.msra.mxu1 %v6033_v32  ;;  %5327 = vmatprep.subr.bf16.mxu0 %v6492_v0  ;;  %v6055_v32 = vld [vmem:[#allocation7 + $0x68] sm:$0xff]  }
  0x80   : > { %5347 = vmatprep.subr.bf16.mxu1 %v6492_v0 }
 0x121   : > { %v438_v36 = vpop.f32.mrf.mxu0  ;;  %v6704_v50 = vpop.f32.mrf.mxu1 }
 0x122   : > { %v6685_v39 = vadd.f32 %v4578_v35, %v438_v36  ;;  %v6059_v36 = vld [vmem:[#allocation7 + $0x58] sm:$0xff]  }
 0x123   : > { %v5265_v37 = vpop.f32.mrf.mxu0  ;;  %v5285_v54 = vpop.f32.mrf.mxu1 }
 0x124   : > { %v560_v44 = vrot.slane %v6685_v39, 7  ;;  %v6060_v37 = vld [vmem:[#allocation7 + $0x18] sm:$0xff]  }
 0x125   : > { %v441_v40 = vpop.f32.mrf.mxu0  ;;  %v6711_v55 = vpop.f32.mrf.mxu1 }
 0x126   : > { %v6687_v41 = vadd.f32 %v4578_v35, %v441_v40  ;;  %v6058_v35 = vld [vmem:[#allocation7 + $0x20] sm:$0xff]   ;;  %v6061_v40 = vld [vmem:[#allocation7 + $0x50] sm:$0xff]  }
 0x127   : > { %v5266_v42 = vpop.f32.mrf.mxu0  ;;  %v5286_v58 = vpop.f32.mrf.mxu1 }
 0x128   : > { %v561_v45 = vrot.slane %v6687_v41, 7  ;;  %v683_v46 = vpack.c.bf16 %v6687_v41, %v6685_v39  ;;  %v4589_v42 = vld [vmem:[%s7297_s2 + $0x1] ss:$0 sm:$0xff]  ;;  %v6067_v58 = vld [vmem:[#allocation7 + $0xf8] sm:$0xff]  }
 0x12a   : > { %v563_v47 = vsel %vm562_vm1, %v560_v44, %v561_v45  ;;  %v564_v48 = vsel %vm562_vm1, %v561_v45, %v560_v44  ;;  %5324 = vmatmul.mubr.bf16.vlgmr.msra.gmra.mxu1 %v683_v46  ;;  %v6063_v44 = vld [vmem:[#allocation7 + $0x48] sm:$0xff]   ;;  %v6757_v45 = vadd.f32 %v4589_v42, %v6704_v50  ;;  %v6760_v46 = vadd.f32 %v4589_v42, %v6711_v55  ;;  %v6066_v50 = vld [vmem:[#allocation7] sm:$0xff]  }
 0x12b   : > { %v4607_v52 = vpack.c.bf16 %v563_v47, %v564_v48  ;;  %5348 = vmatpush3.bf16.msra.mxu1 %v6035_v43  ;;  %5363 = vmatprep.mubr.msk.bf16.mxu1 %vm6493_vm0, %v6492_v0  ;;  %v6062_v43 = vld [vmem:[#allocation7 + $0x10] sm:$0xff]   ;;  %v6064_v47 = vld [vmem:[#allocation7 + $0x8] sm:$0xff]   ;;  %v6065_v48 = vld [vmem:[#allocation7 + $0x40] sm:$0xff]  }
 0x12c   : > { %5349 = vmatprep.subr.bf16.mxu1 %v6492_v0  ;;  %v1166_v55 = vpack.c.bf16 %v6760_v46, %v6757_v45 }
 0x12d   : > { %5304 = vmatmul.mubr.msk.bf16.vlgmr.msra.gmra.mxu0 %vm6700_vm4, %v4607_v52  ;;  %v1044_v52 = vrot.slane %v6760_v46, 1 }
 0x12e   : > { %5328 = vmatpush3.bf16.msra.mxu0 %v6036_v51  ;;  %5343 = vmatprep.mubr.msk.bf16.mxu0 %vm6493_vm0, %v6492_v0  ;;  %v1043_v51 = vrot.slane %v6757_v45, 1 }
 0x12f   : > { %5350 = vmatpush3.bf16.msra.mxu1 %v6037_v53  ;;  %5329 = vmatprep.subr.bf16.mxu0 %v6492_v0 }
 0x130   : > { %5351 = vmatprep.subr.bf16.mxu1 %v6492_v0  ;;  %v1046_v53 = vsel %vm1045_vm5, %v1043_v51, %v1044_v52  ;;  %v1047_v54 = vsel %vm1045_vm5, %v1044_v52, %v1043_v51 }
 0x132   : > { %5330 = vmatpush3.bf16.msra.mxu0 %v6038_v56  ;;  %v6089_v56 = vld [vmem:[#allocation5 + $0x160] sm:$0xff]  }
 0x133   : > { %5352 = vmatpush3.bf16.msra.mxu1 %v6039_v57  ;;  %5331 = vmatprep.subr.bf16.mxu0 %v6492_v0  ;;  %v4650_v57 = vpack.c.bf16 %v1047_v54, %v1046_v53 }
 0x134   : > { %5353 = vmatprep.subr.bf16.mxu1 %v6492_v0 }
 0x136   : > { %5332 = vmatpush3.bf16.msra.mxu0 %v6040_v59  ;;  %v6068_v59 = vld [vmem:[#allocation7 + $0xb8] sm:$0xff]  }
 0x137   : > { %5354 = vmatpush3.bf16.msra.mxu1 %v6041_v60  ;;  %5333 = vmatprep.subr.bf16.mxu0 %v6492_v0  ;;  %v6069_v60 = vld [vmem:[#allocation7 + $0xf0] sm:$0xff]  }
 0x138   : > { %5355 = vmatprep.subr.bf16.mxu1 %v6492_v0 }
 0x13a   : > { %5334 = vmatpush3.bf16.msra.mxu0 %v6042_v61  ;;  %v6070_v61 = vld [vmem:[#allocation7 + $0xb0] sm:$0xff]  }
 0x13b   : > { %5335 = vmatprep.subr.bf16.mxu0 %v6492_v0  ;;  %5356 = vmatpush3.bf16.msra.mxu1 %v6043_v62  ;;  %v6071_v62 = vld [vmem:[#allocation7 + $0xe8] sm:$0xff]  }
 0x13c   : > { %5357 = vmatprep.subr.bf16.mxu1 %v6492_v0 }
 0x13e   : > { %5336 = vmatpush3.bf16.msra.mxu0 %v6044_v63  ;;  %v6072_v63 = vld [vmem:[#allocation7 + $0xa8] sm:$0xff]  }
 0x13f   : > { %5358 = vmatpush3.bf16.msra.mxu1 %v6045_v1  ;;  %5337 = vmatprep.subr.bf16.mxu0 %v6492_v0  ;;  %v6073_v1 = vld [vmem:[#allocation7 + $0xe0] sm:$0xff]  }
 0x140   : > { %5359 = vmatprep.subr.bf16.mxu1 %v6492_v0 }
 0x142   : > { %5338 = vmatpush3.bf16.msra.mxu0 %v6046_v2  ;;  %v6074_v2 = vld [vmem:[#allocation7 + $0xa0] sm:$0xff]  }
 0x143   : > { %5360 = vmatpush3.bf16.msra.mxu1 %v6047_v3  ;;  %5339 = vmatprep.subr.bf16.mxu0 %v6492_v0  ;;  %v6075_v3 = vld [vmem:[#allocation7 + $0xd8] sm:$0xff]  }
 0x144   : > { %5361 = vmatprep.subr.bf16.mxu1 %v6492_v0 }
 0x146   : > { %5340 = vmatpush3.bf16.msra.mxu0 %v6048_v4  ;;  %v6076_v4 = vld [vmem:[#allocation7 + $0x98] sm:$0xff]  }
 0x147   : > { %5362 = vmatpush3.bf16.msra.mxu1 %v6049_v5  ;;  %5341 = vmatprep.subr.bf16.mxu0 %v6492_v0  ;;  %v6077_v5 = vld [vmem:[#allocation7 + $0xd0] sm:$0xff]  }
 0x148   : > { %5387 = vmatprep.subr.bf16.mxu1 %v6492_v0 }
 0x14a   : > { %5342 = vmatpush3.bf16.msra.mxu0 %v6050_v6  ;;  %v6078_v6 = vld [vmem:[#allocation7 + $0x90] sm:$0xff]  }
 0x14b   : > { %5367 = vmatprep.subr.bf16.mxu0 %v6492_v0 }
 0x1ea   : > { %v783_v7 = vpop.f32.mrf.mxu1 }
 0x1ec   : > { %v5325_v9 = vpop.f32.mrf.mxu1 }
 0x1ed   : > { %v668_v10 = vpop.f32.mrf.mxu0  ;;  %v6081_v9 = vld [vmem:[#allocation7 + $0xc0] sm:$0xff]  }
 0x1ee   : > { %v681_v11 = vadd.f32 %v4609_v8, %v668_v10  ;;  %v786_v12 = vpop.f32.mrf.mxu1  ;;  %v6082_v10 = vld [vmem:[#allocation7 + $0x80] sm:$0xff]  }
 0x1ef   : > { %v5305_v13 = vpop.f32.mrf.mxu0 }
 0x1f0   : > { %v790_v14 = vadd.f32 %v783_v7, %v681_v11  ;;  %v5326_v15 = vpop.f32.mrf.mxu1  ;;  %v6079_v7 = vld [vmem:[#allocation7 + $0xc8] sm:$0xff]  }
 0x1f1   : > { %v671_v16 = vpop.f32.mrf.mxu0 }
 0x1f2   : > { %v682_v17 = vadd.f32 %v4609_v8, %v671_v16  ;;  %v792_v19 = vmax.f32 %v790_v14, 0.0  ;;  %v6080_v8 = vld [vmem:[#allocation7 + $0x88] sm:$0xff]  }
 0x1f3   : > { %v5306_v18 = vpop.f32.mrf.mxu0 }
 0x1f4   : > { %v791_v20 = vadd.f32 %v786_v12, %v682_v17  ;;  %v796_v23 = vrot.slane %v792_v19, 7 }
 0x1f6   : > { %v793_v21 = vmax.f32 %v791_v20, 0.0 }
 0x1f8   : > { %v797_v24 = vrot.slane %v793_v21, 7  ;;  %v917_v25 = vpack.c.bf16 %v793_v21, %v792_v19  ;;  %v4630_v19 = vld [vmem:[%s7299_s4 + $0x1] ss:$0 sm:$0xff] }
 0x1fa   : > { %v798_v26 = vsel %vm562_vm1, %v796_v23, %v797_v24  ;;  %v799_v27 = vsel %vm562_vm1, %v797_v24, %v796_v23  ;;  %5364 = vmatmul.mubr.bf16.vlgmr.msra.gmra.mxu1 %v917_v25  ;;  %vm7016_vm1 = vmpackc.low %vm6494_vm3, %vm2525_vm15 }
 0x1fb   : > { %v4628_v29 = vpack.c.bf16 %v798_v26, %v799_v27  ;;  %5388 = vmatpush3.bf16.msra.mxu1 %v6051_v22  ;;  %5403 = vmatprep.mubr.msk.bf16.mxu1 %vm6493_vm0, %v6492_v0 }
 0x1fc   : > { %5389 = vmatprep.subr.bf16.mxu1 %v6492_v0 }
 0x1fd   : > { %5344 = vmatmul.mubr.msk.bf16.vlgmr.msra.gmra.mxu0 %vm6700_vm4, %v4628_v29  ;;  %v4652_v29 = vld [vmem:[%s7301_s6] ss:$0 sm:$0xff]  ;;  %vm7095_vm4 = vmpackc.low %vm3010_vm2, %vm6494_vm3 }
 0x1fe   : > { %5368 = vmatpush3.bf16.msra.mxu0 %v6052_v28  ;;  %5383 = vmatprep.mubr.msk.bf16.mxu0 %vm6493_vm0, %v6492_v0 }
 0x1ff   : > { %5390 = vmatpush3.bf16.msra.mxu1 %v6053_v30  ;;  %5369 = vmatprep.subr.bf16.mxu0 %v6492_v0 }
 0x200   : > { %5391 = vmatprep.subr.bf16.mxu1 %v6492_v0 }
 0x202   : > { %5370 = vmatpush3.bf16.msra.mxu0 %v6054_v31 }
 0x203   : > { %5392 = vmatpush3.bf16.msra.mxu1 %v6055_v32  ;;  %5371 = vmatprep.subr.bf16.mxu0 %v6492_v0 }
 0x204   : > { %5393 = vmatprep.subr.bf16.mxu1 %v6492_v0 }
 0x206   : > { %5372 = vmatpush3.bf16.msra.mxu0 %v6056_v33 }
 0x207   : > { %5394 = vmatpush3.bf16.msra.mxu1 %v6057_v34  ;;  %5373 = vmatprep.subr.bf16.mxu0 %v6492_v0 }
 0x208   : > { %5395 = vmatprep.subr.bf16.mxu1 %v6492_v0 }
 0x20a   : > { %5374 = vmatpush3.bf16.msra.mxu0 %v6058_v35 }
 0x20b   : > { %5396 = vmatpush3.bf16.msra.mxu1 %v6059_v36  ;;  %5375 = vmatprep.subr.bf16.mxu0 %v6492_v0 }
 0x20c   : > { %5397 = vmatprep.subr.bf16.mxu1 %v6492_v0 }
 0x20e   : > { %5376 = vmatpush3.bf16.msra.mxu0 %v6060_v37 }
 0x20f   : > { %5398 = vmatpush3.bf16.msra.mxu1 %v6061_v40  ;;  %5377 = vmatprep.subr.bf16.mxu0 %v6492_v0 }
 0x210   : > { %5399 = vmatprep.subr.bf16.mxu1 %v6492_v0 }
 0x212   : > { %5378 = vmatpush3.bf16.msra.mxu0 %v6062_v43 }
 0x213   : > { %5400 = vmatpush3.bf16.msra.mxu1 %v6063_v44  ;;  %5379 = vmatprep.subr.bf16.mxu0 %v6492_v0 }
 0x214   : > { %5401 = vmatprep.subr.bf16.mxu1 %v6492_v0 }
 0x216   : > { %5380 = vmatpush3.bf16.msra.mxu0 %v6064_v47 }
 0x217   : > { %5402 = vmatpush3.bf16.msra.mxu1 %v6065_v48  ;;  %5381 = vmatprep.subr.bf16.mxu0 %v6492_v0  ;;  %v6083_v48 = vld [vmem:[#allocation5 + $0x178] sm:$0xff]  }
 0x218   : > { %5427 = vmatprep.subr.bf16.mxu1 %v6492_v0 }
 0x21a   : > { %5382 = vmatpush3.bf16.msra.mxu0 %v6066_v50  ;;  %5404 = vmatmul.mubr.bf16.vlgmr.msra.gmra.mxu1 %v1166_v55 }
 0x21b   : > { %5407 = vmatprep.subr.bf16.mxu0 %v6492_v0  ;;  %5443 = vmatprep.mubr.msk.bf16.mxu1 %vm6493_vm0, %v6492_v0 }
 0x21c   : > { %5428 = vmatpush3.bf16.msra.mxu1 %v6067_v58 }
 0x21d   : > { %5384 = vmatmul.mubr.msk.bf16.vlgmr.msra.gmra.mxu0 %vm6781_vm7, %v4650_v57  ;;  %5429 = vmatprep.subr.bf16.mxu1 %v6492_v0  ;;  %v6084_v57 = vld [vmem:[#allocation5 + $0x138] sm:$0xff]  }
 0x21e   : > { %5423 = vmatprep.mubr.msk.bf16.mxu0 %vm6493_vm0, %v6492_v0  ;;  %5408 = vmatpush3.bf16.msra.mxu0 %v6068_v59 }
 0x21f   : > { %5409 = vmatprep.subr.bf16.mxu0 %v6492_v0 }
 0x220   : > { %5430 = vmatpush3.bf16.msra.mxu1 %v6069_v60  ;;  %v6085_v60 = vld [vmem:[#allocation5 + $0x170] sm:$0xff]  }
 0x221   : > { %5431 = vmatprep.subr.bf16.mxu1 %v6492_v0 }
 0x222   : > { %5410 = vmatpush3.bf16.msra.mxu0 %v6070_v61 }
 0x223   : > { %5411 = vmatprep.subr.bf16.mxu0 %v6492_v0 }
 0x224   : > { %5432 = vmatpush3.bf16.msra.mxu1 %v6071_v62 }
 0x225   : > { %5433 = vmatprep.subr.bf16.mxu1 %v6492_v0 }
 0x226   : > { %5412 = vmatpush3.bf16.msra.mxu0 %v6072_v63  ;;  %v6086_v63 = vld [vmem:[#allocation5 + $0x130] sm:$0xff]  }
 0x227   : > { %5413 = vmatprep.subr.bf16.mxu0 %v6492_v0 }
 0x228   : > { %5434 = vmatpush3.bf16.msra.mxu1 %v6073_v1  ;;  %v6087_v1 = vld [vmem:[#allocation5 + $0x168] sm:$0xff]  }
 0x229   : > { %5435 = vmatprep.subr.bf16.mxu1 %v6492_v0 }
 0x22a   : > { %5414 = vmatpush3.bf16.msra.mxu0 %v6074_v2  ;;  %v6088_v2 = vld [vmem:[#allocation5 + $0x128] sm:$0xff]  }
 0x22b   : > { %5415 = vmatprep.subr.bf16.mxu0 %v6492_v0 }
 0x22c   : > { %5436 = vmatpush3.bf16.msra.mxu1 %v6075_v3  ;;  %v6090_v3 = vld [vmem:[#allocation5 + $0x120] sm:$0xff]  }
 0x22d   : > { %5437 = vmatprep.subr.bf16.mxu1 %v6492_v0 }
 0x22e   : > { %5416 = vmatpush3.bf16.msra.mxu0 %v6076_v4  ;;  %v6091_v4 = vld [vmem:[#allocation5 + $0x158] sm:$0xff]  }
 0x22f   : > { %5417 = vmatprep.subr.bf16.mxu0 %v6492_v0 }
 0x230   : > { %5438 = vmatpush3.bf16.msra.mxu1 %v6077_v5  ;;  %v6092_v5 = vld [vmem:[#allocation5 + $0x118] sm:$0xff]  }
 0x231   : > { %5439 = vmatprep.subr.bf16.mxu1 %v6492_v0 }
 0x232   : > { %5418 = vmatpush3.bf16.msra.mxu0 %v6078_v6  ;;  %v6093_v6 = vld [vmem:[#allocation5 + $0x150] sm:$0xff]  }
 0x233   : > { %5419 = vmatprep.subr.bf16.mxu0 %v6492_v0 }
 0x234   : > { %5440 = vmatpush3.bf16.msra.mxu1 %v6079_v7 }
 0x235   : > { %5441 = vmatprep.subr.bf16.mxu1 %v6492_v0 }
 0x236   : > { %5420 = vmatpush3.bf16.msra.mxu0 %v6080_v8  ;;  %v6094_v8 = vld [vmem:[#allocation5 + $0x110] sm:$0xff]  }
 0x237   : > { %5421 = vmatprep.subr.bf16.mxu0 %v6492_v0 }
 0x238   : > { %5442 = vmatpush3.bf16.msra.mxu1 %v6081_v9 }
 0x239   : > { %5467 = vmatprep.subr.bf16.mxu1 %v6492_v0 }
 0x23a   : > { %5422 = vmatpush3.bf16.msra.mxu0 %v6082_v10  ;;  %v6095_v10 = vld [vmem:[#allocation5 + $0x148] sm:$0xff]  }
 0x23b   : > { %5447 = vmatprep.subr.bf16.mxu0 %v6492_v0 }
 0x2ba   : > { %v1017_v11 = vpop.f32.mrf.mxu1 }
 0x2bc   : > { %v5365_v12 = vpop.f32.mrf.mxu1 }
 0x2bd   : > { %v902_v13 = vpop.f32.mrf.mxu0  ;;  %v6096_v12 = vld [vmem:[#allocation5 + $0x108] sm:$0xff]  }
 0x2be   : > { %v1020_v14 = vpop.f32.mrf.mxu1  ;;  %v915_v21 = vadd.f32 %v4630_v19, %v902_v13 }
 0x2bf   : > { %v5345_v15 = vpop.f32.mrf.mxu0 }
 0x2c0   : > { %v5366_v16 = vpop.f32.mrf.mxu1  ;;  %v1024_v23 = vadd.f32 %v1017_v11, %v915_v21  ;;  %v6099_v21 = vld [vmem:[#allocation5 + $0x1f8] sm:$0xff]  }
 0x2c1   : > { %v905_v17 = vpop.f32.mrf.mxu0  ;;  %v6098_v16 = vld [vmem:[#allocation5 + $0x100] sm:$0xff]  }
 0x2c2   : > { %v916_v20 = vadd.f32 %v4630_v19, %v905_v17  ;;  %v1026_v25 = vmax.f32 %v1024_v23, 0.0  ;;  %v6101_v23 = vld [vmem:[#allocation5 + $0x1f0] sm:$0xff]   ;;  %v6121_v19 = vld [vmem:[#allocation7 + $0x160] sm:$0xff]  }
 0x2c3   : > { %v5346_v18 = vpop.f32.mrf.mxu0 }
 0x2c4   : > { %v1025_v22 = vadd.f32 %v1020_v14, %v916_v20  ;;  %v4639_v27 = vmul.f32 -1.442695, %v1026_v25  ;;  %v6097_v14 = vld [vmem:[#allocation5 + $0x140] sm:$0xff]   ;;  %v6103_v25 = vld [vmem:[#allocation5 + $0x1e8] sm:$0xff]  }
 0x2c6   : > { %v1027_v24 = vmax.f32 %v1025_v22, 0.0  ;;  %v6100_v22 = vld [vmem:[#allocation5 + $0x1b8] sm:$0xff]  }
 0x2c8   : > { %v4640_v26 = vmul.f32 -1.442695, %v1027_v24  ;;  %v6102_v24 = vld [vmem:[#allocation5 + $0x1b0] sm:$0xff]  }
 0x2ca   : > { %6275 = vpow2.f32 %v4640_v26  ;;  %v6104_v26 = vld [vmem:[#allocation5 + $0x1a8] sm:$0xff]  }
 0x2cb   : > { %6277 = vpow2.f32 %v4639_v27  ;;  %v6105_v27 = vld [vmem:[#allocation5 + $0x1e0] sm:$0xff]  }
 0x2d7   : > { %v6276_v53 = vpop.eup %6275 }
 0x2d8   : > { %v6278_v58 = vpop.eup %6277  ;;  %v1035_v61 = vadd.f32 1.0, %v6276_v53 }
 0x2d9   : > { %v1034_v62 = vadd.f32 1.0, %v6278_v58 }
 0x2da   : > { %v1266_v28 = vpop.f32.mrf.mxu1  ;;  %6279 = vrcp.f32 %v1035_v61 }
 0x2db   : > { %6281 = vrcp.f32 %v1034_v62 }
 0x2dc   : > { %v5405_v30 = vpop.f32.mrf.mxu1 }
 0x2dd   : > { %v1151_v31 = vpop.f32.mrf.mxu0  ;;  %v6108_v30 = vld [vmem:[#allocation5 + $0x198] sm:$0xff]  }
 0x2de   : > { %v1164_v32 = vadd.f32 %v4652_v29, %v1151_v31  ;;  %v1269_v33 = vpop.f32.mrf.mxu1  ;;  %v6109_v31 = vld [vmem:[#allocation5 + $0x1d0] sm:$0xff]  }
 0x2df   : > { %v5385_v34 = vpop.f32.mrf.mxu0 }
 0x2e0   : > { %v1273_v35 = vadd.f32 %v1266_v28, %v1164_v32  ;;  %v5406_v36 = vpop.f32.mrf.mxu1  ;;  %v6106_v28 = vld [vmem:[#allocation5 + $0x1a0] sm:$0xff]   ;;  %v6110_v32 = vld [vmem:[#allocation5 + $0x190] sm:$0xff]   ;;  %v6112_v34 = vld [vmem:[#allocation5 + $0x188] sm:$0xff]  }
 0x2e1   : > { %v1154_v37 = vpop.f32.mrf.mxu0  ;;  %v6114_v36 = vld [vmem:[#allocation5 + $0x180] sm:$0xff]  }
 0x2e2   : > { %v1165_v40 = vadd.f32 %v4652_v29, %v1154_v37  ;;  %v1275_v43 = vmax.f32 %v1273_v35, 0.0  ;;  %v6107_v29 = vld [vmem:[#allocation5 + $0x1d8] sm:$0xff]   ;;  %v6113_v35 = vld [vmem:[#allocation5 + $0x1c0] sm:$0xff]  }
 0x2e3   : > { %v5386_v42 = vpop.f32.mrf.mxu0 }
 0x2e4   : > { %v1274_v44 = vadd.f32 %v1269_v33, %v1165_v40  ;;  %v1279_v51 = vrot.slane %v1275_v43, 1  ;;  %v6111_v33 = vld [vmem:[#allocation5 + $0x1c8] sm:$0xff]   ;;  %v4673_v40 = vld [vmem:[%s7301_s6 + $0x1] ss:$0 sm:$0xff] }
 0x2e6   : > { %v1276_v47 = vmax.f32 %v1274_v44, 0.0 }
 0x2e7   : > { %v6280_v7 = vpop.eup %6279 }
 0x2e8   : > { %v1280_v52 = vrot.slane %v1276_v47, 1  ;;  %v1400_v50 = vpack.c.bf16 %v1276_v47, %v1275_v43  ;;  %v6282_v9 = vpop.eup %6281  ;;  %v6836_v11 = vmul.f32 %v6280_v7, %v6687_v41 }
 0x2e9   : > { %v6839_v13 = vmul.f32 %v6282_v9, %v6685_v39 }
 0x2ea   : > { %v1281_v54 = vsel %vm1045_vm5, %v1279_v51, %v1280_v52  ;;  %v1282_v55 = vsel %vm1045_vm5, %v1280_v52, %v1279_v51  ;;  %5444 = vmatmul.mubr.bf16.vlgmr.msra.gmra.mxu1 %v1400_v50  ;;  %v1540_v15 = vrot.slane %v6836_v11, 6 }
 0x2eb   : > { %v4671_v59 = vpack.c.bf16 %v1282_v55, %v1281_v54  ;;  %5468 = vmatpush3.bf16.msra.mxu1 %v6083_v48  ;;  %5483 = vmatprep.mubr.msk.bf16.mxu1 %vm6493_vm0, %v6492_v0  ;;  %v1539_v41 = vrot.slane %v6839_v13, 6  ;;  %v1663_v39 = vpack.c.bf16 %v6836_v11, %v6839_v13 }
 0x2ec   : > { %5469 = vmatprep.subr.bf16.mxu1 %v6492_v0 }
 0x2ed   : > { %5424 = vmatmul.mubr.msk.bf16.vlgmr.msra.gmra.mxu0 %vm6781_vm7, %v4671_v59  ;;  %v1542_v17 = vsel %vm1541_vm8, %v1539_v41, %v1540_v15  ;;  %v1543_v18 = vsel %vm1541_vm8, %v1540_v15, %v1539_v41 }
 0x2ee   : > { %5448 = vmatpush3.bf16.msra.mxu0 %v6084_v57  ;;  %5463 = vmatprep.mubr.msk.bf16.mxu0 %vm6493_vm0, %v6492_v0  ;;  %v4694_v20 = vpack.c.bf16 %v1542_v17, %v1543_v18 }
 0x2ef   : > { %5470 = vmatpush3.bf16.msra.mxu1 %v6085_v60  ;;  %5449 = vmatprep.subr.bf16.mxu0 %v6492_v0 }
 0x2f0   : > { %5471 = vmatprep.subr.bf16.mxu1 %v6492_v0 }
 0x2f2   : > { %5450 = vmatpush3.bf16.msra.mxu0 %v6086_v63 }
 0x2f3   : > { %5472 = vmatpush3.bf16.msra.mxu1 %v6087_v1  ;;  %5451 = vmatprep.subr.bf16.mxu0 %v6492_v0 }
 0x2f4   : > { %5473 = vmatprep.subr.bf16.mxu1 %v6492_v0 }
 0x2f6   : > { %5452 = vmatpush3.bf16.msra.mxu0 %v6088_v2 }
 0x2f7   : > { %5474 = vmatpush3.bf16.msra.mxu1 %v6089_v56  ;;  %5453 = vmatprep.subr.bf16.mxu0 %v6492_v0  ;;  %v4696_v56 = vld [vmem:[%s7299_s4 + $0x2] ss:$0 sm:$0xff] }
 0x2f8   : > { %5475 = vmatprep.subr.bf16.mxu1 %v6492_v0 }
 0x2fa   : > { %5454 = vmatpush3.bf16.msra.mxu0 %v6090_v3 }
 0x2fb   : > { %5476 = vmatpush3.bf16.msra.mxu1 %v6091_v4  ;;  %5455 = vmatprep.subr.bf16.mxu0 %v6492_v0 }
 0x2fc   : > { %5477 = vmatprep.subr.bf16.mxu1 %v6492_v0 }
 0x2fe   : > { %5456 = vmatpush3.bf16.msra.mxu0 %v6092_v5 }
 0x2ff   : > { %5478 = vmatpush3.bf16.msra.mxu1 %v6093_v6  ;;  %5457 = vmatprep.subr.bf16.mxu0 %v6492_v0 }
 0x300   : > { %5479 = vmatprep.subr.bf16.mxu1 %v6492_v0 }
 0x302   : > { %5458 = vmatpush3.bf16.msra.mxu0 %v6094_v8 }
 0x303   : > { %5480 = vmatpush3.bf16.msra.mxu1 %v6095_v10  ;;  %5459 = vmatprep.subr.bf16.mxu0 %v6492_v0 }
 0x304   : > { %5481 = vmatprep.subr.bf16.mxu1 %v6492_v0 }
 0x306   : > { %5460 = vmatpush3.bf16.msra.mxu0 %v6096_v12 }
 0x307   : > { %5482 = vmatpush3.bf16.msra.mxu1 %v6097_v14  ;;  %5461 = vmatprep.subr.bf16.mxu0 %v6492_v0 }
 0x308   : > { %5507 = vmatprep.subr.bf16.mxu1 %v6492_v0 }
 0x30a   : > { %5462 = vmatpush3.bf16.msra.mxu0 %v6098_v16  ;;  %5484 = vmatmul.mubr.bf16.vlgmr.msra.gmra.mxu1 %v1663_v39 }
 0x30b   : > { %5487 = vmatprep.subr.bf16.mxu0 %v6492_v0  ;;  %5523 = vmatprep.mubr.msk.bf16.mxu1 %vm6493_vm0, %v6492_v0 }
 0x30c   : > { %5508 = vmatpush3.bf16.msra.mxu1 %v6099_v21 }
 0x30d   : > { %5464 = vmatmul.mubr.msk.bf16.vlgmr.msra.gmra.mxu0 %vm6856_vm10, %v4694_v20  ;;  %5509 = vmatprep.subr.bf16.mxu1 %v6492_v0  ;;  %v6115_v20 = vld [vmem:[#allocation7 + $0x178] sm:$0xff]  }
 0x30e   : > { %5503 = vmatprep.mubr.msk.bf16.mxu0 %vm6493_vm0, %v6492_v0  ;;  %5488 = vmatpush3.bf16.msra.mxu0 %v6100_v22 }
 0x30f   : > { %5489 = vmatprep.subr.bf16.mxu0 %v6492_v0 }
 0x310   : > { %5510 = vmatpush3.bf16.msra.mxu1 %v6101_v23 }
 0x311   : > { %5511 = vmatprep.subr.bf16.mxu1 %v6492_v0 }
 0x312   : > { %5490 = vmatpush3.bf16.msra.mxu0 %v6102_v24 }
 0x313   : > { %5491 = vmatprep.subr.bf16.mxu0 %v6492_v0 }
 0x314   : > { %5512 = vmatpush3.bf16.msra.mxu1 %v6103_v25 }
 0x315   : > { %5513 = vmatprep.subr.bf16.mxu1 %v6492_v0 }
 0x316   : > { %5492 = vmatpush3.bf16.msra.mxu0 %v6104_v26 }
 0x317   : > { %5493 = vmatprep.subr.bf16.mxu0 %v6492_v0 }
 0x318   : > { %5514 = vmatpush3.bf16.msra.mxu1 %v6105_v27  ;;  %v6116_v27 = vld [vmem:[#allocation7 + $0x138] sm:$0xff]  }
 0x319   : > { %5515 = vmatprep.subr.bf16.mxu1 %v6492_v0 }
 0x31a   : > { %5494 = vmatpush3.bf16.msra.mxu0 %v6106_v28 }
 0x31b   : > { %5495 = vmatprep.subr.bf16.mxu0 %v6492_v0 }
 0x31c   : > { %5516 = vmatpush3.bf16.msra.mxu1 %v6107_v29 }
 0x31d   : > { %5517 = vmatprep.subr.bf16.mxu1 %v6492_v0 }
 0x31e   : > { %5496 = vmatpush3.bf16.msra.mxu0 %v6108_v30  ;;  %v6117_v30 = vld [vmem:[#allocation7 + $0x170] sm:$0xff]  }
 0x31f   : > { %5497 = vmatprep.subr.bf16.mxu0 %v6492_v0 }
 0x320   : > { %5518 = vmatpush3.bf16.msra.mxu1 %v6109_v31  ;;  %v6118_v31 = vld [vmem:[#allocation7 + $0x130] sm:$0xff]  }
 0x321   : > { %5519 = vmatprep.subr.bf16.mxu1 %v6492_v0 }
 0x322   : > { %5498 = vmatpush3.bf16.msra.mxu0 %v6110_v32 }
 0x323   : > { %5499 = vmatprep.subr.bf16.mxu0 %v6492_v0 }
 0x324   : > { %5520 = vmatpush3.bf16.msra.mxu1 %v6111_v33  ;;  %v6119_v33 = vld [vmem:[#allocation7 + $0x168] sm:$0xff]  }
 0x325   : > { %5521 = vmatprep.subr.bf16.mxu1 %v6492_v0 }
 0x326   : > { %5500 = vmatpush3.bf16.msra.mxu0 %v6112_v34 }
 0x327   : > { %5501 = vmatprep.subr.bf16.mxu0 %v6492_v0 }
 0x328   : > { %5522 = vmatpush3.bf16.msra.mxu1 %v6113_v35  ;;  %v6120_v35 = vld [vmem:[#allocation7 + $0x128] sm:$0xff]  }
 0x329   : > { %5547 = vmatprep.subr.bf16.mxu1 %v6492_v0 }
 0x32a   : > { %5502 = vmatpush3.bf16.msra.mxu0 %v6114_v36 }
 0x32b   : > { %5527 = vmatprep.subr.bf16.mxu0 %v6492_v0 }
 0x3aa   : > { %v1500_v37 = vpop.f32.mrf.mxu1 }
 0x3ac   : > { %v5445_v42 = vpop.f32.mrf.mxu1 }
 0x3ad   : > { %v1385_v43 = vpop.f32.mrf.mxu0 }
 0x3ae   : > { %v1398_v44 = vadd.f32 %v4673_v40, %v1385_v43  ;;  %v1503_v47 = vpop.f32.mrf.mxu1  ;;  %v6123_v43 = vld [vmem:[#allocation7 + $0x158] sm:$0xff]  }
 0x3af   : > { %v5425_v48 = vpop.f32.mrf.mxu0 }
 0x3b0   : > { %v1507_v51 = vadd.f32 %v1500_v37, %v1398_v44  ;;  %v5446_v52 = vpop.f32.mrf.mxu1 }
 0x3b1   : > { %v1388_v50 = vpop.f32.mrf.mxu0  ;;  %v6126_v52 = vld [vmem:[#allocation7 + $0x110] sm:$0xff]  }
 0x3b2   : > { %v1509_v53 = vmax.f32 %v1507_v51, 0.0  ;;  %v1399_v54 = vadd.f32 %v4673_v40, %v1388_v50  ;;  %v6122_v40 = vld [vmem:[#allocation7 + $0x120] sm:$0xff]   ;;  %v6125_v51 = vld [vmem:[#allocation7 + $0x150] sm:$0xff]   ;;  %v6127_v50 = vld [vmem:[#allocation7 + $0x148] sm:$0xff]  }
 0x3b3   : > { %v5426_v55 = vpop.f32.mrf.mxu0 }
 0x3b4   : > { %v4682_v57 = vmul.f32 -1.442695, %v1509_v53  ;;  %v1508_v58 = vadd.f32 %v1503_v47, %v1399_v54  ;;  %v6124_v47 = vld [vmem:[#allocation7 + $0x118] sm:$0xff]   ;;  %v6128_v53 = vld [vmem:[#allocation7 + $0x108] sm:$0xff]   ;;  %v6129_v54 = vld [vmem:[#allocation7 + $0x140] sm:$0xff]  }
 0x3b6   : > { %6283 = vpow2.f32 %v4682_v57  ;;  %v1510_v59 = vmax.f32 %v1508_v58, 0.0  ;;  %v6130_v57 = vld [vmem:[#allocation7 + $0x100] sm:$0xff]  }
 0x3b8   : > { %v4683_v60 = vmul.f32 -1.442695, %v1510_v59 }
 0x3ba   : > { %6285 = vpow2.f32 %v4683_v60 }
 0x3c3   : > { %v6284_v61 = vpop.eup %6283 }
 0x3c4   : > { %v1517_v62 = vadd.f32 1.0, %v6284_v61 }
 0x3c6   : > { %6287 = vrcp.f32 %v1517_v62  ;;  %v6153_v62 = vld [vmem:[#allocation5 + $0x260] sm:$0xff]  }
 0x3c7   : > { %v6286_v63 = vpop.eup %6285 }
 0x3c8   : > { %v1518_v1 = vadd.f32 1.0, %v6286_v63 }
 0x3ca   : > { %6289 = vrcp.f32 %v1518_v1  ;;  %v1763_v2 = vpop.f32.mrf.mxu1  ;;  %v6131_v1 = vld [vmem:[#allocation7 + $0x1f8] sm:$0xff]  }
 0x3cc   : > { %v5485_v3 = vpop.f32.mrf.mxu1 }
 0x3cd   : > { %v1648_v4 = vpop.f32.mrf.mxu0  ;;  %v6134_v3 = vld [vmem:[#allocation7 + $0x1b0] sm:$0xff]  }
 0x3ce   : > { %v1661_v5 = vadd.f32 %v4696_v56, %v1648_v4  ;;  %v1766_v6 = vpop.f32.mrf.mxu1  ;;  %v6135_v4 = vld [vmem:[#allocation7 + $0x1e8] sm:$0xff]  }
 0x3cf   : > { %v5465_v7 = vpop.f32.mrf.mxu0 }
 0x3d0   : > { %v1770_v8 = vadd.f32 %v1763_v2, %v1661_v5  ;;  %v5486_v9 = vpop.f32.mrf.mxu1  ;;  %v6132_v2 = vld [vmem:[#allocation7 + $0x1b8] sm:$0xff]   ;;  %v6136_v5 = vld [vmem:[#allocation7 + $0x1a8] sm:$0xff]   ;;  %v6138_v7 = vld [vmem:[#allocation7 + $0x1a0] sm:$0xff]  }
 0x3d1   : > { %v1651_v10 = vpop.f32.mrf.mxu0  ;;  %v6140_v9 = vld [vmem:[#allocation7 + $0x198] sm:$0xff]  }
 0x3d2   : > { %v1662_v12 = vadd.f32 %v4696_v56, %v1651_v10  ;;  %v1772_v16 = vmax.f32 %v1770_v8, 0.0  ;;  %v6133_v56 = vld [vmem:[#allocation7 + $0x1f0] sm:$0xff]   ;;  %v6139_v8 = vld [vmem:[#allocation7 + $0x1d8] sm:$0xff]  }
 0x3d3   : > { %v6288_v14 = vpop.eup %6287  ;;  %v5466_v15 = vpop.f32.mrf.mxu0  ;;  %v6141_v10 = vld [vmem:[#allocation7 + $0x1d0] sm:$0xff]  }
 0x3d4   : > { %v1771_v41 = vadd.f32 %v1766_v6, %v1662_v12  ;;  %v6890_v17 = vmul.f32 %v6288_v14, %v6757_v45  ;;  %v1776_v21 = vrot.slane %v1772_v16, 6  ;;  %v6137_v6 = vld [vmem:[#allocation7 + $0x1e0] sm:$0xff]   ;;  %v6142_v12 = vld [vmem:[#allocation7 + $0x190] sm:$0xff]   ;;  %v6143_v14 = vld [vmem:[#allocation7 + $0x1c8] sm:$0xff]  }
 0x3d5   : > { %v6144_v15 = vld [vmem:[#allocation7 + $0x188] sm:$0xff]  }
 0x3d6   : > { %v1773_v39 = vmax.f32 %v1771_v41, 0.0  ;;  %v1525_v45 = vadd.f32 %v6890_v17, %v6839_v13  ;;  %v2024_v58 = vrot.slane %v6890_v17, 2  ;;  %v6146_v41 = vld [vmem:[#allocation7 + $0x180] sm:$0xff]  }
 0x3d7   : > { %v6290_v18 = vpop.eup %6289 }
 0x3d8   : > { %v1777_v22 = vrot.slane %v1773_v39, 6  ;;  %v1897_v23 = vpack.c.bf16 %v1773_v39, %v1772_v16  ;;  %v6893_v24 = vmul.f32 %v6290_v18, %v6760_v46  ;;  %v6145_v16 = vld [vmem:[#allocation7 + $0x1c0] sm:$0xff]  }
 0x3da   : > { %v1778_v25 = vsel %vm1541_vm8, %v1776_v21, %v1777_v22  ;;  %v1779_v26 = vsel %vm1541_vm8, %v1777_v22, %v1776_v21  ;;  %5524 = vmatmul.mubr.bf16.vlgmr.msra.gmra.mxu1 %v1897_v23  ;;  %v1526_v28 = vadd.f32 %v6893_v24, %v6836_v11  ;;  %v2025_v55 = vrot.slane %v6893_v24, 2 }
 0x3db   : > { %v4715_v29 = vpack.c.bf16 %v1778_v25, %v1779_v26  ;;  %5548 = vmatpush3.bf16.msra.mxu1 %v6115_v20  ;;  %5563 = vmatprep.mubr.msk.bf16.mxu1 %vm6493_vm0, %v6492_v0  ;;  %v2148_v59 = vpack.c.bf16 %v6893_v24, %v6890_v17 }
 0x3dc   : > { %5549 = vmatprep.subr.bf16.mxu1 %v6492_v0  ;;  %v1527_v46 = vadd.f32 %v1526_v28, %v1525_v45  ;;  %v2027_v60 = vsel %vm2026_vm11, %v2024_v58, %v2025_v55  ;;  %v2028_v61 = vsel %vm2026_vm11, %v2025_v55, %v2024_v58 }
 0x3dd   : > { %5504 = vmatmul.mubr.msk.bf16.vlgmr.msra.gmra.mxu0 %vm6856_vm10, %v4715_v29  ;;  %v4738_v63 = vpack.c.bf16 %v2028_v61, %v2027_v60 }
 0x3de   : > { %5528 = vmatpush3.bf16.msra.mxu0 %v6116_v27  ;;  %5543 = vmatprep.mubr.msk.bf16.mxu0 %vm6493_vm0, %v6492_v0  ;;  %v1528_v32 = vrot.slane %v1527_v46, 4  ;;  %v4717_v27 = vld [vmem:[%s7299_s4 + $0x3] ss:$0 sm:$0xff] }
 0x3df   : > { %5550 = vmatpush3.bf16.msra.mxu1 %v6117_v30  ;;  %5529 = vmatprep.subr.bf16.mxu0 %v6492_v0 }
 0x3e0   : > { %5551 = vmatprep.subr.bf16.mxu1 %v6492_v0  ;;  %v1529_v34 = vadd.f32 %v1528_v32, %v1527_v46 }
 0x3e2   : > { %5530 = vmatpush3.bf16.msra.mxu0 %v6118_v31  ;;  %v1530_v36 = vrot.slane %v1529_v34, 2 }
 0x3e3   : > { %5552 = vmatpush3.bf16.msra.mxu1 %v6119_v33  ;;  %5531 = vmatprep.subr.bf16.mxu0 %v6492_v0 }
 0x3e4   : > { %5553 = vmatprep.subr.bf16.mxu1 %v6492_v0  ;;  %v1531_v37 = vadd.f32 %v1530_v36, %v1529_v34 }
 0x3e6   : > { %5532 = vmatpush3.bf16.msra.mxu0 %v6120_v35  ;;  %v1532_v42 = vrot.slane %v1531_v37, 1  ;;  %v4740_v35 = vld [vmem:[%s7301_s6 + $0x2] ss:$0 sm:$0xff] }
 0x3e7   : > { %5554 = vmatpush3.bf16.msra.mxu1 %v6121_v19  ;;  %5533 = vmatprep.subr.bf16.mxu0 %v6492_v0 }
 0x3e8   : > { %5555 = vmatprep.subr.bf16.mxu1 %v6492_v0  ;;  %v1533_v44 = vadd.f32 %v1532_v42, %v1531_v37 }
 0x3ea   : > { %5534 = vmatpush3.bf16.msra.mxu0 %v6122_v40  ;;  %v1535_v48 = vmul.f32 0.0625, %v1533_v44 }
 0x3eb   : > { %5556 = vmatpush3.bf16.msra.mxu1 %v6123_v43  ;;  %5535 = vmatprep.subr.bf16.mxu0 %v6492_v0 }
 0x3ec   : > { %5557 = vmatprep.subr.bf16.mxu1 %v6492_v0  ;;  %1536 = vst [vmem:[%s6921_s8] sm:$0x1] %v1535_v48 }
 0x3ee   : > { %5536 = vmatpush3.bf16.msra.mxu0 %v6124_v47 }
 0x3ef   : > { %5558 = vmatpush3.bf16.msra.mxu1 %v6125_v51  ;;  %5537 = vmatprep.subr.bf16.mxu0 %v6492_v0 }
 0x3f0   : > { %5559 = vmatprep.subr.bf16.mxu1 %v6492_v0 }
 0x3f2   : > { %5538 = vmatpush3.bf16.msra.mxu0 %v6126_v52 }
 0x3f3   : > { %5560 = vmatpush3.bf16.msra.mxu1 %v6127_v50  ;;  %5539 = vmatprep.subr.bf16.mxu0 %v6492_v0 }
 0x3f4   : > { %5561 = vmatprep.subr.bf16.mxu1 %v6492_v0 }
 0x3f6   : > { %5540 = vmatpush3.bf16.msra.mxu0 %v6128_v53 }
 0x3f7   : > { %5562 = vmatpush3.bf16.msra.mxu1 %v6129_v54  ;;  %5541 = vmatprep.subr.bf16.mxu0 %v6492_v0  ;;  %v6147_v54 = vld [vmem:[#allocation5 + $0x278] sm:$0xff]  }
 0x3f8   : > { %5587 = vmatprep.subr.bf16.mxu1 %v6492_v0 }
 0x3fa   : > { %5542 = vmatpush3.bf16.msra.mxu0 %v6130_v57  ;;  %5564 = vmatmul.mubr.bf16.vlgmr.msra.gmra.mxu1 %v2148_v59 }
 0x3fb   : > { %5567 = vmatprep.subr.bf16.mxu0 %v6492_v0  ;;  %5603 = vmatprep.mubr.msk.bf16.mxu1 %vm6493_vm0, %v6492_v0 }
 0x3fc   : > { %5588 = vmatpush3.bf16.msra.mxu1 %v6131_v1 }
 0x3fd   : > { %5544 = vmatmul.mubr.msk.bf16.vlgmr.msra.gmra.mxu0 %vm6941_vm13, %v4738_v63  ;;  %5589 = vmatprep.subr.bf16.mxu1 %v6492_v0  ;;  %v6148_v63 = vld [vmem:[#allocation5 + $0x238] sm:$0xff]  }
 0x3fe   : > { %5583 = vmatprep.mubr.msk.bf16.mxu0 %vm6493_vm0, %v6492_v0  ;;  %5568 = vmatpush3.bf16.msra.mxu0 %v6132_v2 }
 0x3ff   : > { %5569 = vmatprep.subr.bf16.mxu0 %v6492_v0 }
 0x400   : > { %5590 = vmatpush3.bf16.msra.mxu1 %v6133_v56  ;;  %v6149_v56 = vld [vmem:[#allocation5 + $0x270] sm:$0xff]  }
 0x401   : > { %5591 = vmatprep.subr.bf16.mxu1 %v6492_v0 }
 0x402   : > { %5570 = vmatpush3.bf16.msra.mxu0 %v6134_v3 }
 0x403   : > { %5571 = vmatprep.subr.bf16.mxu0 %v6492_v0 }
 0x404   : > { %5592 = vmatpush3.bf16.msra.mxu1 %v6135_v4 }
 0x405   : > { %5593 = vmatprep.subr.bf16.mxu1 %v6492_v0 }
 0x406   : > { %5572 = vmatpush3.bf16.msra.mxu0 %v6136_v5  ;;  %v6150_v5 = vld [vmem:[#allocation5 + $0x230] sm:$0xff]  }
 0x407   : > { %5573 = vmatprep.subr.bf16.mxu0 %v6492_v0 }
 0x408   : > { %5594 = vmatpush3.bf16.msra.mxu1 %v6137_v6  ;;  %v6151_v6 = vld [vmem:[#allocation5 + $0x268] sm:$0xff]  }
 0x409   : > { %5595 = vmatprep.subr.bf16.mxu1 %v6492_v0 }
 0x40a   : > { %5574 = vmatpush3.bf16.msra.mxu0 %v6138_v7  ;;  %v6152_v7 = vld [vmem:[#allocation5 + $0x228] sm:$0xff]  }
 0x40b   : > { %5575 = vmatprep.subr.bf16.mxu0 %v6492_v0 }
 0x40c   : > { %5596 = vmatpush3.bf16.msra.mxu1 %v6139_v8  ;;  %v6154_v8 = vld [vmem:[#allocation5 + $0x220] sm:$0xff]  }
 0x40d   : > { %5597 = vmatprep.subr.bf16.mxu1 %v6492_v0 }
 0x40e   : > { %5576 = vmatpush3.bf16.msra.mxu0 %v6140_v9  ;;  %v6155_v9 = vld [vmem:[#allocation5 + $0x258] sm:$0xff]  }
 0x40f   : > { %5577 = vmatprep.subr.bf16.mxu0 %v6492_v0 }
 0x410   : > { %5598 = vmatpush3.bf16.msra.mxu1 %v6141_v10  ;;  %v6156_v10 = vld [vmem:[#allocation5 + $0x218] sm:$0xff]  }
 0x411   : > { %5599 = vmatprep.subr.bf16.mxu1 %v6492_v0 }
 0x412   : > { %5578 = vmatpush3.bf16.msra.mxu0 %v6142_v12  ;;  %v6157_v12 = vld [vmem:[#allocation5 + $0x250] sm:$0xff]  }
 0x413   : > { %5579 = vmatprep.subr.bf16.mxu0 %v6492_v0 }
 0x414   : > { %5600 = vmatpush3.bf16.msra.mxu1 %v6143_v14 }
 0x415   : > { %5601 = vmatprep.subr.bf16.mxu1 %v6492_v0 }
 0x416   : > { %5580 = vmatpush3.bf16.msra.mxu0 %v6144_v15  ;;  %v6158_v15 = vld [vmem:[#allocation5 + $0x210] sm:$0xff]  }
 0x417   : > { %5581 = vmatprep.subr.bf16.mxu0 %v6492_v0 }
 0x418   : > { %5602 = vmatpush3.bf16.msra.mxu1 %v6145_v16 }
 0x419   : > { %5627 = vmatprep.subr.bf16.mxu1 %v6492_v0 }
 0x41a   : > { %5582 = vmatpush3.bf16.msra.mxu0 %v6146_v41  ;;  %v6159_v41 = vld [vmem:[#allocation5 + $0x248] sm:$0xff]  }
 0x41b   : > { %5607 = vmatprep.subr.bf16.mxu0 %v6492_v0 }
 0x49a   : > { %v1997_v39 = vpop.f32.mrf.mxu1 }
 0x49c   : > { %v5525_v18 = vpop.f32.mrf.mxu1 }
 0x49d   : > { %v1882_v20 = vpop.f32.mrf.mxu0  ;;  %v6160_v18 = vld [vmem:[#allocation5 + $0x208] sm:$0xff]  }
 0x49e   : > { %v2000_v21 = vpop.f32.mrf.mxu1  ;;  %v1895_v28 = vadd.f32 %v4717_v27, %v1882_v20 }
 0x49f   : > { %v5505_v22 = vpop.f32.mrf.mxu0 }
 0x4a0   : > { %v5526_v23 = vpop.f32.mrf.mxu1  ;;  %v2004_v30 = vadd.f32 %v1997_v39, %v1895_v28  ;;  %v6163_v28 = vld [vmem:[#allocation5 + $0x2f8] sm:$0xff]  }
 0x4a1   : > { %v1885_v25 = vpop.f32.mrf.mxu0  ;;  %v6162_v23 = vld [vmem:[#allocation5 + $0x200] sm:$0xff]  }
 0x4a2   : > { %v1896_v45 = vadd.f32 %v4717_v27, %v1885_v25  ;;  %v2006_v31 = vmax.f32 %v2004_v30, 0.0  ;;  %v6165_v30 = vld [vmem:[#allocation5 + $0x2f0] sm:$0xff]   ;;  %v6185_v27 = vld [vmem:[#allocation7 + $0x260] sm:$0xff]  }
 0x4a3   : > { %v5506_v26 = vpop.f32.mrf.mxu0 }
 0x4a4   : > { %v2005_v29 = vadd.f32 %v2000_v21, %v1896_v45  ;;  %v4726_v33 = vmul.f32 -1.442695, %v2006_v31  ;;  %v6161_v21 = vld [vmem:[#allocation5 + $0x240] sm:$0xff]   ;;  %v6167_v31 = vld [vmem:[#allocation5 + $0x2e8] sm:$0xff]  }
 0x4a6   : > { %v2007_v46 = vmax.f32 %v2005_v29, 0.0  ;;  %v6164_v29 = vld [vmem:[#allocation5 + $0x2b8] sm:$0xff]  }
 0x4a8   : > { %v4727_v32 = vmul.f32 -1.442695, %v2007_v46  ;;  %v6166_v46 = vld [vmem:[#allocation5 + $0x2b0] sm:$0xff]  }
 0x4aa   : > { %6291 = vpow2.f32 %v4727_v32  ;;  %v6168_v32 = vld [vmem:[#allocation5 + $0x2a8] sm:$0xff]  }
 0x4ab   : > { %6293 = vpow2.f32 %v4726_v33  ;;  %v6169_v33 = vld [vmem:[#allocation5 + $0x2e0] sm:$0xff]  }
 0x4b7   : > { %v6292_v59 = vpop.eup %6291 }
 0x4b8   : > { %v6294_v1 = vpop.eup %6293  ;;  %v2015_v3 = vadd.f32 1.0, %v6292_v59 }
 0x4b9   : > { %v2014_v4 = vadd.f32 1.0, %v6294_v1 }
 0x4ba   : > { %v2248_v34 = vpop.f32.mrf.mxu1  ;;  %6295 = vrcp.f32 %v2015_v3 }
 0x4bb   : > { %6297 = vrcp.f32 %v2014_v4 }
 0x4bc   : > { %v5565_v36 = vpop.f32.mrf.mxu1 }
 0x4bd   : > { %v2133_v19 = vpop.f32.mrf.mxu0  ;;  %v6172_v36 = vld [vmem:[#allocation5 + $0x298] sm:$0xff]  }
 0x4be   : > { %v2146_v37 = vadd.f32 %v4740_v35, %v2133_v19  ;;  %v2251_v40 = vpop.f32.mrf.mxu1  ;;  %v6173_v19 = vld [vmem:[#allocation5 + $0x2d0] sm:$0xff]  }
 0x4bf   : > { %v5545_v42 = vpop.f32.mrf.mxu0 }
 0x4c0   : > { %v2255_v43 = vadd.f32 %v2248_v34, %v2146_v37  ;;  %v5566_v44 = vpop.f32.mrf.mxu1  ;;  %v6170_v34 = vld [vmem:[#allocation5 + $0x2a0] sm:$0xff]   ;;  %v6174_v37 = vld [vmem:[#allocation5 + $0x290] sm:$0xff]   ;;  %v6176_v42 = vld [vmem:[#allocation5 + $0x288] sm:$0xff]  }
 0x4c1   : > { %v2136_v47 = vpop.f32.mrf.mxu0  ;;  %v6178_v44 = vld [vmem:[#allocation5 + $0x280] sm:$0xff]  }
 0x4c2   : > { %v2147_v48 = vadd.f32 %v4740_v35, %v2136_v47  ;;  %v2257_v52 = vmax.f32 %v2255_v43, 0.0  ;;  %v6171_v35 = vld [vmem:[#allocation5 + $0x2d8] sm:$0xff]   ;;  %v6177_v43 = vld [vmem:[#allocation5 + $0x2c0] sm:$0xff]  }
 0x4c3   : > { %v5546_v51 = vpop.f32.mrf.mxu0 }
 0x4c4   : > { %v2256_v50 = vadd.f32 %v2251_v40, %v2147_v48  ;;  %v2261_v55 = vrot.slane %v2257_v52, 2  ;;  %v6175_v40 = vld [vmem:[#allocation5 + $0x2c8] sm:$0xff]   ;;  %v4761_v48 = vld [vmem:[%s7301_s6 + $0x3] ss:$0 sm:$0xff] }
 0x4c6   : > { %v2258_v53 = vmax.f32 %v2256_v50, 0.0 }
 0x4c7   : > { %v6296_v14 = vpop.eup %6295 }
 0x4c8   : > { %v2262_v57 = vrot.slane %v2258_v53, 2  ;;  %v2382_v58 = vpack.c.bf16 %v2258_v53, %v2257_v52  ;;  %v6298_v16 = vpop.eup %6297  ;;  %v6996_v39 = vmul.f32 %v6296_v14, %v6836_v11 }
 0x4c9   : > { %v6999_v20 = vmul.f32 %v6298_v16, %v6839_v13 }
 0x4ca   : > { %v2263_v60 = vsel %vm2026_vm11, %v2261_v55, %v2262_v57  ;;  %v2264_v61 = vsel %vm2026_vm11, %v2262_v57, %v2261_v55  ;;  %5604 = vmatmul.mubr.bf16.vlgmr.msra.gmra.mxu1 %v2382_v58  ;;  %v2521_v22 = vrot.slane %v6996_v39, 4 }
 0x4cb   : > { %v4759_v2 = vpack.c.bf16 %v2264_v61, %v2263_v60  ;;  %5628 = vmatpush3.bf16.msra.mxu1 %v6147_v54  ;;  %5643 = vmatprep.mubr.msk.bf16.mxu1 %vm6493_vm0, %v6492_v0  ;;  %v2520_v11 = vrot.slane %v6999_v20, 4  ;;  %v2644_v13 = vpack.c.bf16 %v6996_v39, %v6999_v20 }
 0x4cc   : > { %5629 = vmatprep.subr.bf16.mxu1 %v6492_v0 }
 0x4cd   : > { %5584 = vmatmul.mubr.msk.bf16.vlgmr.msra.gmra.mxu0 %vm6941_vm13, %v4759_v2  ;;  %v2523_v25 = vsel %vm2522_vm14, %v2520_v11, %v2521_v22  ;;  %v2524_v26 = vsel %vm2522_vm14, %v2521_v22, %v2520_v11 }
 0x4ce   : > { %5608 = vmatpush3.bf16.msra.mxu0 %v6148_v63  ;;  %5623 = vmatprep.mubr.msk.bf16.mxu0 %vm6493_vm0, %v6492_v0  ;;  %v4782_v45 = vpack.c.bf16 %v2523_v25, %v2524_v26 }
 0x4cf   : > { %5630 = vmatpush3.bf16.msra.mxu1 %v6149_v56  ;;  %5609 = vmatprep.subr.bf16.mxu0 %v6492_v0 }
 0x4d0   : > { %5631 = vmatprep.subr.bf16.mxu1 %v6492_v0 }
 0x4d2   : > { %5610 = vmatpush3.bf16.msra.mxu0 %v6150_v5 }
 0x4d3   : > { %5632 = vmatpush3.bf16.msra.mxu1 %v6151_v6  ;;  %5611 = vmatprep.subr.bf16.mxu0 %v6492_v0 }
 0x4d4   : > { %5633 = vmatprep.subr.bf16.mxu1 %v6492_v0 }
 0x4d6   : > { %5612 = vmatpush3.bf16.msra.mxu0 %v6152_v7 }
 0x4d7   : > { %5634 = vmatpush3.bf16.msra.mxu1 %v6153_v62  ;;  %5613 = vmatprep.subr.bf16.mxu0 %v6492_v0  ;;  %v4784_v62 = vld [vmem:[%s7299_s4 + $0x4] ss:$0 sm:$0xff] }
 0x4d8   : > { %5635 = vmatprep.subr.bf16.mxu1 %v6492_v0 }
 0x4da   : > { %5614 = vmatpush3.bf16.msra.mxu0 %v6154_v8 }
 0x4db   : > { %5636 = vmatpush3.bf16.msra.mxu1 %v6155_v9  ;;  %5615 = vmatprep.subr.bf16.mxu0 %v6492_v0 }
 0x4dc   : > { %5637 = vmatprep.subr.bf16.mxu1 %v6492_v0 }
 0x4de   : > { %5616 = vmatpush3.bf16.msra.mxu0 %v6156_v10 }
 0x4df   : > { %5638 = vmatpush3.bf16.msra.mxu1 %v6157_v12  ;;  %5617 = vmatprep.subr.bf16.mxu0 %v6492_v0 }
 0x4e0   : > { %5639 = vmatprep.subr.bf16.mxu1 %v6492_v0 }
 0x4e2   : > { %5618 = vmatpush3.bf16.msra.mxu0 %v6158_v15 }
 0x4e3   : > { %5640 = vmatpush3.bf16.msra.mxu1 %v6159_v41  ;;  %5619 = vmatprep.subr.bf16.mxu0 %v6492_v0 }
 0x4e4   : > { %5641 = vmatprep.subr.bf16.mxu1 %v6492_v0 }
 0x4e6   : > { %5620 = vmatpush3.bf16.msra.mxu0 %v6160_v18 }
 0x4e7   : > { %5642 = vmatpush3.bf16.msra.mxu1 %v6161_v21  ;;  %5621 = vmatprep.subr.bf16.mxu0 %v6492_v0 }
 0x4e8   : > { %5667 = vmatprep.subr.bf16.mxu1 %v6492_v0 }
 0x4ea   : > { %5622 = vmatpush3.bf16.msra.mxu0 %v6162_v23  ;;  %5644 = vmatmul.mubr.bf16.vlgmr.msra.gmra.mxu1 %v2644_v13 }
 0x4eb   : > { %5647 = vmatprep.subr.bf16.mxu0 %v6492_v0  ;;  %5683 = vmatprep.mubr.msk.bf16.mxu1 %vm6493_vm0, %v6492_v0 }
 0x4ec   : > { %5668 = vmatpush3.bf16.msra.mxu1 %v6163_v28 }
 0x4ed   : > { %5624 = vmatmul.mubr.msk.bf16.vlgmr.msra.gmra.mxu0 %vm7016_vm1, %v4782_v45  ;;  %5669 = vmatprep.subr.bf16.mxu1 %v6492_v0  ;;  %v6179_v45 = vld [vmem:[#allocation7 + $0x278] sm:$0xff]  }
 0x4ee   : > { %5663 = vmatprep.mubr.msk.bf16.mxu0 %vm6493_vm0, %v6492_v0  ;;  %5648 = vmatpush3.bf16.msra.mxu0 %v6164_v29 }
 0x4ef   : > { %5649 = vmatprep.subr.bf16.mxu0 %v6492_v0 }
 0x4f0   : > { %5670 = vmatpush3.bf16.msra.mxu1 %v6165_v30 }
 0x4f1   : > { %5671 = vmatprep.subr.bf16.mxu1 %v6492_v0 }
 0x4f2   : > { %5650 = vmatpush3.bf16.msra.mxu0 %v6166_v46 }
 0x4f3   : > { %5651 = vmatprep.subr.bf16.mxu0 %v6492_v0 }
 0x4f4   : > { %5672 = vmatpush3.bf16.msra.mxu1 %v6167_v31 }
 0x4f5   : > { %5673 = vmatprep.subr.bf16.mxu1 %v6492_v0 }
 0x4f6   : > { %5652 = vmatpush3.bf16.msra.mxu0 %v6168_v32 }
 0x4f7   : > { %5653 = vmatprep.subr.bf16.mxu0 %v6492_v0 }
 0x4f8   : > { %5674 = vmatpush3.bf16.msra.mxu1 %v6169_v33  ;;  %v6180_v33 = vld [vmem:[#allocation7 + $0x238] sm:$0xff]  }
 0x4f9   : > { %5675 = vmatprep.subr.bf16.mxu1 %v6492_v0 }
 0x4fa   : > { %5654 = vmatpush3.bf16.msra.mxu0 %v6170_v34 }
 0x4fb   : > { %5655 = vmatprep.subr.bf16.mxu0 %v6492_v0 }
 0x4fc   : > { %5676 = vmatpush3.bf16.msra.mxu1 %v6171_v35 }
 0x4fd   : > { %5677 = vmatprep.subr.bf16.mxu1 %v6492_v0 }
 0x4fe   : > { %5656 = vmatpush3.bf16.msra.mxu0 %v6172_v36  ;;  %v6181_v36 = vld [vmem:[#allocation7 + $0x270] sm:$0xff]  }
 0x4ff   : > { %5657 = vmatprep.subr.bf16.mxu0 %v6492_v0 }
 0x500   : > { %5678 = vmatpush3.bf16.msra.mxu1 %v6173_v19  ;;  %v6182_v19 = vld [vmem:[#allocation7 + $0x230] sm:$0xff]  }
 0x501   : > { %5679 = vmatprep.subr.bf16.mxu1 %v6492_v0 }
 0x502   : > { %5658 = vmatpush3.bf16.msra.mxu0 %v6174_v37 }
 0x503   : > { %5659 = vmatprep.subr.bf16.mxu0 %v6492_v0 }
 0x504   : > { %5680 = vmatpush3.bf16.msra.mxu1 %v6175_v40  ;;  %v6183_v40 = vld [vmem:[#allocation7 + $0x268] sm:$0xff]  }
 0x505   : > { %5681 = vmatprep.subr.bf16.mxu1 %v6492_v0 }
 0x506   : > { %5660 = vmatpush3.bf16.msra.mxu0 %v6176_v42 }
 0x507   : > { %5661 = vmatprep.subr.bf16.mxu0 %v6492_v0 }
 0x508   : > { %5682 = vmatpush3.bf16.msra.mxu1 %v6177_v43  ;;  %v6184_v43 = vld [vmem:[#allocation7 + $0x228] sm:$0xff]  }
 0x509   : > { %5707 = vmatprep.subr.bf16.mxu1 %v6492_v0 }
 0x50a   : > { %5662 = vmatpush3.bf16.msra.mxu0 %v6178_v44 }
 0x50b   : > { %5687 = vmatprep.subr.bf16.mxu0 %v6492_v0 }
 0x58a   : > { %v2482_v47 = vpop.f32.mrf.mxu1 }
 0x58c   : > { %v5605_v51 = vpop.f32.mrf.mxu1 }
 0x58d   : > { %v2367_v52 = vpop.f32.mrf.mxu0 }
 0x58e   : > { %v2380_v50 = vadd.f32 %v4761_v48, %v2367_v52  ;;  %v2485_v53 = vpop.f32.mrf.mxu1  ;;  %v6187_v52 = vld [vmem:[#allocation7 + $0x258] sm:$0xff]  }
 0x58f   : > { %v5585_v54 = vpop.f32.mrf.mxu0 }
 0x590   : > { %v2489_v55 = vadd.f32 %v2482_v47, %v2380_v50  ;;  %v5606_v57 = vpop.f32.mrf.mxu1 }
 0x591   : > { %v2370_v58 = vpop.f32.mrf.mxu0  ;;  %v6190_v57 = vld [vmem:[#allocation7 + $0x210] sm:$0xff]  }
 0x592   : > { %v2491_v59 = vmax.f32 %v2489_v55, 0.0  ;;  %v2381_v60 = vadd.f32 %v4761_v48, %v2370_v58  ;;  %v6186_v48 = vld [vmem:[#allocation7 + $0x220] sm:$0xff]   ;;  %v6189_v55 = vld [vmem:[#allocation7 + $0x250] sm:$0xff]   ;;  %v6191_v58 = vld [vmem:[#allocation7 + $0x248] sm:$0xff]  }
 0x593   : > { %v5586_v61 = vpop.f32.mrf.mxu0 }
 0x594   : > { %v4770_v63 = vmul.f32 -1.442695, %v2491_v59  ;;  %v2490_v1 = vadd.f32 %v2485_v53, %v2381_v60  ;;  %v6188_v53 = vld [vmem:[#allocation7 + $0x218] sm:$0xff]   ;;  %v6192_v59 = vld [vmem:[#allocation7 + $0x208] sm:$0xff]   ;;  %v6193_v60 = vld [vmem:[#allocation7 + $0x240] sm:$0xff]  }
 0x596   : > { %6299 = vpow2.f32 %v4770_v63  ;;  %v2492_v2 = vmax.f32 %v2490_v1, 0.0  ;;  %v6194_v63 = vld [vmem:[#allocation7 + $0x200] sm:$0xff]  }
 0x598   : > { %v4771_v56 = vmul.f32 -1.442695, %v2492_v2 }
 0x59a   : > { %6301 = vpow2.f32 %v4771_v56 }
 0x5a3   : > { %v6300_v3 = vpop.eup %6299 }
 0x5a4   : > { %v2499_v4 = vadd.f32 1.0, %v6300_v3 }
 0x5a6   : > { %6303 = vrcp.f32 %v2499_v4  ;;  %v6217_v4 = vld [vmem:[#allocation5 + $0x360] sm:$0xff]  }
 0x5a7   : > { %v6302_v5 = vpop.eup %6301 }
 0x5a8   : > { %v2500_v6 = vadd.f32 1.0, %v6302_v5 }
 0x5aa   : > { %6305 = vrcp.f32 %v2500_v6  ;;  %v2744_v7 = vpop.f32.mrf.mxu1  ;;  %v6196_v6 = vld [vmem:[#allocation7 + $0x2b8] sm:$0xff]  }
 0x5ac   : > { %v5645_v8 = vpop.f32.mrf.mxu1 }
 0x5ad   : > { %v2629_v9 = vpop.f32.mrf.mxu0  ;;  %v6199_v8 = vld [vmem:[#allocation7 + $0x2e8] sm:$0xff]  }
 0x5ae   : > { %v2642_v10 = vadd.f32 %v4784_v62, %v2629_v9  ;;  %v2747_v12 = vpop.f32.mrf.mxu1  ;;  %v6200_v9 = vld [vmem:[#allocation7 + $0x2a8] sm:$0xff]  }
 0x5af   : > { %v5625_v14 = vpop.f32.mrf.mxu0 }
 0x5b0   : > { %v2751_v15 = vadd.f32 %v2744_v7, %v2642_v10  ;;  %v5646_v16 = vpop.f32.mrf.mxu1  ;;  %v6197_v7 = vld [vmem:[#allocation7 + $0x2f0] sm:$0xff]   ;;  %v6201_v10 = vld [vmem:[#allocation7 + $0x2e0] sm:$0xff]   ;;  %v6203_v14 = vld [vmem:[#allocation7 + $0x2d8] sm:$0xff]  }
 0x5b1   : > { %v2632_v41 = vpop.f32.mrf.mxu0  ;;  %v6205_v16 = vld [vmem:[#allocation7 + $0x2d0] sm:$0xff]  }
 0x5b2   : > { %v2643_v18 = vadd.f32 %v4784_v62, %v2632_v41  ;;  %v2753_v23 = vmax.f32 %v2751_v15, 0.0  ;;  %v6198_v62 = vld [vmem:[#allocation7 + $0x2b0] sm:$0xff]   ;;  %v6204_v15 = vld [vmem:[#allocation7 + $0x298] sm:$0xff]  }
 0x5b3   : > { %v6304_v21 = vpop.eup %6303  ;;  %v5626_v22 = vpop.f32.mrf.mxu0  ;;  %v6206_v41 = vld [vmem:[#allocation7 + $0x290] sm:$0xff]  }
 0x5b4   : > { %v2752_v11 = vadd.f32 %v2747_v12, %v2643_v18  ;;  %v7050_v25 = vmul.f32 %v6304_v21, %v6890_v17  ;;  %v2757_v28 = vrot.slane %v2753_v23, 4  ;;  %v6202_v12 = vld [vmem:[#allocation7 + $0x2a0] sm:$0xff]   ;;  %v6207_v18 = vld [vmem:[#allocation7 + $0x2c8] sm:$0xff]  }
 0x5b5   : > { %v6208_v21 = vld [vmem:[#allocation7 + $0x288] sm:$0xff]   ;;  %v6209_v22 = vld [vmem:[#allocation7 + $0x2c0] sm:$0xff]  }
 0x5b6   : > { %v2754_v13 = vmax.f32 %v2752_v11, 0.0  ;;  %v2507_v17 = vadd.f32 %v7050_v25, %v6999_v20  ;;  %v3005_v1 = vrot.slane %v7050_v25, 4 }
 0x5b7   : > { %v6306_v26 = vpop.eup %6305 }
 0x5b8   : > { %v2758_v29 = vrot.slane %v2754_v13, 4  ;;  %v2878_v30 = vpack.c.bf16 %v2754_v13, %v2753_v23  ;;  %v7053_v46 = vmul.f32 %v6306_v26, %v6893_v24  ;;  %v6210_v23 = vld [vmem:[#allocation7 + $0x280] sm:$0xff]  }
 0x5ba   : > { %v2759_v31 = vsel %vm2522_vm14, %v2757_v28, %v2758_v29  ;;  %v2760_v32 = vsel %vm2522_vm14, %v2758_v29, %v2757_v28  ;;  %5684 = vmatmul.mubr.bf16.vlgmr.msra.gmra.mxu1 %v2878_v30  ;;  %v2508_v34 = vadd.f32 %v7053_v46, %v6996_v39  ;;  %v3006_v61 = vrot.slane %v7053_v46, 4 }
 0x5bb   : > { %v4803_v35 = vpack.c.bf16 %v2759_v31, %v2760_v32  ;;  %5708 = vmatpush3.bf16.msra.mxu1 %v6179_v45  ;;  %5723 = vmatprep.mubr.msk.bf16.mxu1 %vm6493_vm0, %v6492_v0  ;;  %v3128_v2 = vpack.c.bf16 %v7053_v46, %v7050_v25  ;;  %v4805_v32 = vld [vmem:[%s7299_s4 + $0x5] ss:$0 sm:$0xff] }
 0x5bc   : > { %5709 = vmatprep.subr.bf16.mxu1 %v6492_v0  ;;  %v2509_v24 = vadd.f32 %v2508_v34, %v2507_v17  ;;  %v3007_v56 = vsel %vm2522_vm14, %v3005_v1, %v3006_v61  ;;  %v3008_v3 = vsel %vm2522_vm14, %v3006_v61, %v3005_v1 }
 0x5bd   : > { %5664 = vmatmul.mubr.msk.bf16.vlgmr.msra.gmra.mxu0 %vm7016_vm1, %v4803_v35  ;;  %v4826_v5 = vpack.c.bf16 %v3008_v3, %v3007_v56  ;;  %v6212_v56 = vld [vmem:[#allocation5 + $0x338] sm:$0xff]  }
 0x5be   : > { %5688 = vmatpush3.bf16.msra.mxu0 %v6180_v33  ;;  %5703 = vmatprep.mubr.msk.bf16.mxu0 %vm6493_vm0, %v6492_v0  ;;  %v2510_v37 = vrot.slane %v2509_v24, 4 }
 0x5bf   : > { %5710 = vmatpush3.bf16.msra.mxu1 %v6181_v36  ;;  %5689 = vmatprep.subr.bf16.mxu0 %v6492_v0 }
 0x5c0   : > { %5711 = vmatprep.subr.bf16.mxu1 %v6492_v0  ;;  %v2511_v42 = vadd.f32 %v2510_v37, %v2509_v24  ;;  %v4828_v37 = vld [vmem:[%s7301_s6 + $0x4] ss:$0 sm:$0xff] }
 0x5c2   : > { %5690 = vmatpush3.bf16.msra.mxu0 %v6182_v19  ;;  %v2512_v44 = vrot.slane %v2511_v42, 2 }
 0x5c3   : > { %5712 = vmatpush3.bf16.msra.mxu1 %v6183_v40  ;;  %5691 = vmatprep.subr.bf16.mxu0 %v6492_v0 }
 0x5c4   : > { %5713 = vmatprep.subr.bf16.mxu1 %v6492_v0  ;;  %v2513_v47 = vadd.f32 %v2512_v44, %v2511_v42 }
 0x5c6   : > { %5692 = vmatpush3.bf16.msra.mxu0 %v6184_v43  ;;  %v2514_v51 = vrot.slane %v2513_v47, 1 }
 0x5c7   : > { %5714 = vmatpush3.bf16.msra.mxu1 %v6185_v27  ;;  %5693 = vmatprep.subr.bf16.mxu0 %v6492_v0 }
 0x5c8   : > { %5715 = vmatprep.subr.bf16.mxu1 %v6492_v0  ;;  %v2515_v50 = vadd.f32 %v2514_v51, %v2513_v47 }
 0x5ca   : > { %5694 = vmatpush3.bf16.msra.mxu0 %v6186_v48  ;;  %v2516_v54 = vmul.f32 0.0625, %v2515_v50 }
 0x5cb   : > { %5716 = vmatpush3.bf16.msra.mxu1 %v6187_v52  ;;  %5695 = vmatprep.subr.bf16.mxu0 %v6492_v0 }
 0x5cc   : > { %5717 = vmatprep.subr.bf16.mxu1 %v6492_v0  ;;  %2517 = vst [vmem:[%s6921_s8 + $0x1] sm:$0x1] %v2516_v54 }
 0x5ce   : > { %5696 = vmatpush3.bf16.msra.mxu0 %v6188_v53 }
 0x5cf   : > { %5718 = vmatpush3.bf16.msra.mxu1 %v6189_v55  ;;  %5697 = vmatprep.subr.bf16.mxu0 %v6492_v0 }
 0x5d0   : > { %5719 = vmatprep.subr.bf16.mxu1 %v6492_v0 }
 0x5d2   : > { %5698 = vmatpush3.bf16.msra.mxu0 %v6190_v57 }
 0x5d3   : > { %5720 = vmatpush3.bf16.msra.mxu1 %v6191_v58  ;;  %5699 = vmatprep.subr.bf16.mxu0 %v6492_v0 }
 0x5d4   : > { %5721 = vmatprep.subr.bf16.mxu1 %v6492_v0 }
 0x5d6   : > { %5700 = vmatpush3.bf16.msra.mxu0 %v6192_v59  ;;  %v6211_v59 = vld [vmem:[#allocation5 + $0x378] sm:$0xff]  }
 0x5d7   : > { %5722 = vmatpush3.bf16.msra.mxu1 %v6193_v60  ;;  %5701 = vmatprep.subr.bf16.mxu0 %v6492_v0 }
 0x5d8   : > { %5747 = vmatprep.subr.bf16.mxu1 %v6492_v0 }
 0x5da   : > { %5702 = vmatpush3.bf16.msra.mxu0 %v6194_v63  ;;  %5724 = vmatmul.mubr.bf16.vlgmr.msra.gmra.mxu1 %v3128_v2 }
 0x5db   : > { %5727 = vmatprep.subr.bf16.mxu0 %v6492_v0  ;;  %5763 = vmatprep.mubr.msk.bf16.mxu1 %vm6493_vm0, %v6492_v0 }
 0x5dc   : > { %5748 = vmatpush3.bf16.msra.mxu1 %v6195_v49 }
 0x5dd   : > { %5704 = vmatmul.mubr.msk.bf16.vlgmr.msra.gmra.mxu0 %vm7095_vm4, %v4826_v5  ;;  %5749 = vmatprep.subr.bf16.mxu1 %v6492_v0  ;;  %v6213_v5 = vld [vmem:[#allocation5 + $0x370] sm:$0xff]  }
 0x5de   : > { %5743 = vmatprep.mubr.msk.bf16.mxu0 %vm6493_vm0, %v6492_v0  ;;  %5728 = vmatpush3.bf16.msra.mxu0 %v6196_v6  ;;  %v6214_v6 = vld [vmem:[#allocation5 + $0x330] sm:$0xff]  }
 0x5df   : > { %5729 = vmatprep.subr.bf16.mxu0 %v6492_v0 }
 0x5e0   : > { %5750 = vmatpush3.bf16.msra.mxu1 %v6197_v7  ;;  %v6215_v7 = vld [vmem:[#allocation5 + $0x368] sm:$0xff]  }
 0x5e1   : > { %5751 = vmatprep.subr.bf16.mxu1 %v6492_v0 }
 0x5e2   : > { %5730 = vmatpush3.bf16.msra.mxu0 %v6198_v62 }
 0x5e3   : > { %5731 = vmatprep.subr.bf16.mxu0 %v6492_v0 }
 0x5e4   : > { %5752 = vmatpush3.bf16.msra.mxu1 %v6199_v8 }
 0x5e5   : > { %5753 = vmatprep.subr.bf16.mxu1 %v6492_v0 }
 0x5e6   : > { %5732 = vmatpush3.bf16.msra.mxu0 %v6200_v9  ;;  %v6216_v9 = vld [vmem:[#allocation5 + $0x328] sm:$0xff]  }
 0x5e7   : > { %5733 = vmatprep.subr.bf16.mxu0 %v6492_v0 }
 0x5e8   : > { %5754 = vmatpush3.bf16.msra.mxu1 %v6201_v10  ;;  %v6218_v10 = vld [vmem:[#allocation5 + $0x320] sm:$0xff]  }
 0x5e9   : > { %5755 = vmatprep.subr.bf16.mxu1 %v6492_v0 }
 0x5ea   : > { %5734 = vmatpush3.bf16.msra.mxu0 %v6202_v12  ;;  %v6219_v12 = vld [vmem:[#allocation5 + $0x358] sm:$0xff]  }
 0x5eb   : > { %5735 = vmatprep.subr.bf16.mxu0 %v6492_v0 }
 0x5ec   : > { %5756 = vmatpush3.bf16.msra.mxu1 %v6203_v14  ;;  %v6220_v14 = vld [vmem:[#allocation5 + $0x318] sm:$0xff]  }
 0x5ed   : > { %5757 = vmatprep.subr.bf16.mxu1 %v6492_v0 }
 0x5ee   : > { %5736 = vmatpush3.bf16.msra.mxu0 %v6204_v15  ;;  %v6221_v15 = vld [vmem:[#allocation5 + $0x350] sm:$0xff]  }
 0x5ef   : > { %5737 = vmatprep.subr.bf16.mxu0 %v6492_v0 }
 0x5f0   : > { %5758 = vmatpush3.bf16.msra.mxu1 %v6205_v16  ;;  %v6222_v16 = vld [vmem:[#allocation5 + $0x310] sm:$0xff]  }
 0x5f1   : > { %5759 = vmatprep.subr.bf16.mxu1 %v6492_v0 }
 0x5f2   : > { %5738 = vmatpush3.bf16.msra.mxu0 %v6206_v41  ;;  %v6223_v41 = vld [vmem:[#allocation5 + $0x348] sm:$0xff]  }
 0x5f3   : > { %5739 = vmatprep.subr.bf16.mxu0 %v6492_v0 }
 0x5f4   : > { %5760 = vmatpush3.bf16.msra.mxu1 %v6207_v18 }
 0x5f5   : > { %5761 = vmatprep.subr.bf16.mxu1 %v6492_v0 }
 0x5f6   : > { %5740 = vmatpush3.bf16.msra.mxu0 %v6208_v21  ;;  %v6224_v21 = vld [vmem:[#allocation5 + $0x308] sm:$0xff]  }
 0x5f7   : > { %5741 = vmatprep.subr.bf16.mxu0 %v6492_v0 }
 0x5f8   : > { %5762 = vmatpush3.bf16.msra.mxu1 %v6209_v22 }
 0x5f9   : > { %5787 = vmatprep.subr.bf16.mxu1 %v6492_v0 }
 0x5fa   : > { %5742 = vmatpush3.bf16.msra.mxu0 %v6210_v23  ;;  %v6225_v23 = vld [vmem:[#allocation5 + $0x340] sm:$0xff]  }
 0x5fb   : > { %5767 = vmatprep.subr.bf16.mxu0 %v6492_v0 }
 0x67a   : > { %v2978_v11 = vpop.f32.mrf.mxu1 }
 0x67c   : > { %v5685_v13 = vpop.f32.mrf.mxu1 }
 0x67d   : > { %v2863_v26 = vpop.f32.mrf.mxu0  ;;  %v6226_v13 = vld [vmem:[#allocation5 + $0x300] sm:$0xff]  }
 0x67e   : > { %v2981_v45 = vpop.f32.mrf.mxu1  ;;  %v2876_v17 = vadd.f32 %v4805_v32, %v2863_v26 }
 0x67f   : > { %v5665_v28 = vpop.f32.mrf.mxu0 }
 0x680   : > { %v5686_v29 = vpop.f32.mrf.mxu1  ;;  %v2985_v35 = vadd.f32 %v2978_v11, %v2876_v17  ;;  %v6234_v17 = vld [vmem:[#allocation5 + $0x398] sm:$0xff]  }
 0x681   : > { %v2866_v30 = vpop.f32.mrf.mxu0  ;;  %v6229_v29 = vld [vmem:[#allocation5 + $0x3f8] sm:$0xff]  }
 0x682   : > { %v2877_v33 = vadd.f32 %v4805_v32, %v2866_v30  ;;  %v2987_v24 = vmax.f32 %v2985_v35, 0.0  ;;  %v6230_v30 = vld [vmem:[#allocation5 + $0x3a8] sm:$0xff]   ;;  %v6232_v32 = vld [vmem:[#allocation5 + $0x3a0] sm:$0xff]   ;;  %v6236_v35 = vld [vmem:[#allocation5 + $0x390] sm:$0xff]  }
 0x683   : > { %v5666_v31 = vpop.f32.mrf.mxu0 }
 0x684   : > { %v2986_v34 = vadd.f32 %v2981_v45, %v2877_v33  ;;  %v4814_v44 = vmul.f32 -1.442695, %v2987_v24  ;;  %v6231_v31 = vld [vmem:[#allocation5 + $0x3f0] sm:$0xff]   ;;  %v6233_v33 = vld [vmem:[#allocation5 + $0x3e8] sm:$0xff]  }
 0x685   : > { %v6238_v24 = vld [vmem:[#allocation5 + $0x388] sm:$0xff]  }
 0x686   : > { %v2988_v36 = vmax.f32 %v2986_v34, 0.0  ;;  %v6235_v34 = vld [vmem:[#allocation5 + $0x3e0] sm:$0xff]  }
 0x688   : > { %v4815_v40 = vmul.f32 -1.442695, %v2988_v36  ;;  %v6237_v36 = vld [vmem:[#allocation5 + $0x3d8] sm:$0xff]  }
 0x68a   : > { %6307 = vpow2.f32 %v4815_v40  ;;  %v6241_v40 = vld [vmem:[#allocation5 + $0x3c8] sm:$0xff]  }
 0x68b   : > { %6309 = vpow2.f32 %v4814_v44  ;;  %v4849_v44 = vld [vmem:[%s7301_s6 + $0x5] ss:$0 sm:$0xff] }
 0x697   : > { %v6308_v49 = vpop.eup %6307 }
 0x698   : > { %v6310_v38 = vpop.eup %6309  ;;  %v2996_v62 = vadd.f32 1.0, %v6308_v49  ;;  %v4869_v49 = vld [vmem:[%s7299_s4 + $0x6] ss:$0 sm:$0xff] }
 0x699   : > { %v2995_v8 = vadd.f32 1.0, %v6310_v38 }
 0x69a   : > { %v3228_v19 = vpop.f32.mrf.mxu1  ;;  %6311 = vrcp.f32 %v2996_v62 }
 0x69b   : > { %6313 = vrcp.f32 %v2995_v8 }
 0x69c   : > { %v5725_v42 = vpop.f32.mrf.mxu1 }
 0x69d   : > { %v3113_v43 = vpop.f32.mrf.mxu0  ;;  %v6242_v42 = vld [vmem:[#allocation5 + $0x3c0] sm:$0xff]  }
 0x69e   : > { %v3126_v27 = vadd.f32 %v4828_v37, %v3113_v43  ;;  %v3231_v47 = vpop.f32.mrf.mxu1 }
 0x69f   : > { %v5705_v48 = vpop.f32.mrf.mxu0 }
 0x6a0   : > { %v3235_v51 = vadd.f32 %v3228_v19, %v3126_v27  ;;  %v5726_v52 = vpop.f32.mrf.mxu1  ;;  %v6239_v19 = vld [vmem:[#allocation5 + $0x3d0] sm:$0xff]  }
 0x6a1   : > { %v3116_v50 = vpop.f32.mrf.mxu0 }
 0x6a2   : > { %v3127_v53 = vadd.f32 %v4828_v37, %v3116_v50  ;;  %v3237_v55 = vmax.f32 %v3235_v51, 0.0  ;;  %v6240_v37 = vld [vmem:[#allocation5 + $0x380] sm:$0xff]  }
 0x6a3   : > { %v5706_v54 = vpop.f32.mrf.mxu0 }
 0x6a4   : > { %v3236_v57 = vadd.f32 %v3231_v47, %v3127_v53  ;;  %v3241_v60 = vrot.slane %v3237_v55, 4 }
 0x6a6   : > { %v3238_v58 = vmax.f32 %v3236_v57, 0.0 }
 0x6a7   : > { %v6312_v18 = vpop.eup %6311 }
 0x6a8   : > { %v3242_v61 = vrot.slane %v3238_v58, 4  ;;  %v3362_v63 = vpack.c.bf16 %v3238_v58, %v3237_v55  ;;  %v6314_v22 = vpop.eup %6313  ;;  %v7152_v11 = vmul.f32 %v6312_v18, %v6996_v39  ;;  %v6227_v39 = vld [vmem:[#allocation5 + $0x3b8] sm:$0xff]  }
 0x6a9   : > { %v7155_v26 = vmul.f32 %v6314_v22, %v6999_v20  ;;  %v6228_v20 = vld [vmem:[#allocation5 + $0x3b0] sm:$0xff]  }
 0x6aa   : > { %v3243_v1 = vsel %vm2522_vm14, %v3241_v60, %v3242_v61  ;;  %v3244_v2 = vsel %vm2522_vm14, %v3242_v61, %v3241_v60  ;;  %5764 = vmatmul.mubr.bf16.vlgmr.msra.gmra.mxu1 %v3362_v63 }
 0x6ab   : > { %v4847_v3 = vpack.c.bf16 %v3244_v2, %v3243_v1  ;;  %5788 = vmatpush3.bf16.msra.mxu1 %v6211_v59  ;;  %5803 = vmatprep.mubr.msk.bf16.mxu1 %vm6493_vm0, %v6492_v0  ;;  %v3619_v45 = vpack.c.bf16 %v7152_v11, %v7155_v26  ;;  %v3504_v28 = vpack.c.bf16 %v7155_v26, %v6492_v0 }
 0x6ac   : > { %5789 = vmatprep.subr.bf16.mxu1 %v6492_v0 }
 0x6ad   : > { %5744 = vmatmul.mubr.msk.bf16.vlgmr.msra.gmra.mxu0 %vm7095_vm4, %v4847_v3 }
 0x6ae   : > { %5768 = vmatpush3.bf16.msra.mxu0 %v6212_v56  ;;  %5783 = vmatprep.mubr.msk.bf16.mxu0 %vm6493_vm0, %v6492_v0 }
 0x6af   : > { %5790 = vmatpush3.bf16.msra.mxu1 %v6213_v5  ;;  %5769 = vmatprep.subr.bf16.mxu0 %v6492_v0 }
 0x6b0   : > { %5791 = vmatprep.subr.bf16.mxu1 %v6492_v0 }
 0x6b2   : > { %5770 = vmatpush3.bf16.msra.mxu0 %v6214_v6 }
 0x6b3   : > { %5792 = vmatpush3.bf16.msra.mxu1 %v6215_v7  ;;  %5771 = vmatprep.subr.bf16.mxu0 %v6492_v0 }
 0x6b4   : > { %5793 = vmatprep.subr.bf16.mxu1 %v6492_v0 }
 0x6b6   : > { %5772 = vmatpush3.bf16.msra.mxu0 %v6216_v9 }
 0x6b7   : > { %5794 = vmatpush3.bf16.msra.mxu1 %v6217_v4  ;;  %5773 = vmatprep.subr.bf16.mxu0 %v6492_v0 }
 0x6b8   : > { %5795 = vmatprep.subr.bf16.mxu1 %v6492_v0 }
 0x6ba   : > { %5774 = vmatpush3.bf16.msra.mxu0 %v6218_v10 }
 0x6bb   : > { %5796 = vmatpush3.bf16.msra.mxu1 %v6219_v12  ;;  %5775 = vmatprep.subr.bf16.mxu0 %v6492_v0 }
 0x6bc   : > { %5797 = vmatprep.subr.bf16.mxu1 %v6492_v0 }
 0x6be   : > { %5776 = vmatpush3.bf16.msra.mxu0 %v6220_v14 }
 0x6bf   : > { %5798 = vmatpush3.bf16.msra.mxu1 %v6221_v15  ;;  %5777 = vmatprep.subr.bf16.mxu0 %v6492_v0 }
 0x6c0   : > { %5799 = vmatprep.subr.bf16.mxu1 %v6492_v0 }
 0x6c2   : > { %5778 = vmatpush3.bf16.msra.mxu0 %v6222_v16 }
 0x6c3   : > { %5800 = vmatpush3.bf16.msra.mxu1 %v6223_v41  ;;  %5779 = vmatprep.subr.bf16.mxu0 %v6492_v0  ;;  %v6243_v41 = vld [vmem:[#allocation7 + $0x338] sm:$0xff]  }
 0x6c4   : > { %5801 = vmatprep.subr.bf16.mxu1 %v6492_v0 }
 0x6c6   : > { %5780 = vmatpush3.bf16.msra.mxu0 %v6224_v21 }
 0x6c7   : > { %5802 = vmatpush3.bf16.msra.mxu1 %v6225_v23  ;;  %5781 = vmatprep.subr.bf16.mxu0 %v6492_v0 }
 0x6c8   : > { %5827 = vmatprep.subr.bf16.mxu1 %v6492_v0 }
 0x6ca   : > { %5782 = vmatpush3.bf16.msra.mxu0 %v6226_v13  ;;  %5804 = vmatmul.mubr.bf16.vlgmr.msra.gmra.mxu1 %v3619_v45  ;;  %v6244_v45 = vld [vmem:[#allocation7 + $0x330] sm:$0xff]  }
 0x6cb   : > { %5807 = vmatprep.subr.bf16.mxu0 %v6492_v0  ;;  %5843 = vmatprep.mubr.msk.bf16.mxu1 %vm6493_vm0, %v6492_v0 }
 0x6cc   : > { %5828 = vmatpush3.bf16.msra.mxu1 %v6229_v29 }
 0x6cd   : > { %5784 = vmatmul.mubr.bf16.vlgmr.msra.gmra.mxu0 %v3504_v28  ;;  %5829 = vmatprep.subr.bf16.mxu1 %v6492_v0  ;;  %v6245_v28 = vld [vmem:[#allocation7 + $0x378] sm:$0xff]  }
 0x6ce   : > { %5823 = vmatprep.mubr.msk.bf16.mxu0 %vm6493_vm0, %v6492_v0  ;;  %5808 = vmatpush3.bf16.msra.mxu0 %v6227_v39 }
 0x6cf   : > { %5809 = vmatprep.subr.bf16.mxu0 %v6492_v0 }
 0x6d0   : > { %5830 = vmatpush3.bf16.msra.mxu1 %v6231_v31  ;;  %v6247_v31 = vld [vmem:[#allocation7 + $0x370] sm:$0xff]  }
 0x6d1   : > { %5831 = vmatprep.subr.bf16.mxu1 %v6492_v0 }
 0x6d2   : > { %5810 = vmatpush3.bf16.msra.mxu0 %v6228_v20 }
 0x6d3   : > { %5811 = vmatprep.subr.bf16.mxu0 %v6492_v0 }
 0x6d4   : > { %5832 = vmatpush3.bf16.msra.mxu1 %v6233_v33  ;;  %v6248_v33 = vld [vmem:[#allocation7 + $0x320] sm:$0xff]  }
 0x6d5   : > { %5833 = vmatprep.subr.bf16.mxu1 %v6492_v0 }
 0x6d6   : > { %5812 = vmatpush3.bf16.msra.mxu0 %v6230_v30  ;;  %v6246_v30 = vld [vmem:[#allocation7 + $0x328] sm:$0xff]  }
 0x6d7   : > { %5813 = vmatprep.subr.bf16.mxu0 %v6492_v0 }
 0x6d8   : > { %5834 = vmatpush3.bf16.msra.mxu1 %v6235_v34 }
 0x6d9   : > { %5835 = vmatprep.subr.bf16.mxu1 %v6492_v0 }
 0x6da   : > { %5814 = vmatpush3.bf16.msra.mxu0 %v6232_v32 }
 0x6db   : > { %5815 = vmatprep.subr.bf16.mxu0 %v6492_v0 }
 0x6dc   : > { %5836 = vmatpush3.bf16.msra.mxu1 %v6237_v36  ;;  %v6250_v36 = vld [vmem:[#allocation7 + $0x318] sm:$0xff]  }
 0x6dd   : > { %5837 = vmatprep.subr.bf16.mxu1 %v6492_v0 }
 0x6de   : > { %5816 = vmatpush3.bf16.msra.mxu0 %v6234_v17  ;;  %v6249_v17 = vld [vmem:[#allocation7 + $0x368] sm:$0xff]  }
 0x6df   : > { %5817 = vmatprep.subr.bf16.mxu0 %v6492_v0 }
 0x6e0   : > { %5838 = vmatpush3.bf16.msra.mxu1 %v6239_v19 }
 0x6e1   : > { %5839 = vmatprep.subr.bf16.mxu1 %v6492_v0 }
 0x6e2   : > { %5818 = vmatpush3.bf16.msra.mxu0 %v6236_v35 }
 0x6e3   : > { %5819 = vmatprep.subr.bf16.mxu0 %v6492_v0 }
 0x6e4   : > { %5840 = vmatpush3.bf16.msra.mxu1 %v6241_v40  ;;  %v6252_v40 = vld [vmem:[#allocation7 + $0x310] sm:$0xff]  }
 0x6e5   : > { %5841 = vmatprep.subr.bf16.mxu1 %v6492_v0 }
 0x6e6   : > { %5820 = vmatpush3.bf16.msra.mxu0 %v6238_v24  ;;  %v6251_v24 = vld [vmem:[#allocation7 + $0x360] sm:$0xff]  }
 0x6e7   : > { %5821 = vmatprep.subr.bf16.mxu0 %v6492_v0 }
 0x6e8   : > { %5842 = vmatpush3.bf16.msra.mxu1 %v6242_v42  ;;  %v6253_v42 = vld [vmem:[#allocation7 + $0x358] sm:$0xff]  }
 0x6e9   : > { %5867 = vmatprep.subr.bf16.mxu1 %v6492_v0 }
 0x6ea   : > { %5822 = vmatpush3.bf16.msra.mxu0 %v6240_v37 }
 0x6eb   : > { %5847 = vmatprep.subr.bf16.mxu0 %v6492_v0 }
 0x76a   : > { %v3462_v43 = vpop.f32.mrf.mxu1 }
 0x76c   : > { %v5765_v27 = vpop.f32.mrf.mxu1 }
 0x76d   : > { %v3347_v47 = vpop.f32.mrf.mxu0  ;;  %v6254_v27 = vld [vmem:[#allocation7 + $0x308] sm:$0xff]  }
 0x76e   : > { %v3360_v48 = vadd.f32 %v4849_v44, %v3347_v47  ;;  %v3465_v51 = vpop.f32.mrf.mxu1  ;;  %v6255_v47 = vld [vmem:[#allocation7 + $0x350] sm:$0xff]  }
 0x76f   : > { %v5745_v52 = vpop.f32.mrf.mxu0 }
 0x770   : > { %v3469_v50 = vadd.f32 %v3462_v43, %v3360_v48  ;;  %v5766_v53 = vpop.f32.mrf.mxu1  ;;  %v6256_v48 = vld [vmem:[#allocation7 + $0x300] sm:$0xff]  }
 0x771   : > { %v3350_v54 = vpop.f32.mrf.mxu0  ;;  %v6258_v52 = vld [vmem:[#allocation7 + $0x340] sm:$0xff]  }
 0x772   : > { %v3471_v55 = vmax.f32 %v3469_v50, 0.0  ;;  %v3361_v57 = vadd.f32 %v4849_v44, %v3350_v54  ;;  %v6259_v54 = vld [vmem:[#allocation7 + $0x3b8] sm:$0xff]  }
 0x773   : > { %v5746_v58 = vpop.f32.mrf.mxu0 }
 0x774   : > { %v4858_v59 = vmul.f32 -1.442695, %v3471_v55  ;;  %v3470_v60 = vadd.f32 %v3465_v51, %v3361_v57  ;;  %v6257_v51 = vld [vmem:[#allocation7 + $0x348] sm:$0xff]   ;;  %v6260_v55 = vld [vmem:[#allocation7 + $0x3f8] sm:$0xff]   ;;  %v6261_v57 = vld [vmem:[#allocation7 + $0x3b0] sm:$0xff]  }
 0x775   : > { %v6262_v58 = vld [vmem:[#allocation7 + $0x3f0] sm:$0xff]  }
 0x776   : > { %6315 = vpow2.f32 %v4858_v59  ;;  %v3472_v61 = vmax.f32 %v3470_v60, 0.0  ;;  %v6263_v59 = vld [vmem:[#allocation7 + $0x3a8] sm:$0xff]  }
 0x777   : > { %v6264_v60 = vld [vmem:[#allocation7 + $0x3e8] sm:$0xff]  }
 0x778   : > { %v4859_v63 = vmul.f32 -1.442695, %v3472_v61  ;;  %v6265_v61 = vld [vmem:[#allocation7 + $0x3a0] sm:$0xff]  }
 0x77a   : > { %6317 = vpow2.f32 %v4859_v63  ;;  %v6266_v63 = vld [vmem:[#allocation7 + $0x3e0] sm:$0xff]  }
 0x783   : > { %v6316_v1 = vpop.eup %6315 }
 0x784   : > { %v3479_v2 = vadd.f32 1.0, %v6316_v1  ;;  %v6267_v1 = vld [vmem:[#allocation7 + $0x398] sm:$0xff]  }
 0x786   : > { %6319 = vrcp.f32 %v3479_v2  ;;  %v6268_v2 = vld [vmem:[#allocation7 + $0x3d8] sm:$0xff]  }
 0x787   : > { %v6318_v56 = vpop.eup %6317 }
 0x788   : > { %v3480_v3 = vadd.f32 1.0, %v6318_v56  ;;  %v6269_v56 = vld [vmem:[#allocation7 + $0x390] sm:$0xff]  }
 0x78a   : > { %6321 = vrcp.f32 %v3480_v3  ;;  %v3719_v5 = vpop.f32.mrf.mxu1  ;;  %v6270_v3 = vld [vmem:[#allocation7 + $0x3d0] sm:$0xff]  }
 0x78c   : > { %v5805_v6 = vpop.f32.mrf.mxu1 }
 0x78d   : > { %v3604_v38 = vpop.f32.mrf.mxu0  ;;  %v6273_v6 = vld [vmem:[#allocation7 + $0x380] sm:$0xff]  }
 0x78e   : > { %v3617_v7 = vadd.f32 %v4869_v49, %v3604_v38  ;;  %v3722_v62 = vpop.f32.mrf.mxu1  ;;  %v6274_v38 = vld [vmem:[#allocation7 + $0x3c0] sm:$0xff]  }
 0x78f   : > { %v5785_v8 = vpop.f32.mrf.mxu0 }
 0x790   : > { %v3726_v9 = vadd.f32 %v3719_v5, %v3617_v7  ;;  %v5806_v4 = vpop.f32.mrf.mxu1  ;;  %v6271_v5 = vld [vmem:[#allocation7 + $0x388] sm:$0xff]   ;;  %v4887_v7 = vld [vmem:[%s7299_s4 + $0x7] ss:$0 sm:$0xff] }
 0x791   : > { %v3607_v10 = vpop.f32.mrf.mxu0 }
 0x792   : > { %v3728_v12 = vmax.f32 %v3726_v9, 0.0  ;;  %v3618_v14 = vadd.f32 %v4869_v49, %v3607_v10  ;;  %v6272_v49 = vld [vmem:[#allocation7 + $0x3c8] sm:$0xff]  }
 0x793   : > { %v6320_v15 = vpop.eup %6319  ;;  %v5786_v16 = vpop.f32.mrf.mxu0 }
 0x794   : > { %v3734_v18 = vpack.c.bf16 %v3728_v12, %v6492_v0  ;;  %v3727_v21 = vadd.f32 %v3722_v62, %v3618_v14  ;;  %v7192_v23 = vmul.f32 %v6320_v15, %v7050_v25 }
 0x796   : > { %v3729_v22 = vmax.f32 %v3727_v21, 0.0  ;;  %5824 = vmatmul.mubr.bf16.vlgmr.msra.gmra.mxu0 %v3734_v18  ;;  %v3487_v29 = vadd.f32 %v7192_v23, %v7155_v26 }
 0x797   : > { %v6322_v13 = vpop.eup %6321  ;;  %5848 = vmatpush3.bf16.msra.mxu0 %v6243_v41  ;;  %5863 = vmatprep.mubr.msk.bf16.mxu0 %vm6493_vm0, %v6492_v0 }
 0x798   : > { %v3849_v39 = vpack.c.bf16 %v3729_v22, %v3728_v12  ;;  %5849 = vmatprep.subr.bf16.mxu0 %v6492_v0  ;;  %v7198_v20 = vmul.f32 %v6322_v13, %v7053_v46  ;;  %v4907_v13 = vld [vmem:[%s7301_s6 + $0x6] ss:$0 sm:$0xff] }
 0x79a   : > { %5844 = vmatmul.mubr.bf16.vlgmr.msra.gmra.mxu1 %v3849_v39  ;;  %v3488_v25 = vadd.f32 %v7198_v20, %v7152_v11  ;;  %v3980_v50 = vpack.c.bf16 %v6492_v0, %v7198_v20  ;;  %v4095_v53 = vpack.c.bf16 %v7198_v20, %v7192_v23 }
 0x79b   : > { %5850 = vmatpush3.bf16.msra.mxu0 %v6244_v45  ;;  %5868 = vmatpush3.bf16.msra.mxu1 %v6245_v28 }
 0x79c   : > { %5851 = vmatprep.subr.bf16.mxu0 %v6492_v0  ;;  %5869 = vmatprep.subr.bf16.mxu1 %v6492_v0  ;;  %v3489_v32 = vadd.f32 %v3488_v25, %v3487_v29 }
 0x79d   : > { %5883 = vmatprep.mubr.msk.bf16.mxu1 %vm6493_vm0, %v6492_v0 }
 0x79e   : > { %v3490_v46 = vrot.slane %v3489_v32, 4 }
 0x79f   : > { %5852 = vmatpush3.bf16.msra.mxu0 %v6246_v30  ;;  %5870 = vmatpush3.bf16.msra.mxu1 %v6247_v31 }
 0x7a0   : > { %5853 = vmatprep.subr.bf16.mxu0 %v6492_v0  ;;  %5871 = vmatprep.subr.bf16.mxu1 %v6492_v0  ;;  %v3491_v34 = vadd.f32 %v3490_v46, %v3489_v32 }
 0x7a2   : > { %v3492_v35 = vrot.slane %v3491_v34, 2 }
 0x7a3   : > { %5854 = vmatpush3.bf16.msra.mxu0 %v6248_v33  ;;  %5872 = vmatpush3.bf16.msra.mxu1 %v6249_v17 }
 0x7a4   : > { %5855 = vmatprep.subr.bf16.mxu0 %v6492_v0  ;;  %5873 = vmatprep.subr.bf16.mxu1 %v6492_v0  ;;  %v3493_v19 = vadd.f32 %v3492_v35, %v3491_v34 }
 0x7a6   : > { %v3494_v37 = vrot.slane %v3493_v19, 1 }
 0x7a7   : > { %5856 = vmatpush3.bf16.msra.mxu0 %v6250_v36  ;;  %5874 = vmatpush3.bf16.msra.mxu1 %v6251_v24 }
 0x7a8   : > { %5857 = vmatprep.subr.bf16.mxu0 %v6492_v0  ;;  %5875 = vmatprep.subr.bf16.mxu1 %v6492_v0  ;;  %v3495_v43 = vadd.f32 %v3494_v37, %v3493_v19  ;;  %v4925_v37 = vld [vmem:[%s7301_s6 + $0x7] ss:$0 sm:$0xff] }
 0x7aa   : > { %v3496_v44 = vmul.f32 0.0625, %v3495_v43 }
 0x7ab   : > { %5858 = vmatpush3.bf16.msra.mxu0 %v6252_v40  ;;  %5876 = vmatpush3.bf16.msra.mxu1 %v6253_v42 }
 0x7ac   : > { %5859 = vmatprep.subr.bf16.mxu0 %v6492_v0  ;;  %5877 = vmatprep.subr.bf16.mxu1 %v6492_v0  ;;  %3497 = vst [vmem:[%s6921_s8 + $0x2] sm:$0x1] %v3496_v44 }
 0x7af   : > { %5860 = vmatpush3.bf16.msra.mxu0 %v6254_v27  ;;  %5878 = vmatpush3.bf16.msra.mxu1 %v6255_v47 }
 0x7b0   : > { %5861 = vmatprep.subr.bf16.mxu0 %v6492_v0  ;;  %5879 = vmatprep.subr.bf16.mxu1 %v6492_v0 }
 0x7b3   : > { %5862 = vmatpush3.bf16.msra.mxu0 %v6256_v48  ;;  %5880 = vmatpush3.bf16.msra.mxu1 %v6257_v51 }
 0x7b4   : > { %5881 = vmatprep.subr.bf16.mxu1 %v6492_v0  ;;  %5887 = vmatprep.subr.bf16.mxu0 %v6492_v0 }
 0x7b6   : > { %5864 = vmatmul.mubr.bf16.vlgmr.msra.gmra.mxu0 %v3980_v50 }
 0x7b7   : > { %5882 = vmatpush3.bf16.msra.mxu1 %v6258_v52  ;;  %5903 = vmatprep.mubr.msk.bf16.mxu0 %vm6493_vm0, %v6492_v0 }
 0x7b8   : > { %5907 = vmatprep.subr.bf16.mxu1 %v6492_v0  ;;  %5888 = vmatpush3.bf16.msra.mxu0 %v6259_v54 }
 0x7b9   : > { %5889 = vmatprep.subr.bf16.mxu0 %v6492_v0 }
 0x7ba   : > { %5884 = vmatmul.mubr.bf16.vlgmr.msra.gmra.mxu1 %v4095_v53 }
 0x7bb   : > { %5923 = vmatprep.mubr.msk.bf16.mxu1 %vm6493_vm0, %v6492_v0  ;;  %5908 = vmatpush3.bf16.msra.mxu1 %v6260_v55 }
 0x7bc   : > { %5909 = vmatprep.subr.bf16.mxu1 %v6492_v0  ;;  %5890 = vmatpush3.bf16.msra.mxu0 %v6261_v57 }
 0x7bd   : > { %5891 = vmatprep.subr.bf16.mxu0 %v6492_v0 }
 0x7bf   : > { %5910 = vmatpush3.bf16.msra.mxu1 %v6262_v58 }
 0x7c0   : > { %5911 = vmatprep.subr.bf16.mxu1 %v6492_v0  ;;  %5892 = vmatpush3.bf16.msra.mxu0 %v6263_v59 }
 0x7c1   : > { %5893 = vmatprep.subr.bf16.mxu0 %v6492_v0 }
 0x7c3   : > { %5912 = vmatpush3.bf16.msra.mxu1 %v6264_v60 }
 0x7c4   : > { %5913 = vmatprep.subr.bf16.mxu1 %v6492_v0  ;;  %5894 = vmatpush3.bf16.msra.mxu0 %v6265_v61 }
 0x7c5   : > { %5895 = vmatprep.subr.bf16.mxu0 %v6492_v0 }
 0x7c7   : > { %5914 = vmatpush3.bf16.msra.mxu1 %v6266_v63 }
 0x7c8   : > { %5915 = vmatprep.subr.bf16.mxu1 %v6492_v0  ;;  %5896 = vmatpush3.bf16.msra.mxu0 %v6267_v1 }
 0x7c9   : > { %5897 = vmatprep.subr.bf16.mxu0 %v6492_v0 }
 0x7cb   : > { %5916 = vmatpush3.bf16.msra.mxu1 %v6268_v2 }
 0x7cc   : > { %5917 = vmatprep.subr.bf16.mxu1 %v6492_v0  ;;  %5898 = vmatpush3.bf16.msra.mxu0 %v6269_v56 }
 0x7cd   : > { %5899 = vmatprep.subr.bf16.mxu0 %v6492_v0 }
 0x7cf   : > { %5918 = vmatpush3.bf16.msra.mxu1 %v6270_v3 }
 0x7d0   : > { %5919 = vmatprep.subr.bf16.mxu1 %v6492_v0  ;;  %5900 = vmatpush3.bf16.msra.mxu0 %v6271_v5 }
 0x7d1   : > { %5901 = vmatprep.subr.bf16.mxu0 %v6492_v0 }
 0x7d3   : > { %5920 = vmatpush3.bf16.msra.mxu1 %v6272_v49 }
 0x7d4   : > { %5921 = vmatprep.subr.bf16.mxu1 %v6492_v0  ;;  %5902 = vmatpush3.bf16.msra.mxu0 %v6273_v6 }
 0x7d7   : > { %5922 = vmatpush3.bf16.msra.mxu1 %v6274_v38 }
 0x856   : > { %v3834_v62 = vpop.f32.mrf.mxu0 }
 0x857   : > { %v3847_v9 = vadd.f32 %v4887_v7, %v3834_v62 }
 0x858   : > { %v5825_v8 = vpop.f32.mrf.mxu0 }
 0x85a   : > { %v3837_v4 = vpop.f32.mrf.mxu0  ;;  %v3949_v10 = vpop.f32.mrf.mxu1 }
 0x85b   : > { %v3956_v12 = vadd.f32 %v3949_v10, %v3847_v9  ;;  %v3848_v16 = vadd.f32 %v4887_v7, %v3837_v4 }
 0x85c   : > { %v5826_v14 = vpop.f32.mrf.mxu0  ;;  %v5845_v15 = vpop.f32.mrf.mxu1 }
 0x85d   : > { %v3958_v19 = vmax.f32 %v3956_v12, 0.0 }
 0x85e   : > { %v3952_v41 = vpop.f32.mrf.mxu1 }
 0x85f   : > { %v3957_v18 = vadd.f32 %v3952_v41, %v3848_v16  ;;  %v4896_v27 = vmul.f32 -1.442695, %v3958_v19 }
 0x860   : > { %v5846_v21 = vpop.f32.mrf.mxu1 }
 0x861   : > { %v3959_v40 = vmax.f32 %v3957_v18, 0.0  ;;  %6323 = vpow2.f32 %v4896_v27 }
 0x863   : > { %v4897_v51 = vmul.f32 -1.442695, %v3959_v40 }
 0x865   : > { %6325 = vpow2.f32 %v4897_v51 }
 0x86e   : > { %v6324_v63 = vpop.eup %6323 }
 0x86f   : > { %v3966_v56 = vadd.f32 1.0, %v6324_v63 }
 0x872   : > { %v6326_v1 = vpop.eup %6325 }
 0x873   : > { %v3967_v3 = vadd.f32 1.0, %v6326_v1 }
 0x876   : > { %v4080_v22 = vpop.f32.mrf.mxu0 }
 0x877   : > { %v4093_v29 = vadd.f32 %v4907_v13, %v4080_v22 }
 0x878   : > { %v5865_v45 = vpop.f32.mrf.mxu0 }
 0x87a   : > { %v4083_v28 = vpop.f32.mrf.mxu0  ;;  %v4195_v39 = vpop.f32.mrf.mxu1 }
 0x87b   : > { %v4094_v31 = vadd.f32 %v4907_v13, %v4083_v28  ;;  %v4202_v32 = vadd.f32 %v4195_v39, %v4093_v29 }
 0x87c   : > { %v5866_v25 = vpop.f32.mrf.mxu0  ;;  %v5885_v30 = vpop.f32.mrf.mxu1 }
 0x87d   : > { %v4204_v34 = vmax.f32 %v4202_v32, 0.0 }
 0x87e   : > { %v4198_v46 = vpop.f32.mrf.mxu1 }
 0x87f   : > { %v4203_v33 = vadd.f32 %v4198_v46, %v4094_v31 }
 0x880   : > { %v5886_v17 = vpop.f32.mrf.mxu1 }
 0x881   : > { %v4205_v35 = vmax.f32 %v4203_v33, 0.0 }
 0x883   : > { %v4210_v36 = vpack.c.bf16 %v6492_v0, %v4205_v35  ;;  %v4325_v24 = vpack.c.bf16 %v4205_v35, %v4204_v34 }
 0x885   : > { %5904 = vmatmul.mubr.bf16.vlgmr.msra.gmra.mxu0 %v4210_v36  ;;  %5924 = vmatmul.mubr.bf16.vlgmr.msra.gmra.mxu1 %v4325_v24 }
 0x945   : > { %v4310_v42 = vpop.f32.mrf.mxu0  ;;  %v4425_v43 = vpop.f32.mrf.mxu1 }
 0x946   : > { %v4323_v44 = vadd.f32 %v4925_v37, %v4310_v42 }
 0x947   : > { %v5905_v47 = vpop.f32.mrf.mxu0  ;;  %v5925_v48 = vpop.f32.mrf.mxu1 }
 0x948   : > { %v4432_v52 = vadd.f32 %v4425_v43, %v4323_v44 }
 0x949   : > { %v4313_v50 = vpop.f32.mrf.mxu0  ;;  %v4428_v53 = vpop.f32.mrf.mxu1 }
 0x94a   : > { %v4434_v0 = vmax.f32 %v4432_v52, 0.0  ;;  %v4324_v54 = vadd.f32 %v4925_v37, %v4313_v50 }
 0x94b   : > { %v5906_v55 = vpop.f32.mrf.mxu0  ;;  %v5926_v57 = vpop.f32.mrf.mxu1 }
 0x94c   : > { %v4934_v58 = vmul.f32 -1.442695, %v4434_v0  ;;  %v4433_v59 = vadd.f32 %v4428_v53, %v4324_v54 }
 0x94e   : > { %6327 = vpow2.f32 %v4934_v58  ;;  %v4435_v60 = vmax.f32 %v4433_v59, 0.0 }
 0x950   : > { %v4935_v61 = vmul.f32 -1.442695, %v4435_v60 }
 0x952   : > { %6329 = vpow2.f32 %v4935_v61 }
 0x95b   : > { %v6328_v2 = vpop.eup %6327 }
 0x95c   : > { %v4442_v5 = vadd.f32 1.0, %v6328_v2 }
 0x95e   : > { %6331 = vrcp.f32 %v4442_v5 }
 0x95f   : > { %v6330_v49 = vpop.eup %6329  ;;  %6333 = vrcp.f32 %v3966_v56 }
 0x960   : > { %6335 = vrcp.f32 %v3967_v3  ;;  %v4443_v6 = vadd.f32 1.0, %v6330_v49 }
 0x962   : > { %6337 = vrcp.f32 %v4443_v6 }
 0x96b   : > { %v6332_v38 = vpop.eup %6331 }
 0x96c   : > { %v6334_v7 = vpop.eup %6333  ;;  %v4448_v8 = vmul.f32 %v6332_v38, %v7192_v23 }
 0x96d   : > { %v6336_v62 = vpop.eup %6335  ;;  %v3972_v4 = vmul.f32 %v6334_v7, %v7155_v26 }
 0x96e   : > { %v3973_v10 = vmul.f32 %v6336_v62, %v7152_v11 }
 0x96f   : > { %v6338_v9 = vpop.eup %6337  ;;  %v4450_v14 = vadd.f32 %v4448_v8, %v3972_v4 }
 0x970   : > { %v4449_v12 = vmul.f32 %v6338_v9, %v7198_v20 }
 0x972   : > { %v4451_v15 = vadd.f32 %v4449_v12, %v3973_v10 }
 0x974   : > { %v4452_v16 = vadd.f32 %v4451_v15, %v4450_v14 }
 0x976   : > { %v4453_v41 = vrot.slane %v4452_v16, 4 }
 0x978   : > { %v4454_v18 = vadd.f32 %v4453_v41, %v4452_v16 }
 0x97a   : > { %v4455_v21 = vrot.slane %v4454_v18, 2 }
 0x97c   : > { %v4456_v22 = vadd.f32 %v4455_v21, %v4454_v18 }
 0x97e   : > { %v4457_v13 = vrot.slane %v4456_v22, 1 }
 0x980   : > { %v4458_v23 = vadd.f32 %v4457_v13, %v4456_v22 }
 0x982   : > { %v4459_v45 = vmul.f32 0.0625, %v4458_v23 }
 0x984   : > { %4460 = vst [vmem:[%s6921_s8 + $0x3] sm:$0x1] %v4459_v45 }
 0x985   : > { %6430 = shalt.err (!%p6427_p0)
}
 0x986   : > { %s6431_s16 = scalar_lea.hbm %s4473_s17, 64  ;;  %s6435_s18 = scalar_lea.hbm %s7302_s7, 128 }
 0x987   : > { %p6432_p6 = scmp.ne.s32.totalorder %s4473_s17, %s6431_s16  ;;  %p6436_p1 = scmp.lt.s32.totalorder %s4473_s17, %s7302_s7 }
 0x988   : > { %p6437_p5 = scmp.lt.s32.totalorder %s6435_s18, %s6431_s16 }
 0x989   : > { %p6433_p9 = pnand %p6432_p6, %p7325_p3 }
 0x98a   : > { %p6438_p10 = por %p6437_p5, %p6436_p1 }
 0x98b   : > { %p6434_p13 = pneg %p6433_p9 }
 0x98d   : > { %p6439_p12 = pnand %p6438_p10, %p6434_p13 }
 0x98f   : > { %6442 = shalt.err (!%p6439_p12)
}
 0x990   : > { %5939 = dma.vmem_to_hbm [thread:$0]  (%p7325_p3), %s4476_s29, 64, %s4473_s17, %s4462_s15  }
 0x991 PF: > { %p5961_p2 = scmp.ge.s32.totalorder %s6485_s27, 2  ;;  %s4487_s9 = sand.u32 1, %s6473_s24  }
 0x992   : > { %p7326_p4 = scmp.ne.s32.totalorder %s7306_s12, 0  ;;  %s4488_s14 = scalar_lea.sflag [#allocation4], %s4487_s9 }
 0x994   : > { %p5952_p7 = pnand %p5961_p2, %p7326_p4 }
 0x996   : > { %p5953_p8 = pneg %p5952_p7 }
 0x998   : > { %6468 = dma.done.wait (%p5953_p8), %s4488_s14, 64  }
 0x999   : > { %6470 = vsyncadd (%p5953_p8), %s4488_s14, 4294967232  ;;  %p19_p11 = scmp.ge.s32.totalorder %s6561_s30, 4   ;;  %s7327_s24 = smov %s6477_s25 }
 0x99a   : > { %s7328_s25 = smov %s6481_s26  ;;  %s7329_s26 = smov %s6572_s10 }
 0x99b   : > { %s7330_s27 = smov %s6561_s30  ;;  %21 = sbr.rel (!%p19_p11) target bundleno = 5 (0x5), region = 142 }
 0x9a0   :  { %4493 = vsyncpa [#allocation3], 1 }
 0x9a1   :  { %4495 = vsyncpa [#allocation3 + $0x1], 1 }
 0x9a2   :  { %4496 = vsyncpa [#allocation6], 1 }
 0x9a3   :  { %4497 = vsyncpa [#allocation4], 1 }
 0x9a4   :  { %4499 = vsyncpa [#allocation4 + $0x1], 1 }

</bundles_post_ra>
